<compile_context>
chip_gen: v7x
topology: tpu7x:2x2x1
jax: 0.10.0
libtpu: 0.0.40
codegen_flags: <defaults>
</compile_context>

<pallas_src>
import functools

import jax
import jax.numpy as jnp
import numpy as np
from jax.experimental import pallas as pl
from jax.experimental.pallas import tpu as pltpu

EPS = 1e-5


def _make_kernel(C, K, Hp, Wp, Lq, inv_cnt, activation):
    # static per-tap lane offsets in the flattened padded frame
    taps = [i * Hp * Wp + j * Wp + l
            for i in range(K) for j in range(K) for l in range(K)]

    def kernel(x_ref, mask_ref, wdw_ref, wpw_ref, g1_ref, b1_ref,
               g2_ref, b2_ref, out_ref):
        xin = x_ref[...]          # (C, N*Lp) loaded once, kept in vregs
        mask = mask_ref[...]      # (1, Lq)   1.0 at valid output positions

        # ---- depthwise 3D conv: K^3 static lane-shifted views of xin -------
        acc = xin[:, taps[0]:taps[0] + Lq] * wdw_ref[:, 0:1]
        for t in range(1, K ** 3):
            off = taps[t]
            acc = acc + xin[:, off:off + Lq] * wdw_ref[:, t:t + 1]
        # dwconv bias omitted: per-channel constant cancels in BN1 mean subtraction.

        # ---- BN1 (single-pass batch stats, biased var) + ReLU ---------------
        am = acc * mask
        s1 = jnp.sum(am, axis=1, keepdims=True)            # (C, 1)
        s2 = jnp.sum(am * acc, axis=1, keepdims=True)      # (C, 1)
        mean1 = s1 * inv_cnt
        var1 = s2 * inv_cnt - mean1 * mean1
        scale1 = g1_ref[...] * jax.lax.rsqrt(var1 + EPS)   # (C, 1)
        shift1 = b1_ref[...] - mean1 * scale1
        y = jnp.maximum(acc * scale1 + shift1, 0.0)

        # ---- pointwise (1,1,1) conv: channel mixing, unrolled on the VPU ----
        z = wpw_ref[:, 0:1] * y[0:1, :]
        for ci in range(1, C):
            z = z + wpw_ref[:, ci:ci + 1] * y[ci:ci + 1, :]
        # pwconv bias omitted (cancels in BN2, same argument as above).

        # ---- BN2 (single-pass) + optional ReLU -------------------------------
        zm = z * mask
        s1b = jnp.sum(zm, axis=1, keepdims=True)
        s2b = jnp.sum(zm * z, axis=1, keepdims=True)
        mean2 = s1b * inv_cnt
        var2 = s2b * inv_cnt - mean2 * mean2
        scale2 = g2_ref[...] * jax.lax.rsqrt(var2 + EPS)
        shift2 = b2_ref[...] - mean2 * scale2
        out = z * scale2 + shift2
        if activation:
            out = jnp.maximum(out, 0.0)

        out_ref[...] = out        # lane-dense (C, Lq) store

    return kernel


def _full_spec(shape):
    n = len(shape)
    return pl.BlockSpec(shape, lambda i, _n=n: (0,) * _n)


@functools.partial(jax.jit, static_argnames=("k", "p", "activation"))
def conv_bn_depthwise(x_ncdhw, params, *, k, p, activation=True):
    """Forward pass of ConvBNDepthWise. x_ncdhw: (N, C, D, H, W) float32."""
    N, C, D, H, W = x_ncdhw.shape
    Dp, Hp, Wp = D + 2 * p, H + 2 * p, W + 2 * p
    Do, Ho, Wo = Dp - k + 1, Hp - k + 1, Wp - k + 1
    Lp = Dp * Hp * Wp                                  # padded frame per sample
    Lq = (N - 1) * Lp + (Do - 1) * Hp * Wp + (Ho - 1) * Wp + Wo
    cnt = N * Do * Ho * Wo                             # valid positions per channel

    # glue: NCDHW -> zero-pad spatial -> (C, N*Lp) lane-dense layout
    xpad = jnp.pad(x_ncdhw.astype(jnp.float32),
                   ((0, 0), (0, 0), (p, p), (p, p), (p, p)))
    x2d = jnp.transpose(xpad, (1, 0, 2, 3, 4)).reshape(C, N * Lp)

    # glue: validity mask over the flattened padded output frame (BN stats must
    # only count real output voxels, not padded/wrapped positions)
    q = jnp.arange(Lq, dtype=jnp.int32)
    rem = q % Lp
    dd = rem // (Hp * Wp)
    hh = (rem % (Hp * Wp)) // Wp
    ww = rem % Wp
    mask = ((dd < Do) & (hh < Ho) & (ww < Wo)).astype(jnp.float32).reshape(1, Lq)

    # glue: kernel-friendly parameter layouts (channel on rows)
    wdw = params["dw_w"].reshape(C, k * k * k).astype(jnp.float32)   # (C, k^3)
    wpw = params["pw_w"].astype(jnp.float32)                         # (cout, cin)
    g1 = params["dw_gamma"].reshape(C, 1).astype(jnp.float32)
    b1 = params["dw_beta"].reshape(C, 1).astype(jnp.float32)
    g2 = params["pw_gamma"].reshape(C, 1).astype(jnp.float32)
    b2 = params["pw_beta"].reshape(C, 1).astype(jnp.float32)

    kernel = _make_kernel(C, k, Hp, Wp, Lq, 1.0 / cnt, activation)
    ins = (x2d, mask, wdw, wpw, g1, b1, g2, b2)

    out2d = pl.pallas_call(
        kernel,
        out_shape=jax.ShapeDtypeStruct((C, Lq), jnp.float32),
        grid=(1,),
        in_specs=[_full_spec(a.shape) for a in ins],
        out_specs=_full_spec((C, Lq)),
        compiler_params=pltpu.CompilerParams(
            dimension_semantics=("arbitrary",),
            vmem_limit_bytes=32 * 1024 * 1024),
    )(*ins)

    # glue: (C, Lq) padded-frame output -> (N, C, Do, Ho, Wo)
    out_full = jnp.pad(out2d, ((0, 0), (0, N * Lp - Lq)))
    out5 = out_full.reshape(C, N, Dp, Hp, Wp)[:, :, :Do, :Ho, :Wo]
    return jnp.transpose(out5, (1, 0, 2, 3, 4))


def reference(x, params, *, k, p, activation=True):
    """Pure-JAX reference mirroring the PyTorch module (training-mode BN)."""
    C = x.shape[1]
    hp = jax.lax.Precision.HIGHEST

    def bn(t, gamma, beta):
        m = jnp.mean(t, axis=(0, 2, 3, 4), keepdims=True)
        v = jnp.mean(jnp.square(t - m), axis=(0, 2, 3, 4), keepdims=True)
        t = (t - m) * jax.lax.rsqrt(v + EPS)
        return t * gamma.reshape(1, C, 1, 1, 1) + beta.reshape(1, C, 1, 1, 1)

    wdw = params["dw_w"][:, None]  # (C, 1, k, k, k)
    y = jax.lax.conv_general_dilated(
        x, wdw, (1, 1, 1), [(p, p)] * 3,
        dimension_numbers=("NCDHW", "OIDHW", "NCDHW"),
        feature_group_count=C, precision=hp)
    y = y + params["dw_b"].reshape(1, C, 1, 1, 1)
    y = jnp.maximum(bn(y, params["dw_gamma"], params["dw_beta"]), 0.0)

    wpw = params["pw_w"].reshape(C, C, 1, 1, 1)
    z = jax.lax.conv_general_dilated(
        y, wpw, (1, 1, 1), [(0, 0)] * 3,
        dimension_numbers=("NCDHW", "OIDHW", "NCDHW"), precision=hp)
    z = z + params["pw_b"].reshape(1, C, 1, 1, 1)
    z = bn(z, params["pw_gamma"], params["pw_beta"])
    if activation:
        z = jnp.maximum(z, 0.0)
    return z


if __name__ == "__main__":
    cin, k, p = 4, 3, 1
    N, D, H, W = 2, 8, 8, 8

    key = jax.random.PRNGKey(0)
    ks = jax.random.split(key, 9)
    params = {
        "dw_w": 0.3 * jax.random.normal(ks[0], (cin, k, k, k), jnp.float32),
        "dw_b": 0.1 * jax.random.normal(ks[1], (cin,), jnp.float32),
        "dw_gamma": 1.0 + 0.1 * jax.random.normal(ks[2], (cin,), jnp.float32),
        "dw_beta": 0.1 * jax.random.normal(ks[3], (cin,), jnp.float32),
        "pw_w": 0.3 * jax.random.normal(ks[4], (cin, cin), jnp.float32),  # (cout, cin)
        "pw_b": 0.1 * jax.random.normal(ks[5], (cin,), jnp.float32),
        "pw_gamma": 1.0 + 0.1 * jax.random.normal(ks[6], (cin,), jnp.float32),
        "pw_beta": 0.1 * jax.random.normal(ks[7], (cin,), jnp.float32),
    }
    x = jax.random.normal(ks[8], (N, cin, D, H, W), jnp.float32)

    out = conv_bn_depthwise(x, params, k=k, p=p, activation=True)
    out = jax.block_until_ready(out)

    ref = jax.block_until_ready(reference(x, params, k=k, p=p, activation=True))
    np.testing.assert_allclose(np.asarray(out), np.asarray(ref),
                               atol=1e-3, rtol=1e-3)

    print("KERNEL_OK")
</pallas_src>

<mosaic_0001>
module attributes {stable_mosaic.version = 11 : i64} {
  func.func @kernel(%arg0: i32, %arg1: memref<4x2000xf32, #tpu.memory_space<vmem>>, %arg2: memref<1x1778xf32, #tpu.memory_space<vmem>>, %arg3: memref<4x27xf32, #tpu.memory_space<vmem>>, %arg4: memref<4x4xf32, #tpu.memory_space<vmem>>, %arg5: memref<4x1xf32, #tpu.memory_space<vmem>>, %arg6: memref<4x1xf32, #tpu.memory_space<vmem>>, %arg7: memref<4x1xf32, #tpu.memory_space<vmem>>, %arg8: memref<4x1xf32, #tpu.memory_space<vmem>>, %arg9: memref<4x1778xf32, #tpu.memory_space<vmem>>) attributes {dimension_semantics = [#tpu.dimension_semantics<arbitrary>], iteration_bounds = array<i64: 1>, scalar_prefetch = 0 : i64, scratch_operands = 0 : i64, tpu.core_type = #tpu.core_type<tc>, window_params = [{pipeline_mode = #tpu.pipeline_mode<synchronous>, transform_indices = @transform_0, window_bounds = array<i64: 4, 2000>}, {pipeline_mode = #tpu.pipeline_mode<synchronous>, transform_indices = @transform_1, window_bounds = array<i64: 1, 1778>}, {pipeline_mode = #tpu.pipeline_mode<synchronous>, transform_indices = @transform_2, window_bounds = array<i64: 4, 27>}, {pipeline_mode = #tpu.pipeline_mode<synchronous>, transform_indices = @transform_3, window_bounds = array<i64: 4, 4>}, {pipeline_mode = #tpu.pipeline_mode<synchronous>, transform_indices = @transform_4, window_bounds = array<i64: 4, 1>}, {pipeline_mode = #tpu.pipeline_mode<synchronous>, transform_indices = @transform_5, window_bounds = array<i64: 4, 1>}, {pipeline_mode = #tpu.pipeline_mode<synchronous>, transform_indices = @transform_6, window_bounds = array<i64: 4, 1>}, {pipeline_mode = #tpu.pipeline_mode<synchronous>, transform_indices = @transform_7, window_bounds = array<i64: 4, 1>}, {pipeline_mode = #tpu.pipeline_mode<synchronous>, transform_indices = @transform_8, window_bounds = array<i64: 4, 1778>}]} {
    %c0 = arith.constant 0 : index
    %c0_0 = arith.constant 0 : index
    %0 = vector.load %arg1[%c0, %c0_0] : memref<4x2000xf32, #tpu.memory_space<vmem>>, vector<4x2000xf32>
    %c0_1 = arith.constant 0 : index
    %c0_2 = arith.constant 0 : index
    %1 = vector.load %arg2[%c0_1, %c0_2] : memref<1x1778xf32, #tpu.memory_space<vmem>>, vector<1x1778xf32>
    %2 = vector.extract_strided_slice %0 {offsets = [0, 0], sizes = [4, 1778], strides = [1, 1]} : vector<4x2000xf32> to vector<4x1778xf32>
    %c0_3 = arith.constant 0 : index
    %c0_4 = arith.constant 0 : index
    %3 = vector.load %arg3[%c0_3, %c0_4] : memref<4x27xf32, #tpu.memory_space<vmem>>, vector<4x1xf32>
    %4 = vector.broadcast %3 : vector<4x1xf32> to vector<4x1778xf32>
    %5 = arith.mulf %2, %4 : vector<4x1778xf32>
    %6 = vector.extract_strided_slice %0 {offsets = [0, 1], sizes = [4, 1778], strides = [1, 1]} : vector<4x2000xf32> to vector<4x1778xf32>
    %c0_5 = arith.constant 0 : index
    %c1 = arith.constant 1 : index
    %7 = vector.load %arg3[%c0_5, %c1] : memref<4x27xf32, #tpu.memory_space<vmem>>, vector<4x1xf32>
    %8 = vector.broadcast %7 : vector<4x1xf32> to vector<4x1778xf32>
    %9 = arith.mulf %6, %8 : vector<4x1778xf32>
    %10 = arith.addf %5, %9 : vector<4x1778xf32>
    %11 = vector.extract_strided_slice %0 {offsets = [0, 2], sizes = [4, 1778], strides = [1, 1]} : vector<4x2000xf32> to vector<4x1778xf32>
    %c0_6 = arith.constant 0 : index
    %c2 = arith.constant 2 : index
    %12 = vector.load %arg3[%c0_6, %c2] : memref<4x27xf32, #tpu.memory_space<vmem>>, vector<4x1xf32>
    %13 = vector.broadcast %12 : vector<4x1xf32> to vector<4x1778xf32>
    %14 = arith.mulf %11, %13 : vector<4x1778xf32>
    %15 = arith.addf %10, %14 : vector<4x1778xf32>
    %16 = vector.extract_strided_slice %0 {offsets = [0, 10], sizes = [4, 1778], strides = [1, 1]} : vector<4x2000xf32> to vector<4x1778xf32>
    %c0_7 = arith.constant 0 : index
    %c3 = arith.constant 3 : index
    %17 = vector.load %arg3[%c0_7, %c3] : memref<4x27xf32, #tpu.memory_space<vmem>>, vector<4x1xf32>
    %18 = vector.broadcast %17 : vector<4x1xf32> to vector<4x1778xf32>
    %19 = arith.mulf %16, %18 : vector<4x1778xf32>
    %20 = arith.addf %15, %19 : vector<4x1778xf32>
    %21 = vector.extract_strided_slice %0 {offsets = [0, 11], sizes = [4, 1778], strides = [1, 1]} : vector<4x2000xf32> to vector<4x1778xf32>
    %c0_8 = arith.constant 0 : index
    %c4 = arith.constant 4 : index
    %22 = vector.load %arg3[%c0_8, %c4] : memref<4x27xf32, #tpu.memory_space<vmem>>, vector<4x1xf32>
    %23 = vector.broadcast %22 : vector<4x1xf32> to vector<4x1778xf32>
    %24 = arith.mulf %21, %23 : vector<4x1778xf32>
    %25 = arith.addf %20, %24 : vector<4x1778xf32>
    %26 = vector.extract_strided_slice %0 {offsets = [0, 12], sizes = [4, 1778], strides = [1, 1]} : vector<4x2000xf32> to vector<4x1778xf32>
    %c0_9 = arith.constant 0 : index
    %c5 = arith.constant 5 : index
    %27 = vector.load %arg3[%c0_9, %c5] : memref<4x27xf32, #tpu.memory_space<vmem>>, vector<4x1xf32>
    %28 = vector.broadcast %27 : vector<4x1xf32> to vector<4x1778xf32>
    %29 = arith.mulf %26, %28 : vector<4x1778xf32>
    %30 = arith.addf %25, %29 : vector<4x1778xf32>
    %31 = vector.extract_strided_slice %0 {offsets = [0, 20], sizes = [4, 1778], strides = [1, 1]} : vector<4x2000xf32> to vector<4x1778xf32>
    %c0_10 = arith.constant 0 : index
    %c6 = arith.constant 6 : index
    %32 = vector.load %arg3[%c0_10, %c6] : memref<4x27xf32, #tpu.memory_space<vmem>>, vector<4x1xf32>
    %33 = vector.broadcast %32 : vector<4x1xf32> to vector<4x1778xf32>
    %34 = arith.mulf %31, %33 : vector<4x1778xf32>
    %35 = arith.addf %30, %34 : vector<4x1778xf32>
    %36 = vector.extract_strided_slice %0 {offsets = [0, 21], sizes = [4, 1778], strides = [1, 1]} : vector<4x2000xf32> to vector<4x1778xf32>
    %c0_11 = arith.constant 0 : index
    %c7 = arith.constant 7 : index
    %37 = vector.load %arg3[%c0_11, %c7] : memref<4x27xf32, #tpu.memory_space<vmem>>, vector<4x1xf32>
    %38 = vector.broadcast %37 : vector<4x1xf32> to vector<4x1778xf32>
    %39 = arith.mulf %36, %38 : vector<4x1778xf32>
    %40 = arith.addf %35, %39 : vector<4x1778xf32>
    %41 = vector.extract_strided_slice %0 {offsets = [0, 22], sizes = [4, 1778], strides = [1, 1]} : vector<4x2000xf32> to vector<4x1778xf32>
    %c0_12 = arith.constant 0 : index
    %c8 = arith.constant 8 : index
    %42 = vector.load %arg3[%c0_12, %c8] : memref<4x27xf32, #tpu.memory_space<vmem>>, vector<4x1xf32>
    %43 = vector.broadcast %42 : vector<4x1xf32> to vector<4x1778xf32>
    %44 = arith.mulf %41, %43 : vector<4x1778xf32>
    %45 = arith.addf %40, %44 : vector<4x1778xf32>
    %46 = vector.extract_strided_slice %0 {offsets = [0, 100], sizes = [4, 1778], strides = [1, 1]} : vector<4x2000xf32> to vector<4x1778xf32>
    %c0_13 = arith.constant 0 : index
    %c9 = arith.constant 9 : index
    %47 = vector.load %arg3[%c0_13, %c9] : memref<4x27xf32, #tpu.memory_space<vmem>>, vector<4x1xf32>
    %48 = vector.broadcast %47 : vector<4x1xf32> to vector<4x1778xf32>
    %49 = arith.mulf %46, %48 : vector<4x1778xf32>
    %50 = arith.addf %45, %49 : vector<4x1778xf32>
    %51 = vector.extract_strided_slice %0 {offsets = [0, 101], sizes = [4, 1778], strides = [1, 1]} : vector<4x2000xf32> to vector<4x1778xf32>
    %c0_14 = arith.constant 0 : index
    %c10 = arith.constant 10 : index
    %52 = vector.load %arg3[%c0_14, %c10] : memref<4x27xf32, #tpu.memory_space<vmem>>, vector<4x1xf32>
    %53 = vector.broadcast %52 : vector<4x1xf32> to vector<4x1778xf32>
    %54 = arith.mulf %51, %53 : vector<4x1778xf32>
    %55 = arith.addf %50, %54 : vector<4x1778xf32>
    %56 = vector.extract_strided_slice %0 {offsets = [0, 102], sizes = [4, 1778], strides = [1, 1]} : vector<4x2000xf32> to vector<4x1778xf32>
    %c0_15 = arith.constant 0 : index
    %c11 = arith.constant 11 : index
    %57 = vector.load %arg3[%c0_15, %c11] : memref<4x27xf32, #tpu.memory_space<vmem>>, vector<4x1xf32>
    %58 = vector.broadcast %57 : vector<4x1xf32> to vector<4x1778xf32>
    %59 = arith.mulf %56, %58 : vector<4x1778xf32>
    %60 = arith.addf %55, %59 : vector<4x1778xf32>
    %61 = vector.extract_strided_slice %0 {offsets = [0, 110], sizes = [4, 1778], strides = [1, 1]} : vector<4x2000xf32> to vector<4x1778xf32>
    %c0_16 = arith.constant 0 : index
    %c12 = arith.constant 12 : index
    %62 = vector.load %arg3[%c0_16, %c12] : memref<4x27xf32, #tpu.memory_space<vmem>>, vector<4x1xf32>
    %63 = vector.broadcast %62 : vector<4x1xf32> to vector<4x1778xf32>
    %64 = arith.mulf %61, %63 : vector<4x1778xf32>
    %65 = arith.addf %60, %64 : vector<4x1778xf32>
    %66 = vector.extract_strided_slice %0 {offsets = [0, 111], sizes = [4, 1778], strides = [1, 1]} : vector<4x2000xf32> to vector<4x1778xf32>
    %c0_17 = arith.constant 0 : index
    %c13 = arith.constant 13 : index
    %67 = vector.load %arg3[%c0_17, %c13] : memref<4x27xf32, #tpu.memory_space<vmem>>, vector<4x1xf32>
    %68 = vector.broadcast %67 : vector<4x1xf32> to vector<4x1778xf32>
    %69 = arith.mulf %66, %68 : vector<4x1778xf32>
    %70 = arith.addf %65, %69 : vector<4x1778xf32>
    %71 = vector.extract_strided_slice %0 {offsets = [0, 112], sizes = [4, 1778], strides = [1, 1]} : vector<4x2000xf32> to vector<4x1778xf32>
    %c0_18 = arith.constant 0 : index
    %c14 = arith.constant 14 : index
    %72 = vector.load %arg3[%c0_18, %c14] : memref<4x27xf32, #tpu.memory_space<vmem>>, vector<4x1xf32>
    %73 = vector.broadcast %72 : vector<4x1xf32> to vector<4x1778xf32>
    %74 = arith.mulf %71, %73 : vector<4x1778xf32>
    %75 = arith.addf %70, %74 : vector<4x1778xf32>
    %76 = vector.extract_strided_slice %0 {offsets = [0, 120], sizes = [4, 1778], strides = [1, 1]} : vector<4x2000xf32> to vector<4x1778xf32>
    %c0_19 = arith.constant 0 : index
    %c15 = arith.constant 15 : index
    %77 = vector.load %arg3[%c0_19, %c15] : memref<4x27xf32, #tpu.memory_space<vmem>>, vector<4x1xf32>
    %78 = vector.broadcast %77 : vector<4x1xf32> to vector<4x1778xf32>
    %79 = arith.mulf %76, %78 : vector<4x1778xf32>
    %80 = arith.addf %75, %79 : vector<4x1778xf32>
    %81 = vector.extract_strided_slice %0 {offsets = [0, 121], sizes = [4, 1778], strides = [1, 1]} : vector<4x2000xf32> to vector<4x1778xf32>
    %c0_20 = arith.constant 0 : index
    %c16 = arith.constant 16 : index
    %82 = vector.load %arg3[%c0_20, %c16] : memref<4x27xf32, #tpu.memory_space<vmem>>, vector<4x1xf32>
    %83 = vector.broadcast %82 : vector<4x1xf32> to vector<4x1778xf32>
    %84 = arith.mulf %81, %83 : vector<4x1778xf32>
    %85 = arith.addf %80, %84 : vector<4x1778xf32>
    %86 = vector.extract_strided_slice %0 {offsets = [0, 122], sizes = [4, 1778], strides = [1, 1]} : vector<4x2000xf32> to vector<4x1778xf32>
    %c0_21 = arith.constant 0 : index
    %c17 = arith.constant 17 : index
    %87 = vector.load %arg3[%c0_21, %c17] : memref<4x27xf32, #tpu.memory_space<vmem>>, vector<4x1xf32>
    %88 = vector.broadcast %87 : vector<4x1xf32> to vector<4x1778xf32>
    %89 = arith.mulf %86, %88 : vector<4x1778xf32>
    %90 = arith.addf %85, %89 : vector<4x1778xf32>
    %91 = vector.extract_strided_slice %0 {offsets = [0, 200], sizes = [4, 1778], strides = [1, 1]} : vector<4x2000xf32> to vector<4x1778xf32>
    %c0_22 = arith.constant 0 : index
    %c18 = arith.constant 18 : index
    %92 = vector.load %arg3[%c0_22, %c18] : memref<4x27xf32, #tpu.memory_space<vmem>>, vector<4x1xf32>
    %93 = vector.broadcast %92 : vector<4x1xf32> to vector<4x1778xf32>
    %94 = arith.mulf %91, %93 : vector<4x1778xf32>
    %95 = arith.addf %90, %94 : vector<4x1778xf32>
    %96 = vector.extract_strided_slice %0 {offsets = [0, 201], sizes = [4, 1778], strides = [1, 1]} : vector<4x2000xf32> to vector<4x1778xf32>
    %c0_23 = arith.constant 0 : index
    %c19 = arith.constant 19 : index
    %97 = vector.load %arg3[%c0_23, %c19] : memref<4x27xf32, #tpu.memory_space<vmem>>, vector<4x1xf32>
    %98 = vector.broadcast %97 : vector<4x1xf32> to vector<4x1778xf32>
    %99 = arith.mulf %96, %98 : vector<4x1778xf32>
    %100 = arith.addf %95, %99 : vector<4x1778xf32>
    %101 = vector.extract_strided_slice %0 {offsets = [0, 202], sizes = [4, 1778], strides = [1, 1]} : vector<4x2000xf32> to vector<4x1778xf32>
    %c0_24 = arith.constant 0 : index
    %c20 = arith.constant 20 : index
    %102 = vector.load %arg3[%c0_24, %c20] : memref<4x27xf32, #tpu.memory_space<vmem>>, vector<4x1xf32>
    %103 = vector.broadcast %102 : vector<4x1xf32> to vector<4x1778xf32>
    %104 = arith.mulf %101, %103 : vector<4x1778xf32>
    %105 = arith.addf %100, %104 : vector<4x1778xf32>
    %106 = vector.extract_strided_slice %0 {offsets = [0, 210], sizes = [4, 1778], strides = [1, 1]} : vector<4x2000xf32> to vector<4x1778xf32>
    %c0_25 = arith.constant 0 : index
    %c21 = arith.constant 21 : index
    %107 = vector.load %arg3[%c0_25, %c21] : memref<4x27xf32, #tpu.memory_space<vmem>>, vector<4x1xf32>
    %108 = vector.broadcast %107 : vector<4x1xf32> to vector<4x1778xf32>
    %109 = arith.mulf %106, %108 : vector<4x1778xf32>
    %110 = arith.addf %105, %109 : vector<4x1778xf32>
    %111 = vector.extract_strided_slice %0 {offsets = [0, 211], sizes = [4, 1778], strides = [1, 1]} : vector<4x2000xf32> to vector<4x1778xf32>
    %c0_26 = arith.constant 0 : index
    %c22 = arith.constant 22 : index
    %112 = vector.load %arg3[%c0_26, %c22] : memref<4x27xf32, #tpu.memory_space<vmem>>, vector<4x1xf32>
    %113 = vector.broadcast %112 : vector<4x1xf32> to vector<4x1778xf32>
    %114 = arith.mulf %111, %113 : vector<4x1778xf32>
    %115 = arith.addf %110, %114 : vector<4x1778xf32>
    %116 = vector.extract_strided_slice %0 {offsets = [0, 212], sizes = [4, 1778], strides = [1, 1]} : vector<4x2000xf32> to vector<4x1778xf32>
    %c0_27 = arith.constant 0 : index
    %c23 = arith.constant 23 : index
    %117 = vector.load %arg3[%c0_27, %c23] : memref<4x27xf32, #tpu.memory_space<vmem>>, vector<4x1xf32>
    %118 = vector.broadcast %117 : vector<4x1xf32> to vector<4x1778xf32>
    %119 = arith.mulf %116, %118 : vector<4x1778xf32>
    %120 = arith.addf %115, %119 : vector<4x1778xf32>
    %121 = vector.extract_strided_slice %0 {offsets = [0, 220], sizes = [4, 1778], strides = [1, 1]} : vector<4x2000xf32> to vector<4x1778xf32>
    %c0_28 = arith.constant 0 : index
    %c24 = arith.constant 24 : index
    %122 = vector.load %arg3[%c0_28, %c24] : memref<4x27xf32, #tpu.memory_space<vmem>>, vector<4x1xf32>
    %123 = vector.broadcast %122 : vector<4x1xf32> to vector<4x1778xf32>
    %124 = arith.mulf %121, %123 : vector<4x1778xf32>
    %125 = arith.addf %120, %124 : vector<4x1778xf32>
    %126 = vector.extract_strided_slice %0 {offsets = [0, 221], sizes = [4, 1778], strides = [1, 1]} : vector<4x2000xf32> to vector<4x1778xf32>
    %c0_29 = arith.constant 0 : index
    %c25 = arith.constant 25 : index
    %127 = vector.load %arg3[%c0_29, %c25] : memref<4x27xf32, #tpu.memory_space<vmem>>, vector<4x1xf32>
    %128 = vector.broadcast %127 : vector<4x1xf32> to vector<4x1778xf32>
    %129 = arith.mulf %126, %128 : vector<4x1778xf32>
    %130 = arith.addf %125, %129 : vector<4x1778xf32>
    %131 = vector.extract_strided_slice %0 {offsets = [0, 222], sizes = [4, 1778], strides = [1, 1]} : vector<4x2000xf32> to vector<4x1778xf32>
    %c0_30 = arith.constant 0 : index
    %c26 = arith.constant 26 : index
    %132 = vector.load %arg3[%c0_30, %c26] : memref<4x27xf32, #tpu.memory_space<vmem>>, vector<4x1xf32>
    %133 = vector.broadcast %132 : vector<4x1xf32> to vector<4x1778xf32>
    %134 = arith.mulf %131, %133 : vector<4x1778xf32>
    %135 = arith.addf %130, %134 : vector<4x1778xf32>
    %136 = vector.broadcast %1 : vector<1x1778xf32> to vector<4x1778xf32>
    %137 = arith.mulf %135, %136 : vector<4x1778xf32>
    %cst = arith.constant dense<0.000000e+00> : vector<4xf32>
    %138 = vector.multi_reduction <add>, %137, %cst [1] : vector<4x1778xf32> to vector<4xf32>
    %139 = vector.shape_cast %138 : vector<4xf32> to vector<4x1xf32>
    %140 = arith.mulf %137, %135 : vector<4x1778xf32>
    %cst_31 = arith.constant dense<0.000000e+00> : vector<4xf32>
    %141 = vector.multi_reduction <add>, %140, %cst_31 [1] : vector<4x1778xf32> to vector<4xf32>
    %142 = vector.shape_cast %141 : vector<4xf32> to vector<4x1xf32>
    %cst_32 = arith.constant 9.765625E-4 : f32
    %143 = vector.broadcast %cst_32 : f32 to vector<4x1xf32>
    %144 = arith.mulf %139, %143 : vector<4x1xf32>
    %cst_33 = arith.constant 9.765625E-4 : f32
    %145 = vector.broadcast %cst_33 : f32 to vector<4x1xf32>
    %146 = arith.mulf %142, %145 : vector<4x1xf32>
    %147 = arith.mulf %144, %144 : vector<4x1xf32>
    %148 = arith.subf %146, %147 : vector<4x1xf32>
    %c0_34 = arith.constant 0 : index
    %c0_35 = arith.constant 0 : index
    %149 = vector.load %arg5[%c0_34, %c0_35] : memref<4x1xf32, #tpu.memory_space<vmem>>, vector<4x1xf32>
    %cst_36 = arith.constant 9.99999974E-6 : f32
    %150 = vector.broadcast %cst_36 : f32 to vector<4x1xf32>
    %151 = arith.addf %148, %150 : vector<4x1xf32>
    %152 = math.rsqrt %151 : vector<4x1xf32>
    %153 = arith.mulf %149, %152 : vector<4x1xf32>
    %c0_37 = arith.constant 0 : index
    %c0_38 = arith.constant 0 : index
    %154 = vector.load %arg6[%c0_37, %c0_38] : memref<4x1xf32, #tpu.memory_space<vmem>>, vector<4x1xf32>
    %155 = arith.mulf %144, %153 : vector<4x1xf32>
    %156 = arith.subf %154, %155 : vector<4x1xf32>
    %157 = vector.broadcast %153 : vector<4x1xf32> to vector<4x1778xf32>
    %158 = arith.mulf %135, %157 : vector<4x1778xf32>
    %159 = vector.broadcast %156 : vector<4x1xf32> to vector<4x1778xf32>
    %160 = arith.addf %158, %159 : vector<4x1778xf32>
    %cst_39 = arith.constant 0.000000e+00 : f32
    %161 = vector.broadcast %cst_39 : f32 to vector<4x1778xf32>
    %162 = arith.maximumf %160, %161 : vector<4x1778xf32>
    %c0_40 = arith.constant 0 : index
    %c0_41 = arith.constant 0 : index
    %163 = vector.load %arg4[%c0_40, %c0_41] : memref<4x4xf32, #tpu.memory_space<vmem>>, vector<4x1xf32>
    %164 = vector.extract_strided_slice %162 {offsets = [0, 0], sizes = [1, 1778], strides = [1, 1]} : vector<4x1778xf32> to vector<1x1778xf32>
    %165 = vector.broadcast %163 : vector<4x1xf32> to vector<4x1778xf32>
    %166 = vector.broadcast %164 : vector<1x1778xf32> to vector<4x1778xf32>
    %167 = arith.mulf %165, %166 : vector<4x1778xf32>
    %c0_42 = arith.constant 0 : index
    %c1_43 = arith.constant 1 : index
    %168 = vector.load %arg4[%c0_42, %c1_43] : memref<4x4xf32, #tpu.memory_space<vmem>>, vector<4x1xf32>
    %169 = vector.extract_strided_slice %162 {offsets = [1, 0], sizes = [1, 1778], strides = [1, 1]} : vector<4x1778xf32> to vector<1x1778xf32>
    %170 = vector.broadcast %168 : vector<4x1xf32> to vector<4x1778xf32>
    %171 = vector.broadcast %169 : vector<1x1778xf32> to vector<4x1778xf32>
    %172 = arith.mulf %170, %171 : vector<4x1778xf32>
    %173 = arith.addf %167, %172 : vector<4x1778xf32>
    %c0_44 = arith.constant 0 : index
    %c2_45 = arith.constant 2 : index
    %174 = vector.load %arg4[%c0_44, %c2_45] : memref<4x4xf32, #tpu.memory_space<vmem>>, vector<4x1xf32>
    %175 = vector.extract_strided_slice %162 {offsets = [2, 0], sizes = [1, 1778], strides = [1, 1]} : vector<4x1778xf32> to vector<1x1778xf32>
    %176 = vector.broadcast %174 : vector<4x1xf32> to vector<4x1778xf32>
    %177 = vector.broadcast %175 : vector<1x1778xf32> to vector<4x1778xf32>
    %178 = arith.mulf %176, %177 : vector<4x1778xf32>
    %179 = arith.addf %173, %178 : vector<4x1778xf32>
    %c0_46 = arith.constant 0 : index
    %c3_47 = arith.constant 3 : index
    %180 = vector.load %arg4[%c0_46, %c3_47] : memref<4x4xf32, #tpu.memory_space<vmem>>, vector<4x1xf32>
    %181 = vector.extract_strided_slice %162 {offsets = [3, 0], sizes = [1, 1778], strides = [1, 1]} : vector<4x1778xf32> to vector<1x1778xf32>
    %182 = vector.broadcast %180 : vector<4x1xf32> to vector<4x1778xf32>
    %183 = vector.broadcast %181 : vector<1x1778xf32> to vector<4x1778xf32>
    %184 = arith.mulf %182, %183 : vector<4x1778xf32>
    %185 = arith.addf %179, %184 : vector<4x1778xf32>
    %186 = vector.broadcast %1 : vector<1x1778xf32> to vector<4x1778xf32>
    %187 = arith.mulf %185, %186 : vector<4x1778xf32>
    %cst_48 = arith.constant dense<0.000000e+00> : vector<4xf32>
    %188 = vector.multi_reduction <add>, %187, %cst_48 [1] : vector<4x1778xf32> to vector<4xf32>
    %189 = vector.shape_cast %188 : vector<4xf32> to vector<4x1xf32>
    %190 = arith.mulf %187, %185 : vector<4x1778xf32>
    %cst_49 = arith.constant dense<0.000000e+00> : vector<4xf32>
    %191 = vector.multi_reduction <add>, %190, %cst_49 [1] : vector<4x1778xf32> to vector<4xf32>
    %192 = vector.shape_cast %191 : vector<4xf32> to vector<4x1xf32>
    %cst_50 = arith.constant 9.765625E-4 : f32
    %193 = vector.broadcast %cst_50 : f32 to vector<4x1xf32>
    %194 = arith.mulf %189, %193 : vector<4x1xf32>
    %cst_51 = arith.constant 9.765625E-4 : f32
    %195 = vector.broadcast %cst_51 : f32 to vector<4x1xf32>
    %196 = arith.mulf %192, %195 : vector<4x1xf32>
    %197 = arith.mulf %194, %194 : vector<4x1xf32>
    %198 = arith.subf %196, %197 : vector<4x1xf32>
    %c0_52 = arith.constant 0 : index
    %c0_53 = arith.constant 0 : index
    %199 = vector.load %arg7[%c0_52, %c0_53] : memref<4x1xf32, #tpu.memory_space<vmem>>, vector<4x1xf32>
    %cst_54 = arith.constant 9.99999974E-6 : f32
    %200 = vector.broadcast %cst_54 : f32 to vector<4x1xf32>
    %201 = arith.addf %198, %200 : vector<4x1xf32>
    %202 = math.rsqrt %201 : vector<4x1xf32>
    %203 = arith.mulf %199, %202 : vector<4x1xf32>
    %c0_55 = arith.constant 0 : index
    %c0_56 = arith.constant 0 : index
    %204 = vector.load %arg8[%c0_55, %c0_56] : memref<4x1xf32, #tpu.memory_space<vmem>>, vector<4x1xf32>
    %205 = arith.mulf %194, %203 : vector<4x1xf32>
    %206 = arith.subf %204, %205 : vector<4x1xf32>
    %207 = vector.broadcast %203 : vector<4x1xf32> to vector<4x1778xf32>
    %208 = arith.mulf %185, %207 : vector<4x1778xf32>
    %209 = vector.broadcast %206 : vector<4x1xf32> to vector<4x1778xf32>
    %210 = arith.addf %208, %209 : vector<4x1778xf32>
    %cst_57 = arith.constant 0.000000e+00 : f32
    %211 = vector.broadcast %cst_57 : f32 to vector<4x1778xf32>
    %212 = arith.maximumf %210, %211 : vector<4x1778xf32>
    %c0_58 = arith.constant 0 : index
    %c0_59 = arith.constant 0 : index
    %213 = vector.load %arg9[%c0_58, %c0_59] : memref<4x1778xf32, #tpu.memory_space<vmem>>, vector<4x1778xf32>
    tpu.vector_store %arg9[%c0_58, %c0_59], %212 {strides = array<i32>} : memref<4x1778xf32, #tpu.memory_space<vmem>>, vector<4x1778xf32>,
    return
  }
  func.func @transform_0(%arg0: i32) -> (i32, i32) {
    %c0_i32 = arith.constant 0 : i32
    %c0_i32_0 = arith.constant 0 : i32
    %c0_i32_1 = arith.constant 0 : i32
    return %c0_i32, %c0_i32_0 : i32, i32
  }
  func.func @transform_1(%arg0: i32) -> (i32, i32) {
    %c0_i32 = arith.constant 0 : i32
    %c0_i32_0 = arith.constant 0 : i32
    %c0_i32_1 = arith.constant 0 : i32
    return %c0_i32, %c0_i32_0 : i32, i32
  }
  func.func @transform_2(%arg0: i32) -> (i32, i32) {
    %c0_i32 = arith.constant 0 : i32
    %c0_i32_0 = arith.constant 0 : i32
    %c0_i32_1 = arith.constant 0 : i32
    return %c0_i32, %c0_i32_0 : i32, i32
  }
  func.func @transform_3(%arg0: i32) -> (i32, i32) {
    %c0_i32 = arith.constant 0 : i32
    %c0_i32_0 = arith.constant 0 : i32
    %c0_i32_1 = arith.constant 0 : i32
    return %c0_i32, %c0_i32_0 : i32, i32
  }
  func.func @transform_4(%arg0: i32) -> (i32, i32) {
    %c0_i32 = arith.constant 0 : i32
    %c0_i32_0 = arith.constant 0 : i32
    %c0_i32_1 = arith.constant 0 : i32
    return %c0_i32, %c0_i32_0 : i32, i32
  }
  func.func @transform_5(%arg0: i32) -> (i32, i32) {
    %c0_i32 = arith.constant 0 : i32
    %c0_i32_0 = arith.constant 0 : i32
    %c0_i32_1 = arith.constant 0 : i32
    return %c0_i32, %c0_i32_0 : i32, i32
  }
  func.func @transform_6(%arg0: i32) -> (i32, i32) {
    %c0_i32 = arith.constant 0 : i32
    %c0_i32_0 = arith.constant 0 : i32
    %c0_i32_1 = arith.constant 0 : i32
    return %c0_i32, %c0_i32_0 : i32, i32
  }
  func.func @transform_7(%arg0: i32) -> (i32, i32) {
    %c0_i32 = arith.constant 0 : i32
    %c0_i32_0 = arith.constant 0 : i32
    %c0_i32_1 = arith.constant 0 : i32
    return %c0_i32, %c0_i32_0 : i32, i32
  }
  func.func @transform_8(%arg0: i32) -> (i32, i32) {
    %c0_i32 = arith.constant 0 : i32
    %c0_i32_0 = arith.constant 0 : i32
    %c0_i32_1 = arith.constant 0 : i32
    return %c0_i32, %c0_i32_0 : i32, i32
  }
}

</mosaic_0001>

<bundles_post_ra>
// kernel: conv_bn_depthwise.1
= control target key start
LH: loop header
LB: loop body
LE: loop exit
PB: predicated region body
PF: predicated region fallthrough
CT: control target
= control target key end

     0   :  { %v6572_v0 = vmov 1   ;;  %v6570_v2 = vmov 3   ;;  %v6571_v3 = vmov 2   ;;  %v3212_v4 = vmov 5   ;;  %s3227_s14 = smov 127   ;;  %s3228_s19 = smov 126   ;;  %s6561_s2 = inlined_call_operand.vmem [shape: f32[4,27], index: 2, kind: input, shape index: {}]   ;;  %s6562_s0 = inlined_call_operand.vmem [shape: f32[4,2000], index: 0, kind: input, shape index: {}]   ;;  %s6563_s1 = inlined_call_operand.vmem [shape: f32[1,1778], index: 1, kind: input, shape index: {}]   ;;  %s6564_s4 = inlined_call_operand.vmem [shape: f32[4,1], index: 4, kind: input, shape index: {}]   ;;  %s6565_s5 = inlined_call_operand.vmem [shape: f32[4,1], index: 5, kind: input, shape index: {}]   ;;  %s6566_s3 = inlined_call_operand.vmem [shape: f32[4,4], index: 3, kind: input, shape index: {}]   ;;  %s6567_s6 = inlined_call_operand.vmem [shape: f32[4,1], index: 6, kind: input, shape index: {}]   ;;  %s6568_s7 = inlined_call_operand.vmem [shape: f32[4,1], index: 7, kind: input, shape index: {}]   ;;  %s6569_s8 = inlined_call_operand.vmem [shape: f32[4,1778], index: 8, kind: output, shape index: {}]  }
   0x1   :  { %3165 = vset.pattern.permute.xlu0 %v6572_v0  ;;  %v3312_v1 = vld [vmem:[%s6561_s2] sm:$0xf]  ;;  %3167 = vset.pattern.permute.xlu1 %v6570_v2  ;;  %v3213_v5 = vmov 4   ;;  %v3214_v6 = vmov 6   ;;  %v3215_v7 = vmov 7   ;;  %v3216_v8 = vmov 8  }
   0x2   :  { %60 = vperm.xlu0 %3165, %v3312_v1   ;;  %209 = vperm.xlu1 %3167, %v3312_v1   ;;  %v3217_v9 = vmov 9   ;;  %v3218_v10 = vmov 10   ;;  %v3219_v11 = vmov 11   ;;  %v3220_v12 = vmov 13   ;;  %v3341_v25 = vld [vmem:[%s6562_s0 + $0x18] sm:$0xff]  ;;  %v3346_v26 = vld [vmem:[%s6562_s0] sm:$0xff] }
   0x3   :  { %v3221_v13 = vmov 12   ;;  %v3222_v14 = vmov 16   ;;  %v3223_v15 = vmov 14   ;;  %v3224_v16 = vmov 15   ;;  %v3354_v30 = vld [vmem:[%s6562_s0 + $0x28] sm:$0xff]  ;;  %v3367_v36 = vld [vmem:[%s6562_s0 + $0x10] sm:$0xff] }
   0x4   :  { %v3225_v17 = vmov 17   ;;  %v3226_v18 = vmov 839922192   ;;  %v47_v20 = vlaneseq  ;;  %v3359_v31 = vld [vmem:[%s6562_s0 + $0x8] sm:$0xff]  ;;  %v3374_v39 = vld [vmem:[%s6562_s0 + $0x20] sm:$0xff]  ;;  %v3382_v43 = vld [vmem:[%s6562_s0 + $0x30] sm:$0xff] }
   0x5   :  { %v45_v19 = vunpack.c.l.s4 %v3226_v18  ;;  %v3229_v52 = vmov 18   ;;  %s3230_s22 = smov 118   ;;  %s3231_s23 = smov 117   ;;  %vm105_vm0 = vcmask 1043456   ;;  %vm107_vm1 = vcmask 1039360  }
   0x6   :  { %3166 = vset.pattern.permute.xlu0 %v6571_v3  ;;  %3169 = vset.pattern.permute.xlu1 %v3212_v4  ;;  %v3333_v22 = vshrl.u32 %v47_v20, 7  ;;  %s3232_s24 = smov 116   ;;  %s3233_s25 = smov 108   ;;  %vm181_vm2 = vcmask 1031168   ;;  %vm329_vm3 = vcmask 957440   ;;  %vm255_vm4 = vcmask 965632  }
   0x7   :  { %135 = vperm.xlu0 %3166, %v3312_v1   ;;  %357 = vperm.xlu1 %3169, %v3312_v1   ;;  %v46_v21 = vunpack.c.0.s8 %v45_v19  ;;  %s3234_s26 = smov 107   ;;  %s3235_s27 = smov 106   ;;  %vm482_vm5 = vcmask 883712   ;;  %vm403_vm6 = vcmask 949248   ;;  %vm562_vm7 = vcmask 875520  }
   0x8   :  { %6719 = vst [vmem:[#allocation2_spill] sm:$0xff] %v3333_v22  ;;  %s3236_s28 = smov 28   ;;  %s3238_s2 = smov 27   ;;  %vm642_vm8 = vcmask 867328   ;;  %vm722_vm9 = vcmask 228352   ;;  %vm802_vm10 = vcmask 220160  }
   0x9   :  { %v3336_v23 = vsub.s32 %v46_v21, %v3333_v22  ;;  %s3239_s29 = smov 26   ;;  %s3240_s30 = smov 18   ;;  %vm882_vm11 = vcmask 211968   ;;  %vm962_vm12 = vcmask 146432   ;;  %vm1042_vm13 = vcmask 138240  }
   0xa   :  { %s3241_s9 = smov 17   ;;  %s3242_s10 = smov 16   ;;  %vm1122_vm14 = vcmask 130048   ;;  %vm1202_vm15 = vcmask 64512  }
   0xb   :  { %3168 = vset.pattern.permute.xlu0 %v3213_v5  ;;  %3170 = vset.pattern.permute.xlu1 %v3214_v6  ;;  %6720 = vst [vmem:[#allocation3_spill] sm:$0xff] %v3336_v23  ;;  %s3243_s11 = smov 8   ;;  %s3245_s12 = smov 7  }
   0xc   :  { %283 = vperm.xlu0 %3168, %v3312_v1   ;;  %431 = vperm.xlu1 %3170, %v3312_v1   ;;  %s3247_s13 = smov 6   ;;  %s3248_s16 = smov 56  }
   0xd   :  { %s3250_s17 = smov 55   ;;  %s3253_s18 = smov 54  }
   0xe   :  { %s3257_s20 = smov 45   ;;  %s3258_s21 = smov 44  }
  0x10   :  { %3171 = vset.pattern.permute.xlu0 %v3215_v7  ;;  %3172 = vset.pattern.permute.xlu1 %v3216_v8 }
  0x11   :  { %511 = vperm.xlu0 %3171, %v3312_v1   ;;  %591 = vperm.xlu1 %3172, %v3312_v1  }
  0x15   :  { %3173 = vset.pattern.permute.xlu1 %v3217_v9  ;;  %3174 = vset.pattern.permute.xlu0 %v3218_v10 }
  0x16   :  { %671 = vperm.xlu1 %3173, %v3312_v1   ;;  %751 = vperm.xlu0 %3174, %v3312_v1  }
  0x1a   :  { %3175 = vset.pattern.permute.xlu1 %v3219_v11  ;;  %3177 = vset.pattern.permute.xlu0 %v3220_v12 }
  0x1b   :  { %831 = vperm.xlu1 %3175, %v3312_v1   ;;  %991 = vperm.xlu0 %3177, %v3312_v1  }
  0x1f   :  { %3176 = vset.pattern.permute.xlu1 %v3221_v13  ;;  %3180 = vset.pattern.permute.xlu0 %v3222_v14 }
  0x20   :  { %911 = vperm.xlu1 %3176, %v3312_v1   ;;  %1231 = vperm.xlu0 %3180, %v3312_v1  }
  0x24   :  { %3178 = vset.pattern.permute.xlu1 %v3223_v15 }
  0x25   :  { %1071 = vperm.xlu1 %3178, %v3312_v1  }
  0x29   :  { %3179 = vset.pattern.permute.xlu1 %v3224_v16 }
  0x2a   :  { %1151 = vperm.xlu1 %3179, %v3312_v1  }
  0x2e   :  { %3181 = vset.pattern.permute.xlu1 %v3225_v17 }
  0x2f   :  { %1311 = vperm.xlu1 %3181, %v3312_v1  }
  0x33   :  { %3182 = vset.pattern.permute.xlu1 %v3229_v52 }
  0x81   :  { %v61_v24 = vpop.permute.xlu0 %60  ;;  %v210_v41 = vpop.permute.xlu1 %209 }
  0x82   :  { %v68_v27 = vrot.slane %v61_v24, %v3336_v23  ;;  %v3386_v44 = vrot.slane %v210_v41, %v3336_v23 }
  0x84   :  { %v73_v28 = vmul.f32 %v68_v27, %v3341_v25  ;;  %v70_v29 = vmul.f32 %v68_v27, %v3346_v26  ;;  %v75_v34 = vmul.f32 %v68_v27, %v3354_v30  ;;  %v71_v35 = vmul.f32 %v68_v27, %v3359_v31 }
  0x85   :  { %v72_v38 = vmul.f32 %v68_v27, %v3367_v36  ;;  %v74_v42 = vmul.f32 %v68_v27, %v3374_v39  ;;  %v76_v47 = vmul.f32 %v68_v27, %v3382_v43  ;;  %v220_v49 = vmul.f32 %v3386_v44, %v3359_v31 }
  0x86   :  { %90 = vrot.lane.b32.xlu0 %v73_v28, %s3227_s14  ;;  %84 = vrot.lane.b32.xlu1 %v70_v29, %s3227_s14  ;;  %v136_v32 = vpop.permute.xlu0 %135  ;;  %v358_v51 = vpop.permute.xlu1 %357  ;;  %v219_v63 = vmul.f32 %v3386_v44, %v3346_v26  ;;  %v221_v10 = vmul.f32 %v3386_v44, %v3367_v36  ;;  %v222_v19 = vmul.f32 %v3386_v44, %v3341_v25 }
  0x87   :  { %v143_v33 = vrot.slane %v136_v32, %v3336_v23  ;;  %v3400_v53 = vrot.slane %v358_v51, %v3336_v23 }
  0x89   :  { %v147_v37 = vmul.f32 %v143_v33, %v3367_v36  ;;  %v149_v40 = vmul.f32 %v143_v33, %v3374_v39  ;;  %v151_v45 = vmul.f32 %v143_v33, %v3382_v43  ;;  %v145_v50 = vmul.f32 %v143_v33, %v3346_v26 }
  0x8a   :  { %94 = vrot.lane.b32.xlu0 %v75_v34, %s3227_s14  ;;  %86 = vrot.lane.b32.xlu1 %v71_v35, %s3227_s14  ;;  %v146_v55 = vmul.f32 %v143_v33, %v3359_v31  ;;  %v367_v56 = vmul.f32 %v3400_v53, %v3346_v26  ;;  %v148_v58 = vmul.f32 %v143_v33, %v3341_v25  ;;  %v3237_v35 = vmov 22  }
  0x8b   :  { %v284_v46 = vpop.permute.xlu0 %283  ;;  %v432_v57 = vpop.permute.xlu1 %431  ;;  %v150_v61 = vmul.f32 %v143_v33, %v3354_v30  ;;  %v369_v6 = vmul.f32 %v3400_v53, %v3367_v36  ;;  %v368_v13 = vmul.f32 %v3400_v53, %v3359_v31  ;;  %v370_v18 = vmul.f32 %v3400_v53, %v3341_v25  ;;  %3186 = vset.pattern.permute.xlu0 %v3237_v35 }
  0x8c   :  { %v3392_v48 = vrot.slane %v284_v46, %v3336_v23  ;;  %v3413_v59 = vrot.slane %v432_v57, %v3336_v23 }
  0x8e   :  { %163 = vrot.lane.b32.xlu0 %v147_v37, %s3228_s19  ;;  %88 = vrot.lane.b32.xlu1 %v72_v38, %s3227_s14  ;;  %v294_v54 = vmul.f32 %v3392_v48, %v3359_v31  ;;  %v295_v60 = vmul.f32 %v3392_v48, %v3367_v36  ;;  %v442_v62 = vmul.f32 %v3413_v59, %v3359_v31 }
  0x8f   :  { %v293_v7 = vmul.f32 %v3392_v48, %v3346_v26  ;;  %v443_v12 = vmul.f32 %v3413_v59, %v3367_v36  ;;  %v441_v15 = vmul.f32 %v3413_v59, %v3346_v26  ;;  %v297_v27 = vmul.f32 %v3392_v48, %v3374_v39 }
  0x90   :  { %v512_v4 = vpop.permute.xlu0 %511  ;;  %v592_v9 = vpop.permute.xlu1 %591  ;;  %v296_v28 = vmul.f32 %v3392_v48, %v3341_v25  ;;  %v223_v37 = vmul.f32 %v3386_v44, %v3374_v39  ;;  %v445_v52 = vmul.f32 %v3413_v59, %v3374_v39 }
  0x91   :  { %v3427_v5 = vrot.slane %v512_v4, %v3336_v23  ;;  %v3442_v11 = vrot.slane %v592_v9, %v3336_v23 }
  0x92   :  { %167 = vrot.lane.b32.xlu0 %v149_v40, %s3228_s19  ;;  %92 = vrot.lane.b32.xlu1 %v74_v42, %s3227_s14  ;;  %v371_v40 = vmul.f32 %v3400_v53, %v3374_v39 }
  0x93   :  { %v522_v8 = vmul.f32 %v3427_v5, %v3359_v31  ;;  %v602_v14 = vmul.f32 %v3442_v11, %v3359_v31  ;;  %v521_v21 = vmul.f32 %v3427_v5, %v3346_v26  ;;  %v603_v32 = vmul.f32 %v3442_v11, %v3367_v36 }
  0x94   :  { %v601_v33 = vmul.f32 %v3442_v11, %v3346_v26  ;;  %v523_v41 = vmul.f32 %v3427_v5, %v3367_v36 }
  0x95   :  { %v672_v16 = vpop.permute.xlu1 %671  ;;  %v752_v24 = vpop.permute.xlu0 %751 }
  0x96   :  { %171 = vrot.lane.b32.xlu0 %v151_v45, %s3228_s19  ;;  %96 = vrot.lane.b32.xlu1 %v76_v47, %s3227_s14  ;;  %v3457_v17 = vrot.slane %v672_v16, %v3336_v23  ;;  %v3478_v29 = vrot.slane %v752_v24, %v3336_v23 }
  0x98   :  { %v681_v20 = vmul.f32 %v3457_v17, %v3346_v26  ;;  %v762_v34 = vmul.f32 %v3478_v29, %v3359_v31  ;;  %v683_v45 = vmul.f32 %v3457_v17, %v3367_v36  ;;  %v682_v46 = vmul.f32 %v3457_v17, %v3359_v31 }
  0x99   :  { %v766_v3 = vmul.f32 %v3478_v29, %v3354_v30 }
  0x9a   :  { %235 = vrot.lane.b32.xlu0 %v220_v49, %s3230_s22  ;;  %159 = vrot.lane.b32.xlu1 %v145_v50, %s3228_s19  ;;  %v832_v38 = vpop.permute.xlu1 %831  ;;  %v444_v49 = vmul.f32 %v3413_v59, %v3341_v25  ;;  %v761_v50 = vmul.f32 %v3478_v29, %v3346_v26 }
  0x9b   :  { %v3499_v42 = vrot.slane %v832_v38, %v3336_v23 }
  0x9d   :  { %v842_v47 = vmul.f32 %v3499_v42, %v3359_v31 }
  0x9e   :  { %309 = vrot.lane.b32.xlu0 %v294_v54, %s3231_s23  ;;  %161 = vrot.lane.b32.xlu1 %v146_v55, %s3228_s19  ;;  %v763_v55 = vmul.f32 %v3478_v29, %v3367_v36 }
  0x9f   :  { %v912_v51 = vpop.permute.xlu1 %911 }
  0xa0   :  { %v3520_v54 = vrot.slane %v912_v51, %v3336_v23 }
  0xa2   :  { %381 = vrot.lane.b32.xlu0 %v367_v56, %s3232_s24  ;;  %165 = vrot.lane.b32.xlu1 %v148_v58, %s3228_s19  ;;  %v224_v56 = vmul.f32 %v3386_v44, %v3354_v30  ;;  %v922_v57 = vmul.f32 %v3520_v54, %v3359_v31  ;;  %v524_v58 = vmul.f32 %v3427_v5, %v3341_v25 }
  0xa6   :  { %311 = vrot.lane.b32.xlu0 %v295_v60, %s3231_s23  ;;  %169 = vrot.lane.b32.xlu1 %v150_v61, %s3228_s19  ;;  %v841_v60 = vmul.f32 %v3499_v42, %v3346_v26  ;;  %v1072_v61 = vpop.permute.xlu1 %1071  ;;  %s3254_s19 = smov 46  }
  0xaa   :  { %459 = vrot.lane.b32.xlu0 %v442_v62, %s3233_s25  ;;  %233 = vrot.lane.b32.xlu1 %v219_v63, %s3230_s22  ;;  %v992_v62 = vpop.permute.xlu0 %991  ;;  %v372_v63 = vmul.f32 %v3400_v53, %v3354_v30 }
  0xab   :  { %v3541_v4 = vrot.slane %v992_v62, %v3336_v23  ;;  %v447_v62 = vmul.f32 %v3413_v59, %v3382_v43 }
  0xad   :  { %v1001_v9 = vmul.f32 %v3541_v4, %v3346_v26  ;;  %v1002_v35 = vmul.f32 %v3541_v4, %v3359_v31  ;;  %v1003_v51 = vmul.f32 %v3541_v4, %v3367_v36  ;;  %v1004_v0 = vmul.f32 %v3541_v4, %v3341_v25 }
  0xae   :  { %385 = vrot.lane.b32.xlu0 %v369_v6, %s3232_s24  ;;  %307 = vrot.lane.b32.xlu1 %v293_v7, %s3231_s23  ;;  %v684_v6 = vmul.f32 %v3457_v17, %v3341_v25  ;;  %v298_v7 = vmul.f32 %v3392_v48, %v3354_v30 }
  0xb2   :  { %539 = vrot.lane.b32.xlu0 %v522_v8, %s3234_s26  ;;  %237 = vrot.lane.b32.xlu1 %v221_v10, %s3230_s22  ;;  %v1152_v8 = vpop.permute.xlu1 %1151  ;;  %v604_v10 = vmul.f32 %v3442_v11, %v3341_v25 }
  0xb6   :  { %461 = vrot.lane.b32.xlu0 %v443_v12, %s3233_s25  ;;  %383 = vrot.lane.b32.xlu1 %v368_v13, %s3232_s24  ;;  %v3555_v12 = vpop.permute.xlu1 %1311  ;;  %v3557_v13 = vpop.permute.xlu0 %1231 }
  0xba   :  { %619 = vrot.lane.b32.xlu0 %v602_v14, %s3235_s27  ;;  %457 = vrot.lane.b32.xlu1 %v441_v15, %s3233_s25  ;;  %v921_v14 = vmul.f32 %v3520_v54, %v3346_v26  ;;  %v299_v15 = vmul.f32 %v3392_v48, %v3382_v43  ;;  %v3576_v48 = vrot.slane %v1072_v61, %v3336_v23 }
  0xbe   :  { %387 = vrot.lane.b32.xlu0 %v370_v18, %s3232_s24  ;;  %239 = vrot.lane.b32.xlu1 %v222_v19, %s3230_s22  ;;  %v605_v19 = vmul.f32 %v3442_v11, %v3374_v39 }
  0xc2   :  { %697 = vrot.lane.b32.xlu0 %v681_v20, %s3236_s28  ;;  %537 = vrot.lane.b32.xlu1 %v521_v21, %s3234_s26  ;;  %v225_v20 = vmul.f32 %v3386_v44, %v3382_v43 }
  0xc6   :  { %315 = vrot.lane.b32.xlu0 %v297_v27, %s3231_s23  ;;  %313 = vrot.lane.b32.xlu1 %v296_v28, %s3231_s23  ;;  %v923_v27 = vmul.f32 %v3520_v54, %v3367_v36  ;;  %v525_v28 = vmul.f32 %v3427_v5, %v3374_v39 }
  0xca   :  { %621 = vrot.lane.b32.xlu0 %v603_v32, %s3235_s27  ;;  %617 = vrot.lane.b32.xlu1 %v601_v33, %s3235_s27  ;;  %v1082_v33 = vmul.f32 %v3576_v48, %v3359_v31 }
  0xce   :  { %779 = vrot.lane.b32.xlu0 %v762_v34, %s3238_s2  ;;  %241 = vrot.lane.b32.xlu1 %v223_v37, %s3230_s22  ;;  %v843_v34 = vmul.f32 %v3499_v42, %v3367_v36 }
  0xd2   :  { %389 = vrot.lane.b32.xlu0 %v371_v40, %s3232_s24  ;;  %541 = vrot.lane.b32.xlu1 %v523_v41, %s3234_s26  ;;  %v373_v40 = vmul.f32 %v3400_v53, %v3382_v43  ;;  %v3619_v53 = vrot.slane %v1152_v8, %v3336_v23  ;;  %v526_v8 = vmul.f32 %v3427_v5, %v3354_v30 }
  0xd6   :  { %701 = vrot.lane.b32.xlu0 %v683_v45, %s3236_s28  ;;  %699 = vrot.lane.b32.xlu1 %v682_v46, %s3236_s28  ;;  %v685_v46 = vmul.f32 %v3457_v17, %v3374_v39 }
  0xda   :  { %859 = vrot.lane.b32.xlu0 %v842_v47, %s3239_s29  ;;  %463 = vrot.lane.b32.xlu1 %v444_v49, %s3233_s25  ;;  %v446_v47 = vmul.f32 %v3413_v59, %v3354_v30 }
  0xde   :  { %465 = vrot.lane.b32.xlu0 %v445_v52, %s3233_s25  ;;  %777 = vrot.lane.b32.xlu1 %v761_v50, %s3238_s2  ;;  %v764_v52 = vmul.f32 %v3478_v29, %v3341_v25 }
  0xe2   :  { %781 = vrot.lane.b32.xlu0 %v763_v55, %s3238_s2  ;;  %243 = vrot.lane.b32.xlu1 %v224_v56, %s3230_s22 }
  0xe6   :  { %939 = vrot.lane.b32.xlu0 %v922_v57, %s3240_s30  ;;  %543 = vrot.lane.b32.xlu1 %v524_v58, %s3234_s26  ;;  %v1162_v57 = vmul.f32 %v3619_v53, %v3359_v31  ;;  %v1081_v58 = vmul.f32 %v3576_v48, %v3346_v26 }
  0xea   :  { %391 = vrot.lane.b32.xlu0 %v372_v63, %s3232_s24  ;;  %857 = vrot.lane.b32.xlu1 %v841_v60, %s3239_s29 }
  0xee   :  { %703 = vrot.lane.b32.xlu0 %v684_v6, %s3236_s28  ;;  %317 = vrot.lane.b32.xlu1 %v298_v7, %s3231_s23  ;;  %v765_v7 = vmul.f32 %v3478_v29, %v3374_v39 }
  0xf2   :  { %1017 = vrot.lane.b32.xlu0 %v1001_v9, %s3241_s9  ;;  %623 = vrot.lane.b32.xlu1 %v604_v10, %s3235_s27  ;;  %v3244_v9 = vmov 19   ;;  %v3661_v10 = vrot.slane %v3557_v13, %v3336_v23 }
  0xf4   :  { %v1242_v13 = vmul.f32 %v3661_v10, %v3359_v31 }
  0xf6   :  { %319 = vrot.lane.b32.xlu0 %v299_v15, %s3231_s23  ;;  %937 = vrot.lane.b32.xlu1 %v921_v14, %s3240_s30  ;;  %s3261_s23 = smov 35  }
  0xf8   :  { %v3565_v16 = vpop.permute.xlu0 %90  ;;  %v3567_v18 = vpop.permute.xlu1 %84 }
  0xfa   :  { %625 = vrot.lane.b32.xlu0 %v605_v19, %s3235_s27  ;;  %245 = vrot.lane.b32.xlu1 %v225_v20, %s3230_s22  ;;  %v1083_v19 = vmul.f32 %v3576_v48, %v3367_v36  ;;  %v844_v20 = vmul.f32 %v3499_v42, %v3341_v25  ;;  %s3260_s22 = smov 36  }
  0xfc   :  { %v3578_v21 = vpop.permute.xlu0 %94  ;;  %v3580_v24 = vpop.permute.xlu1 %86 }
  0xfe   :  { %941 = vrot.lane.b32.xlu0 %v923_v27, %s3240_s30  ;;  %545 = vrot.lane.b32.xlu1 %v525_v28, %s3234_s26 }
 0x100   :  { %v3588_v44 = vpop.permute.xlu0 %163  ;;  %v3590_v32 = vpop.permute.xlu1 %88 }
 0x102   :  { %1099 = vrot.lane.b32.xlu0 %v1082_v33, %s3242_s10  ;;  %861 = vrot.lane.b32.xlu1 %v843_v34, %s3239_s29  ;;  %v1161_v33 = vmul.f32 %v3619_v53, %v3346_v26 }
 0x104   :  { %v3600_v37 = vpop.permute.xlu0 %167  ;;  %v3602_v38 = vpop.permute.xlu1 %92 }
 0x106   :  { %393 = vrot.lane.b32.xlu0 %v373_v40, %s3232_s24  ;;  %1019 = vrot.lane.b32.xlu1 %v1002_v35, %s3241_s9  ;;  %v527_v40 = vmul.f32 %v3427_v5, %v3382_v43  ;;  %s3262_s24 = smov 34  }
 0x108   :  { %v3608_v41 = vpop.permute.xlu0 %171  ;;  %v3610_v45 = vpop.permute.xlu1 %96 }
 0x10a   :  { %705 = vrot.lane.b32.xlu0 %v685_v46, %s3236_s28  ;;  %467 = vrot.lane.b32.xlu1 %v446_v47, %s3233_s25 }
 0x10c   :  { %v3621_v49 = vpop.permute.xlu0 %235  ;;  %v3623_v50 = vpop.permute.xlu1 %159 }
 0x10e   :  { %1021 = vrot.lane.b32.xlu0 %v1003_v51, %s3241_s9  ;;  %783 = vrot.lane.b32.xlu1 %v764_v52, %s3238_s2  ;;  %v845_v51 = vmul.f32 %v3499_v42, %v3374_v39  ;;  %v606_v52 = vmul.f32 %v3442_v11, %v3354_v30 }
 0x110   :  { %v3631_v55 = vpop.permute.xlu0 %309  ;;  %v3633_v56 = vpop.permute.xlu1 %161 }
 0x112   :  { %1179 = vrot.lane.b32.xlu0 %v1162_v57, %s3243_s11  ;;  %1097 = vrot.lane.b32.xlu1 %v1081_v58, %s3242_s10  ;;  %v3246_v57 = vmov 20   ;;  %v3703_v58 = vrot.slane %v3555_v12, %v3336_v23 }
 0x114   :  { %v3641_v60 = vpop.permute.xlu0 %381  ;;  %v3643_v61 = vpop.permute.xlu1 %165  ;;  %v1322_v12 = vmul.f32 %v3703_v58, %v3359_v31 }
 0x116   :  { %469 = vrot.lane.b32.xlu0 %v447_v62, %s3233_s25  ;;  %1391 = vperm.xlu1 %3182, %v3312_v1  }
 0x118   :  { %v3649_v63 = vpop.permute.xlu0 %311  ;;  %v3651_v6 = vpop.permute.xlu1 %169 }
 0x11a   :  { %785 = vrot.lane.b32.xlu0 %v765_v7, %s3238_s2  ;;  %547 = vrot.lane.b32.xlu1 %v526_v8, %s3234_s26  ;;  %v1163_v8 = vmul.f32 %v3619_v53, %v3367_v36 }
 0x11b   :  { %3183 = vset.pattern.permute.xlu1 %v3244_v9  ;;  %v924_v9 = vmul.f32 %v3520_v54, %v3341_v25 }
 0x11c   :  { %v3663_v14 = vpop.permute.xlu0 %459  ;;  %v3665_v15 = vpop.permute.xlu1 %233 }
 0x11e   :  { %1101 = vrot.lane.b32.xlu0 %v1083_v19, %s3242_s10  ;;  %863 = vrot.lane.b32.xlu1 %v844_v20, %s3239_s29 }
 0x120   :  { %v3673_v27 = vpop.permute.xlu0 %385  ;;  %v3675_v28 = vpop.permute.xlu1 %307 }
 0x122   :  { %1259 = vrot.lane.b32.xlu0 %v1242_v13, %s3245_s12  ;;  %1177 = vrot.lane.b32.xlu1 %v1161_v33, %s3243_s11  ;;  %v1241_v13 = vmul.f32 %v3661_v10, %v3346_v26 }
 0x124   :  { %v3683_v34 = vpop.permute.xlu0 %539  ;;  %v3685_v35 = vpop.permute.xlu1 %237 }
 0x126   :  { %549 = vrot.lane.b32.xlu0 %v527_v40, %s3234_s26  ;;  %1470 = vperm.xlu1 %3183, %v3312_v1  }
 0x128   :  { %v3691_v46 = vpop.permute.xlu0 %461  ;;  %v3693_v47 = vpop.permute.xlu1 %383 }
 0x12a   :  { %865 = vrot.lane.b32.xlu0 %v845_v51, %s3239_s29  ;;  %627 = vrot.lane.b32.xlu1 %v606_v52, %s3235_s27  ;;  %v3732_v51 = vld [vmem:[%s6562_s0 + $0x38] sm:$0xff] }
 0x12b   :  { %3184 = vset.pattern.permute.xlu1 %v3246_v57  ;;  %6722 = vst [vmem:[#allocation5_spill] sm:$0xff] %v3732_v51 }
 0x12c   :  { %v3705_v62 = vpop.permute.xlu0 %619  ;;  %v3707_v7 = vpop.permute.xlu1 %457 }
 0x12e   :  { %1181 = vrot.lane.b32.xlu0 %v1163_v8, %s3243_s11  ;;  %943 = vrot.lane.b32.xlu1 %v924_v9, %s3240_s30  ;;  %v448_v8 = vmul.f32 %v3413_v59, %v3732_v51  ;;  %v686_v9 = vmul.f32 %v3457_v17, %v3354_v30 }
 0x130   :  { %v3715_v19 = vpop.permute.xlu0 %387  ;;  %v3717_v20 = vpop.permute.xlu1 %239 }
 0x132   :  { %1339 = vrot.lane.b32.xlu0 %v1322_v12, %s3247_s13  ;;  %1257 = vrot.lane.b32.xlu1 %v1241_v13, %s3245_s12  ;;  %v3249_v12 = vmov 21  }
 0x134   :  { %v3725_v33 = vpop.permute.xlu0 %697  ;;  %v3727_v40 = vpop.permute.xlu1 %537 }
 0x135   :  { %6721 = vst [vmem:[#allocation4_spill] sm:$0xff] %v3725_v33  ;;  %v607_v33 = vmul.f32 %v3442_v11, %v3382_v43 }
 0x136   :  { %1403 = vrot.lane.b32.xlu0 %v3359_v31, %s3248_s16  ;;  %1541 = vperm.xlu1 %3184, %v3312_v1  }
 0x138   :  { %v3737_v52 = vpop.permute.xlu0 %315  ;;  %v3739_v57 = vpop.permute.xlu1 %313 }
 0x13a   :  { %471 = vrot.lane.b32.xlu0 %v448_v8, %s3233_s25  ;;  %707 = vrot.lane.b32.xlu1 %v686_v9, %s3236_s28  ;;  %v1084_v9 = vmul.f32 %v3576_v48, %v3341_v25 }
 0x13b   :  { %3185 = vset.pattern.permute.xlu1 %v3249_v12  ;;  %v1321_v12 = vmul.f32 %v3703_v58, %v3346_v26 }
 0x13c   :  { %v3747_v13 = vpop.permute.xlu0 %621  ;;  %v3749_v2 = vpop.permute.xlu1 %617 }
 0x13e   :  { %787 = vrot.lane.b32.xlu0 %v766_v3, %s3238_s2  ;;  %1023 = vrot.lane.b32.xlu1 %v1004_v0, %s3241_s9 }
 0x140   :  { %v3757_v59 = vpop.permute.xlu0 %779  ;;  %v3759_v8 = vpop.permute.xlu1 %241 }
 0x141   :  { %6723 = vst [vmem:[#allocation6_spill] sm:$0xff] %v3757_v59  ;;  %v846_v59 = vmul.f32 %v3499_v42, %v3354_v30 }
 0x142   :  { %1103 = vrot.lane.b32.xlu0 %v1084_v9, %s3242_s10  ;;  %1337 = vrot.lane.b32.xlu1 %v1321_v12, %s3247_s13 }
 0x144   :  { %v3767_v22 = vpop.permute.xlu0 %389  ;;  %v3769_v23 = vpop.permute.xlu1 %541 }
 0x145   :  { %6724 = vst [vmem:[#allocation7_spill] sm:$0xff] %v3767_v22  ;;  %6725 = vst [vmem:[#allocation8_spill] sm:$0xff] %v3769_v23 }
 0x146   :  { %1472 = vrot.lane.b32.xlu0 %v3346_v26, %s3250_s17  ;;  %1401 = vrot.lane.b32.xlu1 %v3346_v26, %s3248_s16 }
 0x148   :  { %v3775_v0 = vpop.permute.xlu0 %701  ;;  %v3777_v3 = vpop.permute.xlu1 %699 }
 0x149   :  { %6726 = vst [vmem:[#allocation9_spill] sm:$0xff] %v3775_v0  ;;  %6727 = vst [vmem:[#allocation10_spill] sm:$0xff] %v3777_v3  ;;  %v3251_v0 = vmov 24   ;;  %v3252_v3 = vmov 23  }
 0x14a   :  { %1683 = vperm.xlu0 %3186, %v3312_v1   ;;  %1612 = vperm.xlu1 %3185, %v3312_v1  }
 0x14c   :  { %v3781_v9 = vpop.permute.xlu0 %859  ;;  %v3783_v12 = vpop.permute.xlu1 %463 }
 0x14d   :  { %6728 = vst [vmem:[#allocation11_spill] sm:$0xff] %v3781_v9  ;;  %6729 = vst [vmem:[#allocation12_spill] sm:$0xff] %v3783_v12  ;;  %v1164_v9 = vmul.f32 %v3619_v53, %v3341_v25  ;;  %v925_v12 = vmul.f32 %v3520_v54, %v3374_v39 }
 0x14e   :  { %867 = vrot.lane.b32.xlu0 %v846_v59, %s3239_s29  ;;  %629 = vrot.lane.b32.xlu1 %v607_v33, %s3235_s27 }
 0x14f   :  { %3188 = vset.pattern.permute.xlu0 %v3251_v0  ;;  %3187 = vset.pattern.permute.xlu1 %v3252_v3  ;;  %v1243_v0 = vmul.f32 %v3661_v10, %v3367_v36 }
 0x150   :  { %v3791_v23 = vpop.permute.xlu0 %465  ;;  %v3793_v22 = vpop.permute.xlu1 %777 }
 0x151   :  { %6730 = vst [vmem:[#allocation13_spill] sm:$0xff] %v3793_v22 }
 0x152   :  { %1183 = vrot.lane.b32.xlu0 %v1164_v9, %s3243_s11  ;;  %945 = vrot.lane.b32.xlu1 %v925_v12, %s3240_s30 }
 0x154   :  { %v3801_v59 = vpop.permute.xlu0 %781  ;;  %v3803_v33 = vpop.permute.xlu1 %243 }
 0x155   :  { %6731 = vst [vmem:[#allocation14_spill] sm:$0xff] %v3801_v59  ;;  %6732 = vst [vmem:[#allocation15_spill] sm:$0xff] %v3803_v33  ;;  %v608_v33 = vmul.f32 %v3442_v11, %v3732_v51  ;;  %v926_v59 = vmul.f32 %v3520_v54, %v3354_v30 }
 0x156   :  { %1405 = vrot.lane.b32.xlu0 %v3367_v36, %s3248_s16  ;;  %1261 = vrot.lane.b32.xlu1 %v1243_v0, %s3245_s12  ;;  %v528_v0 = vmul.f32 %v3427_v5, %v3732_v51 }
 0x158   :  { %v3810_v3 = vpop.permute.xlu0 %939  ;;  %v3812_v22 = vpop.permute.xlu1 %543 }
 0x159   :  { %6733 = vst [vmem:[#allocation16_spill] sm:$0xff] %v3810_v3  ;;  %6734 = vst [vmem:[#allocation17_spill] sm:$0xff] %v3812_v22 }
 0x15a   :  { %1545 = vrot.lane.b32.xlu0 %v3359_v31, %s3253_s18  ;;  %1474 = vrot.lane.b32.xlu1 %v3359_v31, %s3250_s17 }
 0x15c   :  { %v3818_v9 = vpop.permute.xlu0 %391  ;;  %v3820_v12 = vpop.permute.xlu1 %857 }
 0x15d   :  { %6735 = vst [vmem:[#allocation18_spill] sm:$0xff] %v3820_v12  ;;  %v687_v12 = vmul.f32 %v3457_v17, %v3382_v43 }
 0x15e   :  { %631 = vrot.lane.b32.xlu0 %v608_v33, %s3235_s27  ;;  %551 = vrot.lane.b32.xlu1 %v528_v0, %s3234_s26  ;;  %v1244_v33 = vmul.f32 %v3661_v10, %v3341_v25  ;;  %v1005_v0 = vmul.f32 %v3541_v4, %v3374_v39 }
 0x160   :  { %v3828_v3 = vpop.permute.xlu0 %703  ;;  %v3830_v22 = vpop.permute.xlu1 %317 }
 0x161   :  { %6736 = vst [vmem:[#allocation19_spill] sm:$0xff] %v3828_v3  ;;  %6737 = vst [vmem:[#allocation20_spill] sm:$0xff] %v3830_v22 }
 0x162   :  { %947 = vrot.lane.b32.xlu0 %v926_v59, %s3240_s30  ;;  %709 = vrot.lane.b32.xlu1 %v687_v12, %s3236_s28  ;;  %v1323_v59 = vmul.f32 %v3703_v58, %v3367_v36 }
 0x164   :  { %v3838_v11 = vpop.permute.xlu0 %1017  ;;  %v3840_v5 = vpop.permute.xlu1 %623 }
 0x165   :  { %6738 = vst [vmem:[#allocation21_spill] sm:$0xff] %v3838_v11 }
 0x166   :  { %1263 = vrot.lane.b32.xlu0 %v1244_v33, %s3245_s12  ;;  %1025 = vrot.lane.b32.xlu1 %v1005_v0, %s3241_s9  ;;  %v1006_v0 = vmul.f32 %v3541_v4, %v3354_v30 }
 0x168   :  { %v3848_v22 = vpop.permute.xlu0 %319  ;;  %v3850_v3 = vpop.permute.xlu1 %937 }
 0x169   :  { %6739 = vst [vmem:[#allocation22_spill] sm:$0xff] %v3848_v22  ;;  %6740 = vst [vmem:[#allocation23_spill] sm:$0xff] %v3850_v3  ;;  %v767_v22 = vmul.f32 %v3478_v29, %v3382_v43 }
 0x16a   :  { %1614 = vrot.lane.b32.xlu0 %v3346_v26, %s3254_s19  ;;  %1341 = vrot.lane.b32.xlu1 %v1323_v59, %s3247_s13  ;;  %v3255_v59 = vmov 26  }
 0x16c   :  { %v3857_v12 = vpop.permute.xlu0 %625  ;;  %v3859_v11 = vpop.permute.xlu1 %245 }
 0x16d   :  { %6741 = vst [vmem:[#allocation24_spill] sm:$0xff] %v3857_v12  ;;  %6742 = vst [vmem:[#allocation25_spill] sm:$0xff] %v3859_v11  ;;  %v1324_v11 = vmul.f32 %v3703_v58, %v3341_v25 }
 0x16e   :  { %1825 = vperm.xlu0 %3188, %v3312_v1   ;;  %1543 = vrot.lane.b32.xlu1 %v3346_v26, %s3253_s18 }
 0x170   :  { %v3864_v33 = vpop.permute.xlu0 %941  ;;  %v3870_v3 = vpop.permute.xlu1 %545 }
 0x171   :  { %6743 = vst [vmem:[#allocation26_spill] sm:$0xff] %v3864_v33  ;;  %6744 = vst [vmem:[#allocation27_spill] sm:$0xff] %v3870_v3  ;;  %v3256_v33 = vmov 25   ;;  %v1085_v3 = vmul.f32 %v3576_v48, %v3374_v39 }
 0x172   :  { %1027 = vrot.lane.b32.xlu0 %v1006_v0, %s3241_s9  ;;  %1754 = vperm.xlu1 %3187, %v3312_v1  }
 0x173   :  { %3190 = vset.pattern.permute.xlu0 %v3255_v59 }
 0x174   :  { %v3872_v12 = vpop.permute.xlu0 %1099  ;;  %v3884_v59 = vpop.permute.xlu1 %861 }
 0x175   :  { %6745 = vst [vmem:[#allocation28_spill] sm:$0xff] %v3872_v12  ;;  %6747 = vst [vmem:[#allocation30_spill] sm:$0xff] %v3884_v59 }
 0x176   :  { %1343 = vrot.lane.b32.xlu0 %v1324_v11, %s3247_s13  ;;  %789 = vrot.lane.b32.xlu1 %v767_v22, %s3238_s2 }
 0x177   :  { %3189 = vset.pattern.permute.xlu1 %v3256_v33  ;;  %v768_v33 = vmul.f32 %v3478_v29, %v3732_v51 }
 0x178   :  { %v3880_v0 = vpop.permute.xlu0 %393  ;;  %v3895_v22 = vpop.permute.xlu1 %1019 }
 0x179   :  { %6746 = vst [vmem:[#allocation29_spill] sm:$0xff] %v3880_v0  ;;  %6749 = vst [vmem:[#allocation32_spill] sm:$0xff] %v3895_v22  ;;  %v688_v0 = vmul.f32 %v3457_v17, %v3732_v51  ;;  %v1165_v17 = vmul.f32 %v3619_v53, %v3374_v39 }
 0x17a   :  { %1547 = vrot.lane.b32.xlu0 %v3367_v36, %s3253_s18  ;;  %1105 = vrot.lane.b32.xlu1 %v1085_v3, %s3242_s10 }
 0x17c   :  { %v3889_v12 = vpop.permute.xlu0 %705  ;;  %v3910_v59 = vpop.permute.xlu1 %467 }
 0x17d   :  { %6748 = vst [vmem:[#allocation31_spill] sm:$0xff] %v3889_v12  ;;  %v1086_v12 = vmul.f32 %v3576_v48, %v3354_v30  ;;  %6752 = vst [vmem:[#allocation35_spill] sm:$0xff] %v3910_v59  ;;  %v103_v59 = vrot.slane %v3578_v21, 4 }
 0x17e   :  { %1687 = vrot.lane.b32.xlu0 %v3359_v31, %s3257_s20  ;;  %1476 = vrot.lane.b32.xlu1 %v3367_v36, %s3250_s17 }
 0x180   :  { %v3897_v11 = vpop.permute.xlu0 %1021 }
 0x181   :  { %6750 = vst [vmem:[#allocation33_spill] sm:$0xff] %v3897_v11 }
 0x182   :  { %791 = vrot.lane.b32.xlu0 %v768_v33, %s3238_s2  ;;  %1616 = vrot.lane.b32.xlu1 %v3359_v31, %s3254_s19  ;;  %v847_v33 = vmul.f32 %v3499_v42, %v3382_v43 }
 0x184   :  { %v3904_v3 = vpop.permute.xlu0 %1179 }
 0x185   :  { %6751 = vst [vmem:[#allocation34_spill] sm:$0xff] %v3904_v3  ;;  %v3921_v3 = vpop.permute.xlu1 %783 }
 0x186   :  { %1107 = vrot.lane.b32.xlu0 %v1086_v12, %s3242_s10  ;;  %711 = vrot.lane.b32.xlu1 %v688_v0, %s3236_s28  ;;  %6754 = vst [vmem:[#allocation37_spill] sm:$0xff] %v3921_v3  ;;  %v4059_v3 = vmul.f32 %v3703_v58, %v3354_v30 }
 0x188   :  { %v3914_v29 = vpop.permute.xlu0 %469 }
 0x189   :  { %6753 = vst [vmem:[#allocation36_spill] sm:$0xff] %v3914_v29  ;;  %v3932_v0 = vpop.permute.xlu1 %1097  ;;  %v6610_v29 = vmov 0  }
 0x18a   :  { %1478 = vrot.lane.b32.xlu0 %v3341_v25, %s3250_s17  ;;  %869 = vrot.lane.b32.xlu1 %v847_v33, %s3239_s29  ;;  %6757 = vst [vmem:[#allocation40_spill] sm:$0xff] %v3932_v0  ;;  %v1166_v0 = vmul.f32 %v3619_v53, %v3354_v30 }
 0x18c   :  { %v3923_v11 = vpop.permute.xlu0 %785 }
 0x18d   :  { %6755 = vst [vmem:[#allocation38_spill] sm:$0xff] %v3923_v11 }
 0x18e   :  { %1756 = vrot.lane.b32.xlu0 %v3346_v26, %s3258_s21  ;;  %1185 = vrot.lane.b32.xlu1 %v1165_v17, %s3243_s11 }
 0x190   :  { %v3930_v12 = vpop.permute.xlu0 %1101 }
 0x191   :  { %6756 = vst [vmem:[#allocation39_spill] sm:$0xff] %v3930_v12 }
 0x192   :  { %1967 = vperm.xlu0 %3190, %v3312_v1   ;;  %1407 = vrot.lane.b32.xlu1 %v3341_v25, %s3248_s16 }
 0x194   :  { %v3937_v33 = vpop.permute.xlu0 %1259 }
 0x195   :  { %6758 = vst [vmem:[#allocation41_spill] sm:$0xff] %v3937_v33  ;;  %v3939_v11 = vpop.permute.xlu1 %1391 }
 0x196   :  { %6759 = vst [vmem:[#allocation42_spill] sm:$0xff] %v3939_v11  ;;  %3191 = vset.pattern.permute.xlu0 %v6610_v29  ;;  %1685 = vrot.lane.b32.xlu1 %v3346_v26, %s3257_s20  ;;  %v927_v29 = vmul.f32 %v3520_v54, %v3382_v43 }
 0x197   :  { %42 = vperm.xlu0 %3191, %v3312_v1  }
 0x198   :  { %v3945_v17 = vpop.permute.xlu0 %549 }
 0x199   :  { %6760 = vst [vmem:[#allocation43_spill] sm:$0xff] %v3945_v17  ;;  %v3947_v12 = vpop.permute.xlu1 %547  ;;  %v1245_v17 = vmul.f32 %v3661_v10, %v3374_v39 }
 0x19a   :  { %6761 = vst [vmem:[#allocation44_spill] sm:$0xff] %v3947_v12  ;;  %1896 = vperm.xlu1 %3189, %v3312_v1   ;;  %v6764_v12 = vmov 0  }
 0x19b   :  { %1187 = vrot.lane.b32.xlu0 %v1166_v0, %s3243_s11 }
 0x19c   :  { %v3953_v11 = vpop.permute.xlu0 %865 }
 0x19d   :  { %6762 = vst [vmem:[#allocation45_spill] sm:$0xff] %v3953_v11  ;;  %v3957_v33 = vpop.permute.xlu1 %863 }
 0x19e   :  { %6763 = vst [vmem:[#allocation46_spill] sm:$0xff] %v3957_v33  ;;  %949 = vrot.lane.b32.xlu1 %v927_v29, %s3240_s30  ;;  %v104_v33 = vrot.slane %v3610_v45, 4 }
 0x19f   :  { %1409 = vrot.lane.b32.xlu0 %v3374_v39, %s3248_s16  ;;  %3192 = vset.pattern.permute.xlu1 %v6764_v12 }
 0x1a0   :  { %v3965_v1 = vpop.permute.xlu0 %1181 }
 0x1a1   :  { %6765 = vst [vmem:[#allocation47_spill] sm:$0xff] %v3965_v1  ;;  %v3967_v0 = vpop.permute.xlu1 %1177 }
 0x1a2   :  { %6766 = vst [vmem:[#allocation48_spill] sm:$0xff] %v3967_v0  ;;  %1265 = vrot.lane.b32.xlu1 %v1245_v17, %s3245_s12  ;;  %v1087_v0 = vmul.f32 %v3576_v48, %v3382_v43  ;;  %v848_v17 = vmul.f32 %v3499_v42, %v3732_v51  ;;  %v1325_v42 = vmul.f32 %v3703_v58, %v3374_v39 }
 0x1a3   :  { %1689 = vrot.lane.b32.xlu0 %v3367_v36, %s3257_s20 }
 0x1a4   :  { %v3976_v29 = vpop.permute.xlu0 %1339 }
 0x1a5   :  { %v3972_v11 = vpop.permute.xlu1 %1470  ;;  %6768 = vst [vmem:[#allocation50_spill] sm:$0xff] %v3976_v29 }
 0x1a6   :  { %6767 = vst [vmem:[#allocation49_spill] sm:$0xff] %v3972_v11  ;;  %1618 = vrot.lane.b32.xlu1 %v3367_v36, %s3254_s19 }
 0x1a7   :  { %1829 = vrot.lane.b32.xlu0 %v3359_v31, %s3260_s22 }
 0x1a8   :  { %v3989_v11 = vpop.permute.xlu0 %1403 }
 0x1a9   :  { %v3980_v12 = vpop.permute.xlu1 %627  ;;  %6770 = vst [vmem:[#allocation52_spill] sm:$0xff] %v3989_v11 }
 0x1aa   :  { %6769 = vst [vmem:[#allocation51_spill] sm:$0xff] %v3980_v12  ;;  %1758 = vrot.lane.b32.xlu1 %v3359_v31, %s3258_s21  ;;  %v1007_v12 = vmul.f32 %v3541_v4, %v3382_v43 }
 0x1ab   :  { %1109 = vrot.lane.b32.xlu0 %v1087_v0, %s3242_s10 }
 0x1ac   :  { %v4001_v0 = vpop.permute.xlu0 %471 }
 0x1ad   :  { %v3991_v29 = vpop.permute.xlu1 %943  ;;  %6773 = vst [vmem:[#allocation55_spill] sm:$0xff] %v4001_v0 }
 0x1ae   :  { %6771 = vst [vmem:[#allocation53_spill] sm:$0xff] %v3991_v29  ;;  %871 = vrot.lane.b32.xlu1 %v848_v17, %s3239_s29  ;;  %v101_v29 = vrot.slane %v3565_v16, 4 }
 0x1af   :  { %1480 = vrot.lane.b32.xlu0 %v3374_v39, %s3250_s17  ;;  %v99_v39 = vrot.slane %v3580_v24, 4 }
 0x1b0   :  { %v4012_v17 = vpop.permute.xlu0 %787 }
 0x1b1   :  { %v3998_v1 = vpop.permute.xlu1 %1257  ;;  %6775 = vst [vmem:[#allocation57_spill] sm:$0xff] %v4012_v17  ;;  %v1246_v17 = vmul.f32 %v3661_v10, %v3354_v30 }
 0x1b2   :  { %6772 = vst [vmem:[#allocation54_spill] sm:$0xff] %v3998_v1  ;;  %1029 = vrot.lane.b32.xlu1 %v1007_v12, %s3241_s9  ;;  %v1167_v12 = vmul.f32 %v3619_v53, %v3382_v43 }
 0x1b3   :  { %1760 = vrot.lane.b32.xlu0 %v3367_v36, %s3258_s21 }
 0x1b5   :  { %v4007_v11 = vpop.permute.xlu1 %1541 }
 0x1b6   :  { %6774 = vst [vmem:[#allocation56_spill] sm:$0xff] %v4007_v11  ;;  %1345 = vrot.lane.b32.xlu1 %v1325_v42, %s3247_s13  ;;  %v98_v42 = vrot.slane %v3567_v18, 4  ;;  %v100_v11 = vrot.slane %v3590_v32, 4 }
 0x1b7   :  { %1900 = vrot.lane.b32.xlu0 %v3359_v31, %s3261_s23  ;;  %v4026_v31 = vpop.permute.xlu0 %1103 }
 0x1b8   :  { %6778 = vst [vmem:[#allocation60_spill] sm:$0xff] %v4026_v31  ;;  %v4041_v31 = vmul.f32 %v3541_v4, %v3732_v51  ;;  %v106_v0 = vsel %vm105_vm0, %v98_v42, %v99_v39  ;;  %v1088_v4 = vmul.f32 %v3576_v48, %v3732_v51  ;;  %v4063_v42 = vmul.f32 %v3619_v53, %v3732_v51 }
 0x1b9   :  { %v4014_v1 = vpop.permute.xlu1 %707  ;;  %v4074_v48 = vmul.f32 %v3703_v58, %v3732_v51 }
 0x1ba   :  { %6776 = vst [vmem:[#allocation58_spill] sm:$0xff] %v4014_v1  ;;  %1549 = vrot.lane.b32.xlu1 %v3341_v25, %s3253_s18 }
 0x1bb   :  { %1189 = vrot.lane.b32.xlu0 %v1167_v12, %s3243_s11  ;;  %v928_v12 = vmul.f32 %v3520_v54, %v3732_v51  ;;  %v4049_v54 = vmul.f32 %v3661_v10, %v3382_v43  ;;  %6782 = vst [vmem:[#allocation64_spill] sm:$0xff] %v4074_v48  ;;  %v174_v48 = vrot.slane %v3633_v56, 4 }
 0x1bd   :  { %v4021_v36 = vpop.permute.xlu1 %1023 }
 0x1be   :  { %6777 = vst [vmem:[#allocation59_spill] sm:$0xff] %v4021_v36  ;;  %1827 = vrot.lane.b32.xlu1 %v3346_v26, %s3260_s22  ;;  %v102_v36 = vrot.slane %v3602_v38, 4 }
 0x1bf   :  { %1411 = vrot.lane.b32.xlu0 %v3354_v30, %s3248_s16  ;;  %v4078_v30 = vsel %vm107_vm1, %v3567_v18, %v106_v0  ;;  %v173_v0 = vrot.slane %v3623_v50, 4 }
 0x1c0   :  { %6783 = vst [vmem:[#allocation65_spill] sm:$0xff] %v4078_v30  ;;  %v113_v53 = vsel %vm105_vm0, %v101_v29, %v102_v36  ;;  %v115_v22 = vsel %vm105_vm0, %v102_v36, %v103_v59 }
 0x1c1   :  { %v4035_v1 = vpop.permute.xlu1 %1337 }
 0x1c2   :  { %6779 = vst [vmem:[#allocation61_spill] sm:$0xff] %v4035_v1  ;;  %951 = vrot.lane.b32.xlu1 %v928_v12, %s3240_s30  ;;  %v4053_v1 = vpop.permute.xlu0 %1472  ;;  %v4067_v12 = vmul.f32 %v3661_v10, %v3732_v51  ;;  %v179_v10 = vrot.slane %v3608_v41, 4  ;;  %v117_v51 = vsel %vm105_vm0, %v103_v59, %v104_v33  ;;  %v4107_v59 = vsel %vm107_vm1, %v3565_v16, %v113_v53 }
 0x1c3   :  { %1691 = vrot.lane.b32.xlu0 %v3341_v25, %s3257_s20  ;;  %6780 = vst [vmem:[#allocation62_spill] sm:$0xff] %v4053_v1  ;;  %v109_v25 = vsel %vm105_vm0, %v99_v39, %v100_v11  ;;  %v111_v1 = vsel %vm105_vm0, %v100_v11, %v101_v29  ;;  %v4086_v39 = vmul.f32 %v3703_v58, %v3382_v43  ;;  %v175_v11 = vrot.slane %v3588_v44, 4 }
 0x1c4   :  { %6781 = vst [vmem:[#allocation63_spill] sm:$0xff] %v4067_v12  ;;  %v4095_v18 = vsel %vm107_vm1, %v3580_v24, %v109_v25  ;;  %v4099_v29 = vsel %vm107_vm1, %v3590_v32, %v111_v1  ;;  %v177_v43 = vrot.slane %v3600_v37, 4  ;;  %v176_v58 = vrot.slane %v3643_v61, 4  ;;  %6786 = vst [vmem:[#allocation68_spill] sm:$0xff] %v4107_v59 }
 0x1c5   :  { %v4082_v12 = vpop.permute.xlu1 %1401  ;;  %6784 = vst [vmem:[#allocation66_spill] sm:$0xff] %v4095_v18  ;;  %6785 = vst [vmem:[#allocation67_spill] sm:$0xff] %v4099_v29  ;;  %v322_v24 = vrot.slane %v3631_v55, 4  ;;  %v4114_v32 = vsel %vm107_vm1, %v3602_v38, %v115_v22  ;;  %v4118_v1 = vsel %vm181_vm2, %v3608_v41, %v179_v10  ;;  %v4126_v16 = vsel %vm107_vm1, %v3610_v45, %v104_v33 }
 0x1c6   :  { %1267 = vrot.lane.b32.xlu1 %v1246_v17, %s3245_s12  ;;  %v6633_v17 = vrot.slane %v3649_v63, 4  ;;  %6787 = vst [vmem:[#allocation69_spill] sm:$0xff] %v4114_v32  ;;  %6788 = vst [vmem:[#allocation70_spill] sm:$0xff] %v4118_v1  ;;  %v248_v38 = vrot.slane %v3621_v49, 4  ;;  %v180_v22 = vsel %vm105_vm0, %v173_v0, %v174_v48  ;;  %v183_v41 = vsel %vm105_vm0, %v174_v48, %v175_v11 }
 0x1c7   :  { %1969 = vrot.lane.b32.xlu0 %v3346_v26, %s3262_s24  ;;  %v4122_v26 = vsel %vm107_vm1, %v3578_v21, %v117_v51  ;;  %6790 = vst [vmem:[#allocation72_spill] sm:$0xff] %v4126_v16  ;;  %v178_v53 = vrot.slane %v3651_v6, 4  ;;  %v4139_v21 = vld [vmem:[%s6562_s0 + $0x18] sm:$0xff]  ;;  %v185_v45 = vsel %vm105_vm0, %v175_v11, %v176_v58  ;;  %v187_v51 = vsel %vm105_vm0, %v176_v58, %v177_v43 }
 0x1c8   :  { %6789 = vst [vmem:[#allocation71_spill] sm:$0xff] %v4122_v26  ;;  %v247_v33 = vrot.slane %v3665_v15, 4  ;;  %v321_v0 = vrot.slane %v3675_v28, 4  ;;  %v331_v48 = vsel %vm105_vm0, %v322_v24, %v6633_v17  ;;  %v474_v1 = vrot.slane %v3663_v14, 4 }
 0x1c9   :  { %v4128_v36 = vpop.permute.xlu0 %1683  ;;  %v4130_v25 = vpop.permute.xlu1 %1612  ;;  %v249_v16 = vrot.slane %v3685_v35, 4  ;;  %v6634_v26 = vrot.slane %v3691_v46, 4  ;;  %v4156_v11 = vsel %vm181_vm2, %v3623_v50, %v180_v22  ;;  %v4160_v58 = vsel %vm181_vm2, %v3633_v56, %v183_v41  ;;  %v4181_v41 = vld [vmem:[%s6562_s0] sm:$0xff] }
 0x1ca   :  { %1620 = vrot.lane.b32.xlu1 %v4139_v21, %s3254_s19  ;;  %6791 = vst [vmem:[#allocation73_spill] sm:$0xff] %v4156_v11  ;;  %6792 = vst [vmem:[#allocation74_spill] sm:$0xff] %v4160_v58  ;;  %v396_v32 = vrot.slane %v3693_v47, 4  ;;  %v4170_v29 = vsel %vm181_vm2, %v3588_v44, %v185_v45  ;;  %v4174_v50 = vsel %vm181_vm2, %v3643_v61, %v187_v51  ;;  %v397_v45 = vrot.slane %v3673_v27, 4 }
 0x1cb   :  { %1111 = vrot.lane.b32.xlu0 %v1088_v4, %s3242_s10  ;;  %v395_v4 = vrot.slane %v3641_v60, 4  ;;  %6793 = vst [vmem:[#allocation75_spill] sm:$0xff] %v4170_v29  ;;  %6794 = vst [vmem:[#allocation76_spill] sm:$0xff] %v4174_v50  ;;  %v189_v22 = vsel %vm105_vm0, %v177_v43, %v178_v53  ;;  %v191_v56 = vsel %vm105_vm0, %v178_v53, %v179_v10  ;;  %v4195_v10 = vld [vmem:[%s6562_s0 + $0x28] sm:$0xff]  ;;  %v554_v53 = vrot.slane %v3683_v34, 4 }
 0x1cc   :  { %6795 = vst [vmem:[#allocation77_spill] sm:$0xff] %v4181_v41  ;;  %v4187_v44 = vsel %vm329_vm3, %v3631_v55, %v331_v48  ;;  %v254_v61 = vsel %vm105_vm0, %v247_v33, %v248_v38  ;;  %v328_v43 = vsel %vm105_vm0, %v321_v0, %v322_v24  ;;  %v257_v51 = vsel %vm105_vm0, %v248_v38, %v249_v16 }
 0x1cd   :  { %v4164_v59 = vpop.permute.xlu0 %867  ;;  %v4166_v17 = vpop.permute.xlu1 %629  ;;  %6796 = vst [vmem:[#allocation78_spill] sm:$0xff] %v4187_v44  ;;  %v484_v55 = vsel %vm105_vm0, %v474_v1, %v6634_v26  ;;  %v473_v33 = vrot.slane %v3707_v7, 4  ;;  %v402_v24 = vsel %vm105_vm0, %v395_v4, %v396_v32  ;;  %v398_v0 = vrot.slane %v3715_v19, 4 }
 0x1ce   :  { %1898 = vrot.lane.b32.xlu1 %v4181_v41, %s3261_s23  ;;  %v250_v48 = vrot.slane %v3717_v20, 4  ;;  %v553_v44 = vrot.slane %v3727_v40, 4  ;;  %v4215_v38 = vsel %vm181_vm2, %v3600_v37, %v189_v22  ;;  %v4219_v26 = vsel %vm181_vm2, %v3651_v6, %v191_v56 }
 0x1cf   :  { %1482 = vrot.lane.b32.xlu0 %v4195_v10, %s3250_s17  ;;  %6797 = vst [vmem:[#allocation79_spill] sm:$0xff] %v4215_v38  ;;  %6798 = vst [vmem:[#allocation80_spill] sm:$0xff] %v4219_v26  ;;  %v6635_v4 = vrot.slane %v3737_v52, 4  ;;  %v324_v58 = vrot.slane %v3739_v57, 4  ;;  %v4227_v11 = vsel %vm255_vm4, %v3665_v15, %v254_v61  ;;  %v4231_v37 = vsel %vm329_vm3, %v3675_v28, %v328_v43  ;;  %v6810_v43 = vld [vmem:[#allocation8_spill] sm:$0xff]  ;;  %v6831_v26 = vld [vmem:[#allocation17_spill] sm:$0xff] }
 0x1d0   :  { %6799 = vst [vmem:[#allocation81_spill] sm:$0xff] %v4227_v11  ;;  %6800 = vst [vmem:[#allocation82_spill] sm:$0xff] %v4231_v37  ;;  %v4235_v6 = vsel %vm255_vm4, %v3621_v49, %v257_v51  ;;  %v405_v22 = vsel %vm105_vm0, %v396_v32, %v397_v45  ;;  %v4246_v15 = vsel %vm403_vm6, %v3641_v60, %v402_v24  ;;  %v634_v28 = vrot.slane %v3705_v62, 4  ;;  %v6809_v24 = vld [vmem:[#allocation7_spill] sm:$0xff] }
 0x1d1   :  { %v4209_v50 = vpop.permute.xlu0 %1183  ;;  %v4211_v29 = vpop.permute.xlu1 %945  ;;  %6801 = vst [vmem:[#allocation83_spill] sm:$0xff] %v4235_v6  ;;  %6803 = vst [vmem:[#allocation85_spill] sm:$0xff] %v4246_v15  ;;  %v481_v56 = vsel %vm105_vm0, %v473_v33, %v474_v1  ;;  %v407_v49 = vsel %vm105_vm0, %v397_v45, %v398_v0  ;;  %v259_v32 = vsel %vm105_vm0, %v249_v16, %v250_v48  ;;  %v6806_v60 = vrot.slane %v3649_v63, 4  ;;  %v6825_v15 = vld [vmem:[#allocation13_spill] sm:$0xff]  ;;  %v6827_v37 = vld [vmem:[#allocation15_spill] sm:$0xff] }
 0x1d2   :  { %1031 = vrot.lane.b32.xlu1 %v4041_v31, %s3241_s9  ;;  %v4242_v31 = vsel %vm482_vm5, %v3663_v14, %v484_v55  ;;  %v561_v61 = vsel %vm105_vm0, %v553_v44, %v554_v53  ;;  %v335_v1 = vsel %vm105_vm0, %v324_v58, %v6635_v4  ;;  %v633_v45 = vrot.slane %v3749_v2, 4  ;;  %v6814_v4 = vld [vmem:[#allocation10_spill] sm:$0xff] }
 0x1d3   :  { %1762 = vrot.lane.b32.xlu0 %v4139_v21, %s3258_s21  ;;  %6802 = vst [vmem:[#allocation84_spill] sm:$0xff] %v4242_v31  ;;  %v333_v55 = vsel %vm105_vm0, %v6806_v60, %v324_v58  ;;  %v251_v16 = vrot.slane %v3759_v8, 4  ;;  %v4270_v44 = vsel %vm403_vm6, %v3693_v47, %v405_v22  ;;  %v4274_v33 = vsel %vm482_vm5, %v3707_v7, %v481_v56  ;;  %v6813_v47 = vld [vmem:[#allocation4_spill] sm:$0xff] }
 0x1d4   :  { %6807 = vst [vmem:[#allocation88_spill] sm:$0xff] %v4270_v44  ;;  %6808 = vst [vmem:[#allocation89_spill] sm:$0xff] %v4274_v33  ;;  %v399_v60 = vrot.slane %v6809_v24, 4  ;;  %v555_v31 = vrot.slane %v6810_v43, 4  ;;  %v4282_v58 = vsel %vm403_vm6, %v3673_v27, %v407_v49  ;;  %v713_v22 = vrot.slane %v6813_v47, 4 }
 0x1d5   :  { %v4254_v51 = vpop.permute.xlu0 %1405  ;;  %v4256_v14 = vpop.permute.xlu1 %1261  ;;  %6811 = vst [vmem:[#allocation7_spill] sm:$0xff] %v4282_v58  ;;  %v714_v7 = vrot.slane %v6814_v4, 4  ;;  %v4292_v56 = vsel %vm562_vm7, %v3727_v40, %v561_v61  ;;  %v4296_v33 = vsel %vm329_vm3, %v3649_v63, %v333_v55  ;;  %v4300_v27 = vsel %vm329_vm3, %v3739_v57, %v335_v1  ;;  %v6820_v61 = vld [vmem:[#allocation6_spill] sm:$0xff]  ;;  %v6821_v55 = vld [vmem:[#allocation9_spill] sm:$0xff] }
 0x1d6   :  { %6804 = vst [vmem:[#allocation86_spill] sm:$0xff] %v4254_v51  ;;  %6805 = vst [vmem:[#allocation87_spill] sm:$0xff] %v4256_v14  ;;  %1347 = vrot.lane.b32.xlu1 %v4059_v3, %s3247_s13  ;;  %v4286_v3 = vsel %vm255_vm4, %v3685_v35, %v259_v32  ;;  %v641_v40 = vsel %vm105_vm0, %v633_v45, %v634_v28  ;;  %v794_v58 = vrot.slane %v6820_v61, 4  ;;  %v4316_v57 = vld [vmem:[%s6562_s0 + $0x20] sm:$0xff]  ;;  %vm1282_vm1 = vcmask 56320  }
 0x1d7   :  { %1191 = vrot.lane.b32.xlu0 %v4063_v42, %s3243_s11  ;;  %6812 = vst [vmem:[#allocation8_spill] sm:$0xff] %v4286_v3  ;;  %6815 = vst [vmem:[#allocation4_spill] sm:$0xff] %v4292_v56  ;;  %v6818_v42 = vrot.slane %v3747_v13, 4  ;;  %v261_v63 = vsel %vm105_vm0, %v250_v48, %v251_v16  ;;  %v715_v56 = vrot.slane %v6821_v55, 4  ;;  %v409_v1 = vsel %vm105_vm0, %v398_v0, %v399_v60  ;;  %v4327_v48 = vld [vmem:[%s6562_s0 + $0x30] sm:$0xff]  ;;  %v6826_v3 = vld [vmem:[#allocation14_spill] sm:$0xff] }
 0x1d8   :  { %6816 = vst [vmem:[#allocation10_spill] sm:$0xff] %v4296_v33  ;;  %6817 = vst [vmem:[#allocation90_spill] sm:$0xff] %v4300_v27  ;;  %v6823_v33 = vld [vmem:[#allocation12_spill] sm:$0xff]  ;;  %v721_v44 = vsel %vm105_vm0, %v713_v22, %v714_v7  ;;  %v793_v27 = vrot.slane %v6825_v15, 4  ;;  %v4341_v45 = vsel %vm642_vm8, %v3749_v2, %v641_v40  ;;  %v4345_v11 = vsel %vm255_vm4, %v3717_v20, %v261_v63  ;;  %v6836_v40 = vld [vmem:[#allocation11_spill] sm:$0xff] }
 0x1d9   :  { %v644_v35 = vsel %vm105_vm0, %v634_v28, %v6818_v42  ;;  %v4305_v49 = vpop.permute.xlu0 %1545  ;;  %v4307_v32 = vpop.permute.xlu1 %1474  ;;  %6822 = vst [vmem:[#allocation6_spill] sm:$0xff] %v4316_v57  ;;  %v564_v42 = vsel %vm105_vm0, %v554_v53, %v555_v31  ;;  %v476_v28 = vrot.slane %v6823_v33, 4  ;;  %6824 = vst [vmem:[#allocation9_spill] sm:$0xff] %v4327_v48  ;;  %v4354_v53 = vsel %vm403_vm6, %v3715_v19, %v409_v1 }
 0x1da   :  { %6819 = vst [vmem:[#allocation91_spill] sm:$0xff] %v4305_v49  ;;  %1551 = vrot.lane.b32.xlu1 %v4316_v57, %s3253_s18  ;;  %v4337_v6 = vsel %vm642_vm8, %v3705_v62, %v644_v35  ;;  %6829 = vst [vmem:[#allocation13_spill] sm:$0xff] %v4341_v45  ;;  %v4358_v62 = vsel %vm562_vm7, %v3683_v34, %v564_v42  ;;  %v724_v2 = vsel %vm105_vm0, %v714_v7, %v715_v56  ;;  %v4365_v35 = vld [vmem:[%s6562_s0 + $0x10] sm:$0xff]  ;;  %v6850_v49 = vld [vmem:[#allocation23_spill] sm:$0xff]  ;;  %vm1426_vm2 = vcmask 457728  }
 0x1db   :  { %1413 = vrot.lane.b32.xlu0 %v4327_v48, %s3248_s16  ;;  %6828 = vst [vmem:[#allocation12_spill] sm:$0xff] %v4337_v6  ;;  %6830 = vst [vmem:[#allocation14_spill] sm:$0xff] %v4345_v11  ;;  %v4371_v19 = vsel %vm722_vm9, %v6813_v47, %v721_v44  ;;  %v6837_v34 = vrot.slane %v3691_v46, 4  ;;  %v6838_v1 = vrot.slane %v3791_v23, 4  ;;  %v801_v20 = vsel %vm105_vm0, %v793_v27, %v794_v58  ;;  %v6845_v11 = vld [vmem:[#allocation20_spill] sm:$0xff] }
 0x1dc   :  { %6832 = vst [vmem:[#allocation15_spill] sm:$0xff] %v4354_v53  ;;  %6833 = vst [vmem:[#allocation17_spill] sm:$0xff] %v4358_v62  ;;  %v6839_v22 = vrot.slane %v6826_v3, 4  ;;  %v6840_v47 = vrot.slane %v6827_v37, 4  ;;  %v6842_v45 = vrot.slane %v6831_v26, 4  ;;  %v6844_v62 = vld [vmem:[#allocation19_spill] sm:$0xff]  ;;  %v4415_v53 = vsel %vm722_vm9, %v6814_v4, %v724_v2 }
 0x1dd   :  { %v4348_v38 = vpop.permute.xlu0 %631  ;;  %v4350_v0 = vpop.permute.xlu1 %551  ;;  %6834 = vst [vmem:[#allocation92_spill] sm:$0xff] %v4365_v35  ;;  %6835 = vst [vmem:[#allocation93_spill] sm:$0xff] %v4371_v19  ;;  %v486_v7 = vsel %vm105_vm0, %v6837_v34, %v476_v28  ;;  %v488_v42 = vsel %vm105_vm0, %v476_v28, %v6838_v1  ;;  %v6841_v19 = vld [vmem:[#allocation16_spill] sm:$0xff]  ;;  %v6843_v1 = vld [vmem:[#allocation18_spill] sm:$0xff]  ;;  %v326_v27 = vrot.slane %v6845_v11, 4 }
 0x1de   :  { %1831 = vrot.lane.b32.xlu1 %v4365_v35, %s3260_s22  ;;  %v804_v44 = vsel %vm105_vm0, %v794_v58, %v6839_v22  ;;  %v263_v63 = vsel %vm105_vm0, %v251_v16, %v6840_v47  ;;  %v954_v34 = vrot.slane %v6841_v19, 4  ;;  %v566_v28 = vsel %vm105_vm0, %v555_v31, %v6842_v45  ;;  %v6849_v47 = vld [vmem:[#allocation22_spill] sm:$0xff]  ;;  %v4409_v45 = vld [vmem:[%s6562_s0 + $0x8] sm:$0xff]  ;;  %6852 = vst [vmem:[#allocation19_spill] sm:$0xff] %v4415_v53 }
 0x1df   :  { %1693 = vrot.lane.b32.xlu0 %v4316_v57, %s3257_s20  ;;  %v873_v6 = vrot.slane %v6843_v1, 4  ;;  %v6848_v58 = vrot.slane %v3818_v9, 4  ;;  %v636_v22 = vrot.slane %v3840_v5, 4  ;;  %v327_v41 = vrot.slane %v6849_v47, 4  ;;  %6851 = vst [vmem:[#allocation18_spill] sm:$0xff] %v4409_v45 }
 0x1e0   :  { %v953_v31 = vrot.slane %v6850_v49, 4  ;;  %v4434_v4 = vsel %vm802_vm10, %v6820_v61, %v804_v44  ;;  %v6864_v44 = vrot.slane %v3747_v13, 4 }
 0x1e1   :  { %v4396_v18 = vpop.permute.xlu0 %947  ;;  %v4398_v30 = vpop.permute.xlu1 %709  ;;  %v411_v16 = vsel %vm105_vm0, %v399_v60, %v6848_v58  ;;  %v4419_v60 = vsel %vm482_vm5, %v3691_v46, %v486_v7  ;;  %v4423_v58 = vsel %vm482_vm5, %v6823_v33, %v488_v42  ;;  %v4438_v46 = vsel %vm255_vm4, %v3759_v8, %v263_v63 }
 0x1e2   :  { %6846 = vst [vmem:[#allocation11_spill] sm:$0xff] %v4396_v18  ;;  %6847 = vst [vmem:[#allocation16_spill] sm:$0xff] %v4398_v30  ;;  %1971 = vrot.lane.b32.xlu1 %v4409_v45, %s3262_s24  ;;  %v6855_v30 = vld [vmem:[#allocation24_spill] sm:$0xff]  ;;  %v4430_v45 = vsel %vm802_vm10, %v6825_v15, %v801_v20  ;;  %v4442_v33 = vsel %vm562_vm7, %v6810_v43, %v566_v28  ;;  %v4446_v2 = vsel %vm403_vm6, %v6809_v24, %v411_v16  ;;  %v6865_v16 = vld [vmem:[#allocation25_spill] sm:$0xff] }
 0x1e3   :  { %6853 = vst [vmem:[#allocation20_spill] sm:$0xff] %v4419_v60  ;;  %6854 = vst [vmem:[#allocation22_spill] sm:$0xff] %v4423_v58  ;;  %v6641_v18 = vrot.slane %v6855_v30, 4  ;;  %1973 = vrot.lane.b32.xlu0 %v4365_v35, %s3262_s24  ;;  %v6861_v7 = vrot.slane %v6836_v40, 4  ;;  %v6862_v20 = vrot.slane %v6844_v62, 4  ;;  %v6863_v42 = vrot.slane %v3737_v52, 4 }
 0x1e4   :  { %6856 = vst [vmem:[#allocation23_spill] sm:$0xff] %v4430_v45  ;;  %6857 = vst [vmem:[#allocation24_spill] sm:$0xff] %v4434_v4  ;;  %v646_v24 = vsel %vm105_vm0, %v6864_v44, %v636_v22  ;;  %v339_v28 = vsel %vm105_vm0, %v326_v27, %v327_v41  ;;  %v6868_v45 = vld [vmem:[#allocation30_spill] sm:$0xff]  ;;  %v6900_v58 = vld [vmem:[#allocation28_spill] sm:$0xff] }
 0x1e5   :  { %6858 = vst [vmem:[#allocation94_spill] sm:$0xff] %v4438_v46  ;;  %6859 = vst [vmem:[#allocation95_spill] sm:$0xff] %v4442_v33  ;;  %v881_v15 = vsel %vm105_vm0, %v873_v6, %v6861_v7  ;;  %v726_v61 = vsel %vm105_vm0, %v715_v56, %v6862_v20  ;;  %v337_v8 = vsel %vm105_vm0, %v6863_v42, %v326_v27  ;;  %v4457_v63 = vpop.permute.xlu0 %1263  ;;  %v4459_v43 = vpop.permute.xlu1 %1025  ;;  %v253_v7 = vrot.slane %v6865_v16, 4  ;;  %v6866_v20 = vld [vmem:[#allocation26_spill] sm:$0xff]  ;;  %v6867_v33 = vld [vmem:[#allocation27_spill] sm:$0xff] }
 0x1e6   :  { %6860 = vst [vmem:[#allocation96_spill] sm:$0xff] %v4446_v2  ;;  %v961_v6 = vsel %vm105_vm0, %v953_v31, %v954_v34  ;;  %1269 = vrot.lane.b32.xlu1 %v4049_v54, %s3245_s12  ;;  %v648_v56 = vsel %vm105_vm0, %v636_v22, %v6641_v18  ;;  %v6642_v42 = vrot.slane %v6866_v20, 4  ;;  %v4479_v27 = vsel %vm882_vm11, %v6843_v1, %v881_v15  ;;  %v6872_v31 = vld [vmem:[#allocation29_spill] sm:$0xff] }
 0x1e7   :  { %1484 = vrot.lane.b32.xlu0 %v4327_v48, %s3250_s17  ;;  %6869 = vst [vmem:[#allocation25_spill] sm:$0xff] %v4479_v27  ;;  %v4483_v54 = vsel %vm722_vm9, %v6821_v55, %v726_v61  ;;  %v4487_v22 = vsel %vm329_vm3, %v3737_v52, %v337_v8  ;;  %v401_v44 = vrot.slane %v6872_v31, 4  ;;  %v6873_v18 = vld [vmem:[#allocation21_spill] sm:$0xff]  ;;  %v4493_v60 = vsel %vm642_vm8, %v3747_v13, %v646_v24  ;;  %v6892_v27 = vld [vmem:[#allocation40_spill] sm:$0xff] }
 0x1e8   :  { %6870 = vst [vmem:[#allocation26_spill] sm:$0xff] %v4483_v54  ;;  %6871 = vst [vmem:[#allocation27_spill] sm:$0xff] %v4487_v22  ;;  %v1033_v4 = vrot.slane %v6873_v18, 4  ;;  %v4497_v1 = vsel %vm329_vm3, %v6845_v11, %v339_v28  ;;  %v4501_v55 = vsel %vm329_vm3, %v6849_v47, %v327_v41  ;;  %v4509_v61 = vsel %vm962_vm12, %v6850_v49, %v961_v6  ;;  %v6899_v22 = vld [vmem:[#allocation39_spill] sm:$0xff] }
 0x1e9   :  { %6874 = vst [vmem:[#allocation30_spill] sm:$0xff] %v4493_v60  ;;  %6875 = vst [vmem:[#allocation29_spill] sm:$0xff] %v4497_v1  ;;  %v4503_v15 = vpop.permute.xlu0 %1614  ;;  %v4505_v52 = vpop.permute.xlu1 %1341  ;;  %v4513_v13 = vsel %vm642_vm8, %v3840_v5, %v648_v56  ;;  %v6880_v8 = vrot.slane %v6827_v37, 4  ;;  %v4520_v41 = vsel %vm255_vm4, %v6865_v16, %v253_v7  ;;  %v964_v49 = vsel %vm105_vm0, %v954_v34, %v6642_v42  ;;  %v6888_v42 = vld [vmem:[#allocation31_spill] sm:$0xff] }
 0x1ea   :  { %6876 = vst [vmem:[#allocation21_spill] sm:$0xff] %v4501_v55  ;;  %6877 = vst [vmem:[#allocation97_spill] sm:$0xff] %v4505_v52  ;;  %1622 = vrot.lane.b32.xlu1 %v4316_v57, %s3254_s19  ;;  %v6882_v47 = vrot.slane %v6867_v33, 4  ;;  %v6883_v5 = vrot.slane %v6831_v26, 4  ;;  %v6884_v28 = vrot.slane %v6868_v45, 4  ;;  %v6885_v6 = vrot.slane %v6836_v40, 4 }
 0x1eb   :  { %6878 = vst [vmem:[#allocation98_spill] sm:$0xff] %v4509_v61  ;;  %6879 = vst [vmem:[#allocation99_spill] sm:$0xff] %v4513_v13  ;;  %v265_v11 = vsel %vm105_vm0, %v6880_v8, %v253_v7  ;;  %v6886_v7 = vld [vmem:[#allocation32_spill] sm:$0xff]  ;;  %1764 = vrot.lane.b32.xlu0 %v4316_v57, %s3258_s21  ;;  %v6887_v8 = vrot.slane %v3818_v9, 4  ;;  %v6889_v60 = vld [vmem:[#allocation35_spill] sm:$0xff]  ;;  %v1113_v53 = vrot.slane %v6892_v27, 4  ;;  %v4560_v54 = vsel %vm962_vm12, %v6841_v19, %v964_v49 }
 0x1ec   :  { %6881 = vst [vmem:[#allocation100_spill] sm:$0xff] %v4520_v41  ;;  %v568_v24 = vsel %vm105_vm0, %v6883_v5, %v6882_v47  ;;  %v884_v16 = vsel %vm105_vm0, %v6885_v6, %v6884_v28  ;;  %v1034_v56 = vrot.slane %v6886_v7, 4  ;;  %v478_v55 = vrot.slane %v6889_v60, 4  ;;  %v6890_v47 = vld [vmem:[#allocation33_spill] sm:$0xff]  ;;  %v6893_v28 = vld [vmem:[#allocation36_spill] sm:$0xff]  ;;  %v6894_v13 = vld [vmem:[#allocation38_spill] sm:$0xff] }
 0x1ed   :  { %v413_v34 = vsel %vm105_vm0, %v6887_v8, %v401_v44  ;;  %v6891_v61 = vld [vmem:[#allocation37_spill] sm:$0xff]  ;;  %v4550_v2 = vpop.permute.xlu0 %1825  ;;  %v4552_v1 = vpop.permute.xlu1 %1543  ;;  %v4556_v8 = vsel %vm255_vm4, %v6827_v37, %v265_v11  ;;  %6897 = vst [vmem:[#allocation35_spill] sm:$0xff] %v4560_v54  ;;  %v4564_v5 = vsel %vm562_vm7, %v6831_v26, %v568_v24  ;;  %v1114_v46 = vrot.slane %v6900_v58, 4  ;;  %v6903_v26 = vld [vmem:[#allocation64_spill] sm:$0xff] }
 0x1ee   :  { %v796_v41 = vrot.slane %v6891_v61, 4  ;;  %6895 = vst [vmem:[#allocation32_spill] sm:$0xff] %v4550_v2  ;;  %6896 = vst [vmem:[#allocation31_spill] sm:$0xff] %v4556_v8  ;;  %1902 = vrot.lane.b32.xlu1 %v4365_v35, %s3261_s23  ;;  %v4572_v2 = vsel %vm882_vm11, %v6836_v40, %v884_v16  ;;  %v4576_v37 = vsel %vm403_vm6, %v6872_v31, %v401_v44  ;;  %v6905_v49 = vrot.slane %v6888_v42, 4 }
 0x1ef   :  { %6898 = vst [vmem:[#allocation33_spill] sm:$0xff] %v4564_v5  ;;  %6901 = vst [vmem:[#allocation37_spill] sm:$0xff] %v4572_v2  ;;  %v1041_v19 = vsel %vm105_vm0, %v1033_v4, %v1034_v56  ;;  %1351 = vrot.lane.b32.xlu0 %v6903_v26, %s3247_s13  ;;  %v4583_v11 = vsel %vm403_vm6, %v3818_v9, %v413_v34  ;;  %v6906_v24 = vrot.slane %v6844_v62, 4  ;;  %v6907_v16 = vrot.slane %v3791_v23, 4  ;;  %v6913_v2 = vld [vmem:[#allocation43_spill] sm:$0xff]  ;;  %v6914_v5 = vld [vmem:[#allocation44_spill] sm:$0xff] }
 0x1f0   :  { %6902 = vst [vmem:[#allocation40_spill] sm:$0xff] %v4576_v37  ;;  %6904 = vst [vmem:[#allocation36_spill] sm:$0xff] %v4583_v11  ;;  %v6908_v4 = vrot.slane %v6890_v47, 4  ;;  %v6909_v26 = vrot.slane %v6826_v3, 4  ;;  %v1121_v9 = vsel %vm105_vm0, %v1113_v53, %v1114_v46  ;;  %v6910_v34 = vrot.slane %v6893_v28, 4  ;;  %v6915_v11 = vld [vmem:[#allocation46_spill] sm:$0xff] }
 0x1f1   :  { %v728_v40 = vsel %vm105_vm0, %v6906_v24, %v6905_v49  ;;  %v490_v31 = vsel %vm105_vm0, %v6907_v16, %v478_v55  ;;  %v6911_v49 = vrot.slane %v6894_v13, 4  ;;  %v4606_v54 = vpop.permute.xlu0 %1027  ;;  %v4608_v16 = vpop.permute.xlu1 %1754  ;;  %v558_v53 = vrot.slane %v6914_v5, 4 }
 0x1f2   :  { %v1044_v44 = vsel %vm105_vm0, %v1034_v56, %v6908_v4  ;;  %v806_v6 = vsel %vm105_vm0, %v6909_v26, %v796_v41  ;;  %v492_v37 = vsel %vm105_vm0, %v478_v55, %v6910_v34  ;;  %v6912_v56 = vrot.slane %v6899_v22, 4  ;;  %1349 = vrot.lane.b32.xlu1 %v4086_v39, %s3247_s13  ;;  %v6918_v34 = vld [vmem:[#allocation45_spill] sm:$0xff] }
 0x1f3   :  { %v808_v24 = vsel %vm105_vm0, %v796_v41, %v6911_v49  ;;  %v876_v8 = vrot.slane %v6915_v11, 4  ;;  %v4620_v55 = vsel %vm1042_vm13, %v6873_v18, %v1041_v19  ;;  %v4624_v41 = vsel %vm722_vm9, %v6844_v62, %v728_v40  ;;  %1555 = vrot.lane.b32.xlu0 %v4327_v48, %s3253_s18  ;;  %v6923_v62 = vld [vmem:[#allocation34_spill] sm:$0xff] }
 0x1f4   :  { %v1124_v4 = vsel %vm105_vm0, %v1114_v46, %v6912_v56  ;;  %6916 = vst [vmem:[#allocation38_spill] sm:$0xff] %v4620_v55  ;;  %6917 = vst [vmem:[#allocation39_spill] sm:$0xff] %v4624_v41  ;;  %v6643_v49 = vrot.slane %v6918_v34, 4  ;;  %v6919_v46 = vld [vmem:[#allocation47_spill] sm:$0xff]  ;;  %v4632_v26 = vsel %vm482_vm5, %v3791_v23, %v490_v31  ;;  %v4636_v39 = vsel %vm1042_vm13, %v6886_v7, %v1044_v44  ;;  %v6939_v41 = vld [vmem:[#allocation53_spill] sm:$0xff] }
 0x1f5   :  { %6920 = vst [vmem:[#allocation28_spill] sm:$0xff] %v4632_v26  ;;  %6921 = vst [vmem:[#allocation64_spill] sm:$0xff] %v4636_v39  ;;  %v4640_v18 = vsel %vm802_vm10, %v6826_v3, %v806_v6  ;;  %v1194_v19 = vrot.slane %v6923_v62, 4  ;;  %v4645_v40 = vsel %vm1122_vm14, %v6892_v27, %v1121_v9  ;;  %v4649_v56 = vsel %vm482_vm5, %v6889_v60, %v492_v37  ;;  %v4659_v3 = vpop.permute.xlu0 %1343  ;;  %v4661_v6 = vpop.permute.xlu1 %789  ;;  %v6932_v9 = vld [vmem:[#allocation48_spill] sm:$0xff]  ;;  %v6938_v39 = vld [vmem:[#allocation42_spill] sm:$0xff] }
 0x1f6   :  { %6922 = vst [vmem:[#allocation43_spill] sm:$0xff] %v4640_v18  ;;  %6924 = vst [vmem:[#allocation44_spill] sm:$0xff] %v4645_v40  ;;  %v4653_v23 = vsel %vm802_vm10, %v6891_v61, %v808_v24  ;;  %v4657_v7 = vsel %vm1122_vm14, %v6900_v58, %v1124_v4  ;;  %v6929_v27 = vrot.slane %v6867_v33, 4  ;;  %v6930_v60 = vrot.slane %v6913_v2, 4  ;;  %1553 = vrot.lane.b32.xlu1 %v4195_v10, %s3253_s18  ;;  %v6934_v18 = vld [vmem:[#allocation51_spill] sm:$0xff]  ;;  %v6944_v55 = vld [vmem:[#allocation54_spill] sm:$0xff] }
 0x1f7   :  { %6925 = vst [vmem:[#allocation46_spill] sm:$0xff] %v4649_v56  ;;  %6926 = vst [vmem:[#allocation45_spill] sm:$0xff] %v4653_v23  ;;  %v6931_v61 = vrot.slane %v6868_v45, 4  ;;  %v1193_v58 = vrot.slane %v6932_v9, 4  ;;  %v888_v24 = vsel %vm105_vm0, %v876_v8, %v6643_v49  ;;  %v6933_v4 = vrot.slane %v6919_v46, 4  ;;  %1835 = vrot.lane.b32.xlu0 %v4316_v57, %s3260_s22 }
 0x1f8   :  { %6927 = vst [vmem:[#allocation34_spill] sm:$0xff] %v4657_v7  ;;  %6928 = vst [vmem:[#allocation101_spill] sm:$0xff] %v4659_v3  ;;  %v570_v31 = vsel %vm105_vm0, %v6929_v27, %v558_v53  ;;  %v572_v37 = vsel %vm105_vm0, %v558_v53, %v6930_v60  ;;  %v6935_v60 = vld [vmem:[#allocation55_spill] sm:$0xff]  ;;  %v1273_v26 = vrot.slane %v6944_v55, 4  ;;  %vm1362_vm3 = vcmask 48128  }
 0x1f9   :  { %v886_v44 = vsel %vm105_vm0, %v6931_v61, %v876_v8  ;;  %v1204_v27 = vsel %vm105_vm0, %v1194_v19, %v6933_v4  ;;  %v480_v40 = vrot.slane %v6935_v60, 4  ;;  %v6936_v61 = vld [vmem:[#allocation41_spill] sm:$0xff]  ;;  %v6937_v7 = vld [vmem:[#allocation3_spill] sm:$0xff]  ;;  %v4694_v4 = vsel %vm562_vm7, %v6867_v33, %v570_v31  ;;  %v4707_v56 = vpop.permute.xlu1 %1105  ;;  %v6948_v31 = vld [vmem:[#allocation52_spill] sm:$0xff] }
 0x1fa   :  { %v4688_v23 = vrot.slane %v6938_v39, %v6937_v7  ;;  %v6940_v8 = vld [vmem:[#allocation57_spill] sm:$0xff]  ;;  %6941 = vst [vmem:[#allocation48_spill] sm:$0xff] %v4694_v4  ;;  %v4698_v60 = vsel %vm562_vm7, %v6914_v5, %v572_v37  ;;  %v4702_v53 = vsel %vm882_vm11, %v6868_v45, %v886_v44  ;;  %v4705_v39 = vpop.permute.xlu0 %1547  ;;  %v4711_v49 = vsel %vm882_vm11, %v6915_v11, %v888_v24 }
 0x1fb   :  { %6942 = vst [vmem:[#allocation51_spill] sm:$0xff] %v4698_v60  ;;  %6943 = vst [vmem:[#allocation55_spill] sm:$0xff] %v4702_v53  ;;  %v4715_v33 = vsel %vm1202_vm15, %v6923_v62, %v1204_v27  ;;  %v1201_v5 = vsel %vm105_vm0, %v1193_v58, %v1194_v19  ;;  %v1417_v45 = vrot.slane %v4082_v12, 4  ;;  %1833 = vrot.lane.b32.xlu1 %v4139_v21, %s3260_s22  ;;  %v1418_v37 = vrot.slane %v6948_v31, 4  ;;  %v6952_v27 = vld [vmem:[#allocation60_spill] sm:$0xff]  ;;  %v6953_v19 = vld [vmem:[#allocation5_spill] sm:$0xff] }
 0x1fc   :  { %6945 = vst [vmem:[#allocation41_spill] sm:$0xff] %v4705_v39  ;;  %6946 = vst [vmem:[#allocation42_spill] sm:$0xff] %v4711_v49  ;;  %v6949_v44 = vrot.slane %v6934_v18, 4  ;;  %v6950_v53 = vrot.slane %v6855_v30, 4  ;;  %v6951_v24 = vrot.slane %v6893_v28, 4  ;;  %1486 = vrot.lane.b32.xlu0 %v6953_v19, %s3250_s17  ;;  %v6954_v12 = vrot.slane %v6939_v41, 4 }
 0x1fd   :  { %6947 = vst [vmem:[#allocation53_spill] sm:$0xff] %v4715_v33  ;;  %v6955_v58 = vrot.slane %v6866_v20, 4  ;;  %v6956_v60 = vrot.slane %v6940_v8, 4  ;;  %v6957_v4 = vrot.slane %v6894_v13, 4  ;;  %v4747_v33 = vsel %vm1202_vm15, %v6932_v9, %v1201_v5  ;;  %v6961_v19 = vld [vmem:[#allocation50_spill] sm:$0xff] }
 0x1fe   :  { %v650_v11 = vsel %vm105_vm0, %v6950_v53, %v6949_v44  ;;  %v494_v62 = vsel %vm105_vm0, %v6951_v24, %v480_v40  ;;  %v6958_v44 = vld [vmem:[#allocation58_spill] sm:$0xff]  ;;  %v6959_v40 = vld [vmem:[#allocation59_spill] sm:$0xff]  ;;  %6960 = vst [vmem:[#allocation54_spill] sm:$0xff] %v4747_v33  ;;  %v6962_v3 = vrot.slane %v6936_v61, 4  ;;  %vm1497_vm4 = vcmask 449536   ;;  %v4754_v8 = vpop.permute.xlu0 %1687 }
 0x1ff   :  { %v966_v49 = vsel %vm105_vm0, %v6955_v58, %v6954_v12  ;;  %v810_v53 = vsel %vm105_vm0, %v6957_v4, %v6956_v60  ;;  %v6651_v57 = vrot.slane %v6958_v44, 4  ;;  %v6963_v58 = vld [vmem:[#allocation61_spill] sm:$0xff]  ;;  %v4756_v4 = vpop.permute.xlu1 %1476  ;;  %v4764_v9 = vsel %vm642_vm8, %v6855_v30, %v650_v11 }
 0x200   :  { %v1281_v12 = vsel %vm105_vm0, %v1273_v26, %v6962_v3  ;;  %v1353_v48 = vrot.slane %v6963_v58, 4  ;;  %6964 = vst [vmem:[#allocation52_spill] sm:$0xff] %v4756_v4  ;;  %v6965_v60 = vld [vmem:[#allocation49_spill] sm:$0xff]  ;;  %v4768_v5 = vsel %vm482_vm5, %v6893_v28, %v494_v62  ;;  %v1425_v26 = vsel %vm105_vm0, %v1417_v45, %v1418_v37  ;;  %v6967_v3 = vld [vmem:[#allocation63_spill] sm:$0xff]  ;;  %1766 = vrot.lane.b32.xlu0 %v4195_v10, %s3258_s21 }
 0x201   :  { %v4760_v24 = vrot.slane %v6965_v60, %v6937_v7  ;;  %1271 = vrot.lane.b32.xlu1 %v6967_v3, %s3245_s12  ;;  %v4775_v35 = vsel %vm962_vm12, %v6866_v20, %v966_v49  ;;  %v4779_v60 = vsel %vm802_vm10, %v6894_v13, %v810_v53  ;;  %v6969_v30 = vrot.slane %v6952_v27, 4 }
 0x202   :  { %6968 = vst [vmem:[#allocation5_spill] sm:$0xff] %v4775_v35  ;;  %v6970_v11 = vrot.slane %v6899_v22, 4  ;;  %v4791_v45 = vsel %vm1282_vm1, %v6944_v55, %v1281_v12  ;;  %v6972_v20 = vrot.slane %v6888_v42, 4  ;;  %v6973_v49 = vrot.slane %v6959_v40, 4 }
 0x203   :  { %6966 = vst [vmem:[#allocation60_spill] sm:$0xff] %v4760_v24  ;;  %6971 = vst [vmem:[#allocation58_spill] sm:$0xff] %v4791_v45  ;;  %v6974_v53 = vrot.slane %v6890_v47, 4  ;;  %v6977_v55 = vrot.slane %v6961_v19, 4  ;;  %v1427_v35 = vsel %vm1426_vm2, %v1425_v26, %v6948_v31  ;;  %v4816_v45 = vpop.permute.xlu1 %1616  ;;  %v957_v33 = vrot.slane %v4211_v29, 4 }
 0x204   :  { %v1126_v28 = vsel %vm105_vm0, %v6970_v11, %v6969_v30  ;;  %v730_v13 = vsel %vm105_vm0, %v6972_v20, %v6651_v57  ;;  %v6975_v11 = vld [vmem:[#allocation56_spill] sm:$0xff]  ;;  %v6652_v20 = vrot.slane %v4307_v32, 4  ;;  %v4814_v57 = vpop.permute.xlu0 %791  ;;  %v639_v30 = vrot.slane %v4166_v17, 4 }
 0x205   :  { %v1046_v3 = vsel %vm105_vm0, %v6974_v53, %v6973_v49  ;;  %v4806_v62 = vrot.slane %v6975_v11, %v6937_v7  ;;  %v1361_v12 = vsel %vm105_vm0, %v1353_v48, %v6977_v55  ;;  %v4820_v49 = vsel %vm1122_vm14, %v6899_v22, %v1126_v28  ;;  %v6979_v53 = vld [vmem:[#allocation62_spill] sm:$0xff]  ;;  %1624 = vrot.lane.b32.xlu1 %v4195_v10, %s3254_s19 }
 0x206   :  { %6978 = vst [vmem:[#allocation50_spill] sm:$0xff] %v4820_v49  ;;  %v1488_v11 = vrot.slane %v6979_v53, 4  ;;  %v4829_v48 = vsel %vm722_vm9, %v6888_v42, %v730_v13  ;;  %v4833_v31 = vsel %vm1042_vm13, %v6890_v47, %v1046_v3  ;;  %v6981_v22 = vrot.slane %v4164_v59, 4  ;;  %v4844_v53 = vld [vmem:[%s6562_s0 + $0x38] sm:$0xff] }
 0x207   :  { %6976 = vst [vmem:[#allocation59_spill] sm:$0xff] %v4806_v62  ;;  %6980 = vst [vmem:[#allocation61_spill] sm:$0xff] %v4833_v31  ;;  %v6982_v26 = vrot.slane %v6918_v34, 4  ;;  %1557 = vrot.lane.b32.xlu0 %v4844_v53, %s3253_s18  ;;  %v4850_v42 = vsel %vm1362_vm3, %v6963_v58, %v1361_v12  ;;  %v4853_v47 = vmul.f32 %v4688_v23, %v1427_v35  ;;  %v6985_v13 = vrot.slane %v4254_v51, 4  ;;  %v6991_v31 = vld [vmem:[#allocation11_spill] sm:$0xff] }
 0x208   :  { %6983 = vst [vmem:[#allocation49_spill] sm:$0xff] %v4850_v42  ;;  %vm1568_vm5 = vcmask 441344   ;;  %v4865_v55 = vrot.slane %v4130_v25, %v6937_v7  ;;  %v1496_v35 = vsel %vm105_vm0, %v1488_v11, %v6652_v20  ;;  %v4871_v12 = vpop.permute.xlu0 %1107  ;;  %v6988_v25 = vrot.slane %v6939_v41, 4 }
 0x209   :  { %v890_v28 = vsel %vm105_vm0, %v6982_v26, %v6981_v22  ;;  %6984 = vst [vmem:[#allocation63_spill] sm:$0xff] %v4853_v47  ;;  %v1428_v3 = vsel %vm105_vm0, %v1418_v37, %v6985_v13  ;;  %v640_v22 = vrot.slane %v4348_v38, 4  ;;  %v4861_v26 = vrot.slane %v4128_v36, %v6937_v7  ;;  %v4873_v37 = vpop.permute.xlu1 %711  ;;  %1904 = vrot.lane.b32.xlu1 %v4139_v21, %s3261_s23  ;;  %v6992_v47 = vld [vmem:[#allocation16_spill] sm:$0xff] }
 0x20a   :  { %6986 = vst [vmem:[#allocation56_spill] sm:$0xff] %v4865_v55  ;;  %v4877_v38 = vsel %vm882_vm11, %v6918_v34, %v890_v28  ;;  %v6987_v36 = vrot.slane %v6934_v18, 4  ;;  %v968_v58 = vsel %vm105_vm0, %v6988_v25, %v957_v33  ;;  %v560_v49 = vrot.slane %v4350_v0, 4 }
 0x20b   :  { %v1429_v11 = vsel %vm1426_vm2, %v1428_v3, %v4254_v51  ;;  %v6989_v20 = vrot.slane %v4256_v14, 4  ;;  %v6990_v34 = vrot.slane %v6936_v61, 4  ;;  %1837 = vrot.lane.b32.xlu0 %v4195_v10, %s3260_s22  ;;  %v1498_v0 = vsel %vm1497_vm4, %v1496_v35, %v4307_v32 }
 0x20c   :  { %v652_v13 = vsel %vm105_vm0, %v6987_v36, %v639_v30  ;;  %v654_v25 = vsel %vm105_vm0, %v639_v30, %v640_v22  ;;  %v1037_v3 = vrot.slane %v4459_v43, 4  ;;  %v1559_v51 = vrot.slane %v4552_v1, 4  ;;  %v4920_v22 = vpop.permute.xlu0 %1478 }
 0x20d   :  { %v1284_v28 = vsel %vm105_vm0, %v6990_v34, %v6989_v20  ;;  %v4906_v14 = vsel %vm642_vm8, %v6934_v18, %v652_v13  ;;  %v6993_v20 = vrot.slane %v4209_v50, 4  ;;  %v6994_v34 = vrot.slane %v6919_v46, 4  ;;  %v4922_v1 = vpop.permute.xlu1 %869  ;;  %1415 = vrot.lane.b32.xlu1 %v4844_v53, %s3248_s16 }
 0x20e   :  { %v4917_v35 = vsel %vm962_vm12, %v6939_v41, %v968_v58  ;;  %vm1639_vm6 = vcmask 375808   ;;  %v4925_v18 = vmul.f32 %v4688_v23, %v1429_v11  ;;  %v4929_v13 = vsel %vm1282_vm1, %v6936_v61, %v1284_v28 }
 0x20f   :  { %v4913_v42 = vsel %vm105_vm0, %v6994_v34, %v6993_v20  ;;  %v6997_v20 = vld [vmem:[#allocation91_spill] sm:$0xff]  ;;  %v6998_v36 = vrot.slane %v6913_v2, 4  ;;  %v4938_v58 = vmul.f32 %v4760_v24, %v1498_v0  ;;  %v4942_v11 = vsel %vm642_vm8, %v4166_v17, %v654_v25  ;;  %1628 = vrot.lane.b32.xlu0 %v4844_v53, %s3254_s19 }
 0x210   :  { %6995 = vst [vmem:[#allocation62_spill] sm:$0xff] %v4913_v42  ;;  %6996 = vst [vmem:[#allocation11_spill] sm:$0xff] %v4925_v18  ;;  %v1560_v34 = vrot.slane %v6997_v20, 4  ;;  %v7001_v30 = vrot.slane %v6991_v31, 4  ;;  %v7002_v28 = vrot.slane %v6992_v47, 4  ;;  %v7003_v46 = vrot.slane %v6958_v44, 4 }
 0x211   :  { %v574_v41 = vsel %vm105_vm0, %v6998_v36, %v560_v49  ;;  %6999 = vst [vmem:[#allocation16_spill] sm:$0xff] %v4938_v58  ;;  %7000 = vst [vmem:[#allocation91_spill] sm:$0xff] %v4942_v11  ;;  %v7004_v36 = vrot.slane %v6959_v40, 4  ;;  %v6657_v25 = vrot.slane %v4705_v39, 4  ;;  %v6660_v58 = vrot.slane %v4606_v54, 4  ;;  %v4971_v11 = vpop.permute.xlu1 %1185  ;;  %1695 = vrot.lane.b32.xlu1 %v4195_v10, %s3257_s20  ;;  %v7047_v18 = vld [vmem:[#allocation76_spill] sm:$0xff] }
 0x212   :  { %v970_v61 = vsel %vm105_vm0, %v957_v33, %v7001_v30  ;;  %v732_v49 = vsel %vm105_vm0, %v7003_v46, %v7002_v28  ;;  %v1567_v17 = vsel %vm105_vm0, %v1559_v51, %v1560_v34  ;;  %v4962_v33 = vsel %vm562_vm7, %v6913_v2, %v574_v41  ;;  %v4973_v51 = vpop.permute.xlu0 %1756 }
 0x213   :  { %v1048_v0 = vsel %vm105_vm0, %v7004_v36, %v1037_v3  ;;  %v7005_v30 = vrot.slane %v4505_v52, 4  ;;  %v7006_v46 = vrot.slane %v6961_v19, 4  ;;  %v4977_v42 = vsel %vm962_vm12, %v4211_v29, %v970_v61  ;;  %1908 = vrot.lane.b32.xlu0 %v4195_v10, %s3261_s23 }
 0x214   :  { %v4981_v2 = vsel %vm722_vm9, %v6958_v44, %v732_v49  ;;  %v1630_v36 = vrot.slane %v4503_v15, 4  ;;  %v1569_v29 = vsel %vm1568_vm5, %v1567_v17, %v6997_v20  ;;  %v1117_v61 = vrot.slane %v4707_v56, 4 }
 0x215   :  { %v1364_v28 = vsel %vm105_vm0, %v7006_v46, %v7005_v30  ;;  %v799_v30 = vrot.slane %v4661_v6, 4  ;;  %v4989_v46 = vsel %vm1042_vm13, %v6959_v40, %v1048_v0  ;;  %v1570_v49 = vsel %vm105_vm0, %v1560_v34, %v6657_v25  ;;  %v5018_v25 = vpop.permute.xlu1 %1407  ;;  %1975 = vrot.lane.b32.xlu1 %v4139_v21, %s3262_s24 }
 0x216   :  { %v4999_v44 = vsel %vm1362_vm3, %v6961_v19, %v1364_v28  ;;  %v7007_v40 = vrot.slane %v4756_v4, 4  ;;  %v7008_v15 = vrot.slane %v4307_v32, 4  ;;  %v800_v20 = vrot.slane %v4814_v57, 4  ;;  %7010 = vst [vmem:[#allocation102_spill] sm:$0xff] %v5018_v25  ;;  %v5020_v52 = vpop.permute.xlu0 %1967  ;;  %v7012_v32 = vld [vmem:[#allocation32_spill] sm:$0xff]  ;;  %v7019_v28 = vld [vmem:[#allocation9_spill] sm:$0xff] }
 0x217   :  { %v1050_v17 = vsel %vm105_vm0, %v1037_v3, %v6660_v58  ;;  %v7009_v41 = vrot.slane %v4816_v45, 4  ;;  %v720_v34 = vrot.slane %v4873_v37, 4  ;;  %7011 = vst [vmem:[#allocation103_spill] sm:$0xff] %v5020_v52  ;;  %v5027_v57 = vmul.f32 %v4806_v62, %v1569_v29  ;;  %1839 = vrot.lane.b32.xlu0 %v7019_v28, %s3260_s22 }
 0x218   :  { %v1499_v0 = vsel %vm105_vm0, %v7008_v15, %v7007_v40  ;;  %v5024_v40 = vrot.slane %v7012_v32, %v6937_v7  ;;  %v5031_v3 = vrot.slane %v4608_v16, %v6937_v7  ;;  %v1571_v37 = vsel %vm1568_vm5, %v1570_v49, %v4705_v39  ;;  %v7041_v39 = vld [vmem:[#allocation71_spill] sm:$0xff] }
 0x219   :  { %v1638_v19 = vsel %vm105_vm0, %v1630_v36, %v7009_v41  ;;  %7014 = vst [vmem:[#allocation104_spill] sm:$0xff] %v5027_v57  ;;  %v7016_v36 = vld [vmem:[#allocation57_spill] sm:$0xff]  ;;  %v7018_v32 = vrot.slane %v6952_v27, 4  ;;  %v1500_v29 = vsel %vm1497_vm4, %v1499_v0, %v4756_v4  ;;  %v814_v52 = vsel %vm105_vm0, %v799_v30, %v800_v20  ;;  %1626 = vrot.lane.b32.xlu1 %v7019_v28, %s3254_s19 }
 0x21a   :  { %7013 = vst [vmem:[#allocation32_spill] sm:$0xff] %v5024_v40  ;;  %7015 = vst [vmem:[#allocation105_spill] sm:$0xff] %v5031_v3  ;;  %v7017_v41 = vrot.slane %v7016_v36, 4  ;;  %v1640_v49 = vsel %vm1639_vm6, %v1638_v19, %v4816_v45  ;;  %v6668_v40 = vrot.slane %v4971_v11, 4  ;;  %v7021_v16 = vrot.slane %v4871_v12, 4  ;;  %v43_v57 = vpop.permute.xlu0 %42 }
 0x21b   :  { %v1128_v58 = vsel %vm105_vm0, %v7018_v32, %v1117_v61  ;;  %vm1710_vm7 = vcmask 367616   ;;  %v5068_v20 = vmul.f32 %v4806_v62, %v1571_v37  ;;  %v7027_v37 = vrot.slane %v4922_v1, 4  ;;  %1770 = vrot.lane.b32.xlu0 %v4844_v53, %s3258_s21  ;;  %v7059_v32 = vld [vmem:[#allocation8_spill] sm:$0xff] }
 0x21c   :  { %v812_v15 = vsel %vm105_vm0, %v7017_v41, %v799_v30  ;;  %v5050_v41 = vsel %vm1042_vm13, %v4459_v43, %v1050_v17  ;;  %v1130_v4 = vsel %vm105_vm0, %v1117_v61, %v7021_v16  ;;  %v7022_v43 = vrot.slane %v6992_v47, 4  ;;  %v1686_v30 = vpop.permute.xlu1 %1685 }
 0x21d   :  { %v5059_v0 = vsel %vm802_vm10, %v7016_v36, %v812_v15  ;;  %7023 = vst [vmem:[#allocation57_spill] sm:$0xff] %v5068_v20  ;;  %v5072_v19 = vsel %vm1122_vm14, %v6952_v27, %v1128_v58  ;;  %v5076_v15 = vmul.f32 %v4760_v24, %v1500_v29  ;;  %v5082_v61 = vsel %vm802_vm10, %v4661_v6, %v814_v52  ;;  %v7032_v36 = vld [vmem:[#allocation18_spill] sm:$0xff] }
 0x21e   :  { %v734_v17 = vsel %vm105_vm0, %v7022_v43, %v720_v34  ;;  %7025 = vst [vmem:[#allocation106_spill] sm:$0xff] %v5082_v61  ;;  %v5085_v34 = vmul.f32 %v4865_v55, %v1640_v49  ;;  %v7028_v27 = vrot.slane %v4164_v59, 4  ;;  %v50_v29 = vrot.slane %v43_v57, %v6937_v7  ;;  %v7033_v7 = vld [vmem:[#allocation92_spill] sm:$0xff]  ;;  %v7035_v6 = vld [vmem:[#allocation6_spill] sm:$0xff]  ;;  %v7040_v61 = vld [vmem:[#allocation69_spill] sm:$0xff] }
 0x21f   :  { %7024 = vst [vmem:[#allocation9_spill] sm:$0xff] %v5076_v15  ;;  %v5097_v16 = vsel %vm1122_vm14, %v4707_v56, %v1130_v4  ;;  %v5101_v52 = vsel %vm722_vm9, %v6992_v47, %v734_v17  ;;  %v7030_v49 = vrot.slane %v4209_v50, 4  ;;  %v1701_v57 = vrot.slane %v1686_v30, 4  ;;  %1906 = vrot.lane.b32.xlu1 %v7035_v6, %s3261_s23  ;;  %1841 = vrot.lane.b32.xlu0 %v4844_v53, %s3260_s22 }
 0x220   :  { %7026 = vst [vmem:[#allocation107_spill] sm:$0xff] %v5085_v34  ;;  %v892_v58 = vsel %vm105_vm0, %v7028_v27, %v7027_v37  ;;  %7029 = vst [vmem:[#allocation108_spill] sm:$0xff] %v5101_v52  ;;  %v7031_v37 = vld [vmem:[#allocation77_spill] sm:$0xff]  ;;  %v53_v62 = vmul.f32 %v7032_v36, %v50_v29  ;;  %v54_v56 = vmul.f32 %v7033_v7, %v50_v29  ;;  %v5112_v4 = vpop.permute.xlu1 %1896  ;;  %v7042_v30 = vrot.slane %v4754_v8, 4 }
 0x221   :  { %v1208_v43 = vsel %vm105_vm0, %v7030_v49, %v6668_v40  ;;  %v52_v27 = vmul.f32 %v7031_v37, %v50_v29  ;;  %7034 = vst [vmem:[#allocation77_spill] sm:$0xff] %v5112_v4  ;;  %v5116_v47 = vsel %vm882_vm11, %v4164_v59, %v892_v58  ;;  %v55_v17 = vmul.f32 %v4139_v21, %v50_v29  ;;  %v5121_v49 = vpop.permute.xlu0 %1187  ;;  %v7036_v7 = vld [vmem:[#allocation65_spill] sm:$0xff]  ;;  %v7037_v37 = vld [vmem:[#allocation66_spill] sm:$0xff]  ;;  %v7038_v4 = vld [vmem:[#allocation67_spill] sm:$0xff] }
 0x222   :  { %v56_v24 = vmul.f32 %v7035_v6, %v50_v29  ;;  %v57_v34 = vmul.f32 %v4195_v10, %v50_v29  ;;  %v128_v40 = vadd.f32 %v7037_v37, %v53_v62  ;;  %v129_v59 = vadd.f32 %v7038_v4, %v54_v56  ;;  %v7039_v58 = vld [vmem:[#allocation68_spill] sm:$0xff]  ;;  %v7043_v56 = vld [vmem:[#allocation73_spill] sm:$0xff] }
 0x223   :  { %v127_v36 = vadd.f32 %v7036_v7, %v52_v27  ;;  %v5133_v21 = vsel %vm1202_vm15, %v4209_v50, %v1208_v43  ;;  %v130_v3 = vadd.f32 %v7039_v58, %v55_v17  ;;  %v1709_v27 = vsel %vm105_vm0, %v1701_v57, %v7042_v30  ;;  %v7044_v7 = vld [vmem:[#allocation74_spill] sm:$0xff]  ;;  %v7046_v50 = vld [vmem:[#allocation75_spill] sm:$0xff]  ;;  %1697 = vrot.lane.b32.xlu1 %v7019_v28, %s3257_s20  ;;  %v7050_v57 = vld [vmem:[#allocation81_spill] sm:$0xff] }
 0x224   :  { %v131_v20 = vadd.f32 %v7040_v61, %v56_v24  ;;  %v132_v52 = vadd.f32 %v7041_v39, %v57_v34  ;;  %v58_v62 = vmul.f32 %v7019_v28, %v50_v29  ;;  %v202_v37 = vadd.f32 %v7044_v7, %v128_v40  ;;  %v5144_v15 = vpop.permute.xlu1 %949  ;;  %v7048_v58 = vld [vmem:[#allocation79_spill] sm:$0xff]  ;;  %v7049_v61 = vld [vmem:[#allocation80_spill] sm:$0xff]  ;;  %1912 = vrot.lane.b32.xlu0 %v4844_v53, %s3261_s23 }
 0x225   :  { %v201_v4 = vadd.f32 %v7043_v56, %v127_v36  ;;  %7045 = vst [vmem:[#allocation18_spill] sm:$0xff] %v5144_v15  ;;  %v203_v43 = vadd.f32 %v7046_v50, %v129_v59  ;;  %v204_v17 = vadd.f32 %v7047_v18, %v130_v3  ;;  %v5150_v34 = vpop.permute.xlu0 %1409  ;;  %v7051_v40 = vld [vmem:[#allocation83_spill] sm:$0xff]  ;;  %v5162_v18 = vsel %vm1710_vm7, %v1709_v27, %v4754_v8  ;;  %v7053_v3 = vld [vmem:[#allocation14_spill] sm:$0xff] }
 0x226   :  { %v205_v24 = vadd.f32 %v7048_v58, %v131_v20  ;;  %v206_v39 = vadd.f32 %v7049_v61, %v132_v52  ;;  %v276_v36 = vadd.f32 %v7051_v40, %v202_v37  ;;  %7052 = vst [vmem:[#allocation92_spill] sm:$0xff] %v5162_v18  ;;  %v7054_v52 = vld [vmem:[#allocation94_spill] sm:$0xff]  ;;  %v7055_v7 = vld [vmem:[#allocation31_spill] sm:$0xff]  ;;  %v7056_v58 = vld [vmem:[#allocation72_spill] sm:$0xff]  ;;  %v6675_v29 = vrot.slane %v5144_v15, 4 }
 0x227   :  { %v275_v30 = vadd.f32 %v7050_v57, %v201_v4  ;;  %v278_v20 = vadd.f32 %v7053_v3, %v204_v17  ;;  %v5168_v61 = vadd.f32 %v7056_v58, %v58_v62  ;;  %v7057_v4 = vld [vmem:[#allocation82_spill] sm:$0xff]  ;;  %v277_v27 = vadd.f32 %v7059_v32, %v203_v43  ;;  %v7061_v17 = vld [vmem:[#allocation27_spill] sm:$0xff]  ;;  %1977 = vrot.lane.b32.xlu1 %v7035_v6, %s3262_s24  ;;  %v7063_v62 = vld [vmem:[#allocation85_spill] sm:$0xff] }
 0x228   :  { %v279_v59 = vadd.f32 %v7054_v52, %v205_v24  ;;  %v280_v50 = vadd.f32 %v7055_v7, %v206_v39  ;;  %v7058_v57 = vld [vmem:[#allocation78_spill] sm:$0xff]  ;;  %v5173_v56 = vpop.permute.xlu1 %1265  ;;  %v7062_v24 = vld [vmem:[#allocation29_spill] sm:$0xff]  ;;  %v7065_v58 = vrot.slane %v5121_v49, 4  ;;  %v6676_v43 = vrot.slane %v5150_v34, 4 }
 0x229   :  { %v349_v37 = vadd.f32 %v7057_v4, %v275_v30  ;;  %v350_v40 = vadd.f32 %v7058_v57, %v276_v36  ;;  %v7060_v18 = vld [vmem:[#allocation90_spill] sm:$0xff]  ;;  %v5179_v39 = vpop.permute.xlu0 %1689  ;;  %v7064_v36 = vld [vmem:[#allocation88_spill] sm:$0xff]  ;;  %v7066_v4 = vrot.slane %v4971_v11, 4  ;;  %vm1781_vm8 = vcmask 359424   ;;  %v7069_v57 = vld [vmem:[#allocation15_spill] sm:$0xff] }
 0x22a   :  { %v352_v55 = vadd.f32 %v7060_v18, %v278_v20  ;;  %v353_v3 = vadd.f32 %v7061_v17, %v279_v59  ;;  %v354_v52 = vadd.f32 %v7062_v24, %v280_v50  ;;  %v7067_v18 = vld [vmem:[#allocation96_spill] sm:$0xff]  ;;  %v7071_v24 = vrot.slane %v5018_v25, 4  ;;  %v7076_v15 = vld [vmem:[#allocation22_spill] sm:$0xff] }
 0x22b   :  { %v423_v30 = vadd.f32 %v7063_v62, %v349_v37  ;;  %v424_v7 = vadd.f32 %v7064_v36, %v350_v40  ;;  %v1210_v32 = vsel %vm105_vm0, %v7066_v4, %v7065_v58  ;;  %v7068_v59 = vld [vmem:[#allocation36_spill] sm:$0xff]  ;;  %v7070_v37 = vrot.slane %v6991_v31, 4  ;;  %1768 = vrot.lane.b32.xlu1 %v7019_v28, %s3258_s21 }
 0x22c   :  { %v427_v20 = vadd.f32 %v7067_v18, %v353_v3  ;;  %v428_v50 = vadd.f32 %v7068_v59, %v354_v52  ;;  %v426_v17 = vadd.f32 %v7069_v57, %v352_v55  ;;  %v1432_v62 = vsel %vm105_vm0, %v7071_v24, %v6676_v43  ;;  %v7072_v36 = vld [vmem:[#allocation84_spill] sm:$0xff]  ;;  %v5207_v58 = vpop.permute.xlu1 %1618  ;;  %v7073_v55 = vld [vmem:[#allocation89_spill] sm:$0xff]  ;;  %v7075_v57 = vld [vmem:[#allocation46_spill] sm:$0xff] }
 0x22d   :  { %v972_v40 = vsel %vm105_vm0, %v7070_v37, %v6675_v29  ;;  %v504_v52 = vadd.f32 %v7072_v36, %v424_v7  ;;  %v503_v4 = vadd.f32 %v7073_v55, %v423_v30  ;;  %v7074_v18 = vld [vmem:[#allocation28_spill] sm:$0xff]  ;;  %v5213_v29 = vpop.permute.xlu0 %1829  ;;  %v5219_v24 = vsel %vm1202_vm15, %v4971_v11, %v1210_v32  ;;  %v7079_v36 = vld [vmem:[#allocation17_spill] sm:$0xff]  ;;  %v7083_v32 = vld [vmem:[#allocation10_spill] sm:$0xff] }
 0x22e   :  { %v507_v59 = vadd.f32 %v7074_v18, %v427_v20  ;;  %v508_v6 = vadd.f32 %v7075_v57, %v428_v50  ;;  %v506_v37 = vadd.f32 %v7076_v15, %v426_v17  ;;  %v1433_v7 = vsel %vm1426_vm2, %v1432_v62, %v5150_v34  ;;  %v7080_v17 = vld [vmem:[#allocation48_spill] sm:$0xff]  ;;  %v7081_v18 = vld [vmem:[#allocation51_spill] sm:$0xff]  ;;  %v7082_v43 = vld [vmem:[#allocation33_spill] sm:$0xff] }
 0x22f   :  { %v7077_v30 = vrot.slane %v5179_v39, 4  ;;  %v7078_v20 = vrot.slane %v4754_v8, 4  ;;  %v584_v15 = vadd.f32 %v7079_v36, %v504_v52  ;;  %v5235_v25 = vadd.f32 %v7083_v32, %v277_v27  ;;  %v7088_v36 = vld [vmem:[#allocation4_spill] sm:$0xff]  ;;  %1699 = vrot.lane.b32.xlu1 %v4844_v53, %s3257_s20 }
 0x230   :  { %v587_v55 = vadd.f32 %v7080_v17, %v507_v59  ;;  %v588_v57 = vadd.f32 %v7081_v18, %v508_v6  ;;  %v586_v3 = vadd.f32 %v7082_v43, %v506_v37  ;;  %v973_v62 = vsel %vm962_vm12, %v6991_v31, %v972_v40  ;;  %v7086_v59 = vld [vmem:[#allocation12_spill] sm:$0xff]  ;;  %v5245_v6 = vpop.permute.xlu1 %1758  ;;  %v7089_v40 = vld [vmem:[#allocation19_spill] sm:$0xff] }
 0x231   :  { %v1712_v50 = vsel %vm105_vm0, %v7078_v20, %v7077_v30  ;;  %v7084_v8 = vrot.slane %v5173_v56, 4  ;;  %v7085_v30 = vrot.slane %v4457_v63, 4  ;;  %v664_v20 = vadd.f32 %v7086_v59, %v584_v15  ;;  %v5251_v18 = vpop.permute.xlu0 %1109  ;;  %v7092_v59 = vld [vmem:[#allocation13_spill] sm:$0xff] }
 0x232   :  { %v1713_v11 = vsel %vm1710_vm7, %v1712_v50, %v5179_v39  ;;  %v667_v43 = vadd.f32 %v4764_v9, %v587_v55  ;;  %v668_v37 = vadd.f32 %v4906_v14, %v588_v57  ;;  %v7087_v50 = vld [vmem:[#allocation99_spill] sm:$0xff]  ;;  %v583_v17 = vadd.f32 %v7088_v36, %v503_v4 }
 0x233   :  { %v1288_v52 = vsel %vm105_vm0, %v7085_v30, %v7084_v8  ;;  %v666_v27 = vadd.f32 %v7087_v50, %v586_v3  ;;  %v5256_v31 = vmul.f32 %v4688_v23, %v1433_v7  ;;  %v744_v15 = vadd.f32 %v7089_v40, %v664_v20  ;;  %v7090_v55 = vld [vmem:[#allocation39_spill] sm:$0xff]  ;;  %v7091_v7 = vld [vmem:[#allocation24_spill] sm:$0xff]  ;;  %1979 = vrot.lane.b32.xlu1 %v4195_v10, %s3262_s24  ;;  %v7099_v10 = vld [vmem:[#allocation70_spill] sm:$0xff] }
 0x234   :  { %v1632_v32 = vrot.slane %v5207_v58, 4  ;;  %v1773_v9 = vrot.slane %v5245_v6, 4  ;;  %v747_v14 = vadd.f32 %v4829_v48, %v667_v43  ;;  %v748_v3 = vadd.f32 %v4981_v2, %v668_v37  ;;  %v872_v2 = vpop.permute.xlu1 %871 }
 0x235   :  { %v746_v4 = vadd.f32 %v7090_v55, %v666_v27  ;;  %v5266_v57 = vsel %vm1282_vm1, %v4457_v63, %v1288_v52  ;;  %v5269_v8 = vmul.f32 %v4861_v26, %v1713_v11  ;;  %v824_v30 = vadd.f32 %v7091_v7, %v744_v15  ;;  %v7094_v52 = vld [vmem:[#allocation45_spill] sm:$0xff]  ;;  %v5285_v36 = vpop.permute.xlu0 %1480 }
 0x236   :  { %v663_v20 = vadd.f32 %v7092_v59, %v583_v17  ;;  %v7093_v50 = vrot.slane %v4973_v51, 4  ;;  %v827_v43 = vadd.f32 %v4779_v60, %v747_v14  ;;  %v828_v37 = vadd.f32 %v5059_v0, %v748_v3  ;;  %v7095_v17 = vld [vmem:[#allocation37_spill] sm:$0xff] }
 0x237   :  { %v826_v27 = vadd.f32 %v7094_v52, %v746_v4  ;;  %v904_v51 = vadd.f32 %v7095_v17, %v824_v30  ;;  %v7096_v40 = vrot.slane %v4816_v45, 4  ;;  %v7097_v0 = vld [vmem:[#allocation93_spill] sm:$0xff]  ;;  %v1119_v14 = vrot.slane %v5251_v18, 4  ;;  %v7098_v4 = vld [vmem:[#allocation42_spill] sm:$0xff]  ;;  %v7100_v30 = vld [vmem:[#allocation35_spill] sm:$0xff]  ;;  %1910 = vrot.lane.b32.xlu1 %v7019_v28, %s3261_s23 }
 0x238   :  { %v1780_v48 = vsel %vm105_vm0, %v7093_v50, %v1773_v9  ;;  %v743_v15 = vadd.f32 %v7097_v0, %v663_v20  ;;  %v907_v3 = vadd.f32 %v4877_v38, %v827_v43  ;;  %v908_v55 = vadd.f32 %v5116_v47, %v828_v37  ;;  %v7101_v45 = vld [vmem:[#allocation23_spill] sm:$0xff]  ;;  %v5310_v38 = vpop.permute.xlu1 %1029 }
 0x239   :  { %v5283_v11 = vsel %vm1781_vm8, %v1780_v48, %v5245_v6  ;;  %v1641_v60 = vsel %vm105_vm0, %v7096_v40, %v1632_v32  ;;  %v906_v7 = vadd.f32 %v7098_v4, %v826_v27  ;;  %v207_v59 = vadd.f32 %v7099_v10, %v5168_v61  ;;  %v5316_v27 = vpop.permute.xlu0 %1760  ;;  %v7105_v10 = vld [vmem:[#allocation100_spill] sm:$0xff] }
 0x23a   :  { %v984_v50 = vadd.f32 %v7100_v30, %v904_v51  ;;  %v1844_v48 = vrot.slane %v5213_v29, 4  ;;  %v823_v52 = vadd.f32 %v7101_v45, %v743_v15  ;;  %v7102_v20 = vrot.slane %v4871_v12, 4  ;;  %v7103_v51 = vld [vmem:[#allocation64_spill] sm:$0xff]  ;;  %v7104_v15 = vld [vmem:[#allocation25_spill] sm:$0xff]  ;;  %v7107_v30 = vld [vmem:[#allocation98_spill] sm:$0xff] }
 0x23b   :  { %v987_v47 = vadd.f32 %v4977_v42, %v907_v3  ;;  %v988_v43 = vadd.f32 %v973_v62, %v908_v55  ;;  %v986_v37 = vadd.f32 %v4917_v35, %v906_v7  ;;  %v1642_v0 = vsel %vm1639_vm6, %v1641_v60, %v5207_v58  ;;  %v7106_v55 = vld [vmem:[#allocation34_spill] sm:$0xff]  ;;  %1981 = vrot.lane.b32.xlu1 %v7019_v28, %s3262_s24 }
 0x23c   :  { %v1132_v17 = vsel %vm105_vm0, %v7102_v20, %v1119_v14  ;;  %v1064_v40 = vadd.f32 %v7103_v51, %v984_v50  ;;  %v903_v4 = vadd.f32 %v7104_v15, %v823_v52  ;;  %v281_v42 = vadd.f32 %v7105_v10, %v207_v59  ;;  %v7108_v20 = vld [vmem:[#allocation21_spill] sm:$0xff]  ;;  %v5332_v60 = vpop.permute.xlu1 %1345  ;;  %v7161_v58 = vld [vmem:[#allocation62_spill] sm:$0xff] }
 0x23d   :  { %v1133_v61 = vsel %vm1122_vm14, %v4871_v12, %v1132_v17  ;;  %v1067_v62 = vadd.f32 %v5050_v41, %v987_v47  ;;  %v1066_v35 = vadd.f32 %v4989_v46, %v986_v37  ;;  %v880_v3 = vrot.slane %v872_v2, 4  ;;  %v5342_v47 = vpop.permute.xlu0 %1900  ;;  %v7110_v37 = vld [vmem:[#allocation53_spill] sm:$0xff] }
 0x23e   :  { %v1492_v12 = vrot.slane %v5285_v36, 4  ;;  %v1144_v7 = vadd.f32 %v7106_v55, %v1064_v40  ;;  %v983_v45 = vadd.f32 %v7107_v30, %v903_v4  ;;  %v355_v50 = vadd.f32 %v7108_v20, %v281_v42  ;;  %v7111_v40 = vld [vmem:[#allocation38_spill] sm:$0xff]  ;;  %v7115_v30 = vld [vmem:[#allocation44_spill] sm:$0xff] }
 0x23f   :  { %v1039_v17 = vrot.slane %v5310_v38, 4  ;;  %v1147_v52 = vadd.f32 %v5097_v16, %v1067_v62  ;;  %v1146_v59 = vadd.f32 %v5072_v19, %v1066_v35  ;;  %v7109_v46 = vrot.slane %v4920_v22, 4  ;;  %v7112_v16 = vld [vmem:[#allocation40_spill] sm:$0xff]  ;;  %1983 = vrot.lane.b32.xlu1 %v4844_v53, %s3262_s24 }
 0x240   :  { %v1774_v2 = vrot.slane %v5316_v27, 4  ;;  %v1224_v51 = vadd.f32 %v7110_v37, %v1144_v7  ;;  %v1063_v15 = vadd.f32 %v7111_v40, %v983_v45  ;;  %v429_v4 = vadd.f32 %v7112_v16, %v355_v50  ;;  %v7118_v37 = vld [vmem:[#allocation101_spill] sm:$0xff] }
 0x241   :  { %v1503_v41 = vsel %vm105_vm0, %v7109_v46, %v1492_v12  ;;  %v5354_v10 = vadd.f32 %v5219_v24, %v1147_v52  ;;  %v1226_v42 = vadd.f32 %v5133_v21, %v1146_v59  ;;  %v7113_v62 = vrot.slane %v4922_v1, 4  ;;  %v5370_v21 = vpop.permute.xlu1 %1549  ;;  %v5379_v59 = vpop.permute.xlu0 %1189 }
 0x242   :  { %v5351_v19 = vsel %vm1497_vm4, %v1503_v41, %v5285_v36  ;;  %v7114_v28 = vrot.slane %v4606_v54, 4  ;;  %v1304_v7 = vadd.f32 %v4929_v13, %v1224_v51  ;;  %v1143_v45 = vadd.f32 %v7115_v30, %v1063_v15  ;;  %v7117_v41 = vld [vmem:[#allocation56_spill] sm:$0xff]  ;;  %v7121_v15 = vld [vmem:[#allocation11_spill] sm:$0xff] }
 0x243   :  { %v894_v35 = vsel %vm105_vm0, %v7113_v62, %v880_v3  ;;  %v509_v20 = vadd.f32 %v4768_v5, %v429_v4  ;;  %vm1852_vm9 = vcmask 293888   ;;  %v1306_v3 = vadd.f32 %v5266_v57, %v1226_v42  ;;  %v7116_v5 = vld [vmem:[#allocation54_spill] sm:$0xff]  ;;  %v7123_v42 = vld [vmem:[#allocation91_spill] sm:$0xff] }
 0x244   :  { %v1052_v55 = vsel %vm105_vm0, %v7114_v28, %v1039_v17  ;;  %v1783_v52 = vsel %vm105_vm0, %v1773_v9, %v1774_v2  ;;  %v1357_v13 = vrot.slane %v5332_v60, 4  ;;  %v1223_v46 = vadd.f32 %v7116_v5, %v1143_v45 }
 0x245   :  { %v1053_v24 = vsel %vm1042_vm13, %v4606_v54, %v1052_v55  ;;  %v1384_v54 = vadd.f32 %v4999_v44, %v1304_v7  ;;  %v589_v57 = vadd.f32 %v4962_v33, %v509_v20  ;;  %v1669_v6 = vmul.f32 %v7117_v41, %v1642_v0  ;;  %v7120_v44 = vld [vmem:[#allocation7_spill] sm:$0xff]  ;;  %v7122_v33 = vld [vmem:[#allocation58_spill] sm:$0xff]  ;;  %v1828_v28 = vpop.permute.xlu1 %1827  ;;  %v5405_v45 = vpop.permute.xlu0 %1411  ;;  %v7125_v20 = vld [vmem:[#allocation9_spill] sm:$0xff] }
 0x246   :  { %v1068_v50 = vadd.f32 %v1053_v24, %v988_v43  ;;  %v1784_v43 = vsel %vm1781_vm8, %v1783_v52, %v5316_v27  ;;  %v895_v9 = vsel %vm882_vm11, %v4922_v1, %v894_v35  ;;  %v7119_v51 = vrot.slane %v7118_v37, 4  ;;  %v7124_v35 = vld [vmem:[#allocation20_spill] sm:$0xff]  ;;  %v7126_v24 = vld [vmem:[#allocation49_spill] sm:$0xff] }
 0x247   :  { %v425_v40 = vadd.f32 %v7120_v44, %v5235_v25  ;;  %v1463_v16 = vadd.f32 %v7121_v15, %v1384_v54  ;;  %v1303_v4 = vadd.f32 %v7122_v33, %v1223_v46  ;;  %v669_v62 = vadd.f32 %v7123_v42, %v589_v57  ;;  %v7127_v54 = vld [vmem:[#allocation108_spill] sm:$0xff]  ;;  %v7128_v57 = vld [vmem:[#allocation95_spill] sm:$0xff] }
 0x248   :  { %v1368_v53 = vsel %vm105_vm0, %v7119_v51, %v1357_v13  ;;  %v1562_v7 = vrot.slane %v5370_v21, 4  ;;  %v1148_v30 = vadd.f32 %v1133_v61, %v1068_v50  ;;  %v1199_v46 = vrot.slane %v5379_v59, 4  ;;  %v7131_v50 = vld [vmem:[#allocation57_spill] sm:$0xff] }
 0x249   :  { %v1369_v0 = vsel %vm1362_vm3, %v7118_v37, %v1368_v53  ;;  %v505_v55 = vadd.f32 %v7124_v35, %v425_v40  ;;  %v1534_v25 = vadd.f32 %v7125_v20, %v1463_v16  ;;  %v1383_v52 = vadd.f32 %v7126_v24, %v1303_v4  ;;  %v7132_v16 = vld [vmem:[#allocation63_spill] sm:$0xff]  ;;  %v7133_v4 = vld [vmem:[#allocation106_spill] sm:$0xff]  ;;  %v7134_v35 = vld [vmem:[#allocation105_spill] sm:$0xff] }
 0x24a   :  { %v1386_v1 = vadd.f32 %v1369_v0, %v1306_v3  ;;  %v749_v5 = vadd.f32 %v7127_v54, %v669_v62  ;;  %v7129_v3 = vld [vmem:[#allocation41_spill] sm:$0xff]  ;;  %v1843_v40 = vrot.slane %v1828_v28, 4  ;;  %v6679_v61 = vrot.slane %v5405_v45, 4  ;;  %v952_v0 = vpop.permute.xlu1 %951  ;;  %v7135_v20 = vld [vmem:[#allocation30_spill] sm:$0xff] }
 0x24b   :  { %v585_v51 = vadd.f32 %v7128_v57, %v505_v55  ;;  %v7130_v53 = vrot.slane %v7129_v3, 4  ;;  %v1605_v15 = vadd.f32 %v7131_v50, %v1534_v25  ;;  %v1462_v33 = vadd.f32 %v7132_v16, %v1383_v52  ;;  %v5435_v52 = vpop.permute.xlu0 %1691  ;;  %v7137_v57 = vld [vmem:[#allocation16_spill] sm:$0xff] }
 0x24c   :  { %v829_v42 = vadd.f32 %v7133_v4, %v749_v5  ;;  %v1811_v55 = vmul.f32 %v7134_v35, %v1784_v43  ;;  %v7136_v28 = vrot.slane %v5121_v49, 4  ;;  %v1851_v25 = vsel %vm105_vm0, %v1843_v40, %v1844_v48 }
 0x24d   :  { %v1572_v44 = vsel %vm105_vm0, %v7130_v53, %v1562_v7  ;;  %v665_v24 = vadd.f32 %v7135_v20, %v585_v51  ;;  %v1676_v5 = vadd.f32 %v1669_v6, %v1605_v15  ;;  %v1533_v3 = vadd.f32 %v7137_v57, %v1462_v33  ;;  %v7138_v51 = vld [vmem:[#allocation26_spill] sm:$0xff]  ;;  %v7140_v6 = vld [vmem:[#allocation104_spill] sm:$0xff] }
 0x24e   :  { %v5423_v62 = vsel %vm1568_vm5, %v1572_v44, %v5370_v21  ;;  %v1212_v54 = vsel %vm105_vm0, %v7136_v28, %v1199_v46  ;;  %v909_v53 = vadd.f32 %v895_v9, %v829_v42  ;;  %v1853_v16 = vsel %vm1852_vm9, %v1851_v25, %v5213_v29  ;;  %v7141_v33 = vld [vmem:[#allocation32_spill] sm:$0xff]  ;;  %v7143_v28 = vld [vmem:[#allocation43_spill] sm:$0xff] }
 0x24f   :  { %v1213_v43 = vsel %vm1202_vm15, %v5121_v49, %v1212_v54  ;;  %v745_v44 = vadd.f32 %v7138_v51, %v665_v24  ;;  %v7139_v40 = vrot.slane %v5150_v34, 4  ;;  %v1604_v15 = vadd.f32 %v7140_v6, %v1533_v3  ;;  %v7142_v20 = vld [vmem:[#allocation92_spill] sm:$0xff]  ;;  %v5463_v57 = vpop.permute.xlu0 %1969 }
 0x250   :  { %v5441_v50 = vadd.f32 %v1213_v43, %v1148_v30  ;;  %v1747_v9 = vadd.f32 %v5269_v8, %v1676_v5  ;;  %v1881_v42 = vmul.f32 %v7141_v33, %v1853_v16  ;;  %v5457_v30 = vpop.permute.xlu1 %1267  ;;  %v1739_v24 = vmul.f32 %v4861_v26, %v7142_v20  ;;  %v7144_v8 = vld [vmem:[#allocation107_spill] sm:$0xff] }
 0x251   :  { %v1434_v4 = vsel %vm105_vm0, %v7139_v40, %v6679_v61  ;;  %v825_v54 = vadd.f32 %v7143_v28, %v745_v44  ;;  %v960_v34 = vrot.slane %v952_v0, 4  ;;  %v6680_v25 = vrot.slane %v5435_v52, 4  ;;  %v7145_v16 = vld [vmem:[#allocation55_spill] sm:$0xff] }
 0x252   :  { %v5455_v49 = vsel %vm1426_vm2, %v1434_v4, %v5405_v45  ;;  %vm1923_vm10 = vcmask 285696   ;;  %v1675_v5 = vadd.f32 %v7144_v8, %v1604_v15  ;;  %v1810_v3 = vmul.f32 %v7134_v35, %v5283_v11  ;;  %v7146_v4 = vld [vmem:[#allocation18_spill] sm:$0xff] }
 0x253   :  { %v5468_v43 = vadd.f32 %v1811_v55, %v1747_v9  ;;  %v1278_v51 = vrot.slane %v5457_v30, 4  ;;  %v905_v40 = vadd.f32 %v7145_v16, %v825_v54  ;;  %v7147_v6 = vrot.slane %v7146_v4, 4  ;;  %v1112_v16 = vpop.permute.xlu0 %1111 }
 0x254   :  { %v7148_v44 = vrot.slane %v5179_v39, 4  ;;  %v1465_v15 = vadd.f32 %v5256_v31, %v1386_v1  ;;  %v1746_v28 = vadd.f32 %v1739_v24, %v1675_v5  ;;  %v7149_v9 = vrot.slane %v5173_v56, 4  ;;  %v7150_v39 = vld [vmem:[#allocation60_spill] sm:$0xff]  ;;  %v7151_v31 = vld [vmem:[#allocation5_spill] sm:$0xff] }
 0x255   :  { %v974_v0 = vsel %vm105_vm0, %v7147_v6, %v960_v34  ;;  %v5492_v34 = vpop.permute.xlu1 %1620  ;;  %v1529_v8 = vmul.f32 %v7150_v39, %v5351_v19  ;;  %v985_v1 = vadd.f32 %v7151_v31, %v905_v40  ;;  %v1915_v19 = vrot.slane %v5342_v47, 4  ;;  %v7155_v40 = vld [vmem:[#allocation61_spill] sm:$0xff] }
 0x256   :  { %v1714_v20 = vsel %vm105_vm0, %v7148_v44, %v6680_v25  ;;  %v975_v11 = vsel %vm962_vm12, %v7146_v4, %v974_v0  ;;  %v1290_v54 = vsel %vm105_vm0, %v7149_v9, %v1278_v51  ;;  %v1817_v4 = vadd.f32 %v1810_v3, %v1746_v28  ;;  %v7153_v9 = vld [vmem:[#allocation87_spill] sm:$0xff]  ;;  %v7158_v3 = vld [vmem:[#allocation86_spill] sm:$0xff] }
 0x257   :  { %v5485_v55 = vsel %vm1710_vm7, %v1714_v20, %v5435_v52  ;;  %v989_v24 = vadd.f32 %v975_v11, %v909_v53  ;;  %v1291_v5 = vsel %vm1282_vm1, %v5173_v56, %v1290_v54  ;;  %v1633_v0 = vrot.slane %v5492_v34, 4  ;;  %v7156_v56 = vld [vmem:[#allocation102_spill] sm:$0xff] }
 0x258   :  { %v1307_v6 = vadd.f32 %v1291_v5, %v5354_v10  ;;  %v1120_v44 = vrot.slane %v1112_v16, 4  ;;  %v7152_v20 = vrot.slane %v4457_v63, 4  ;;  %v7154_v61 = vrot.slane %v7153_v9, 4 }
 0x259   :  { %v1065_v53 = vadd.f32 %v7155_v40, %v985_v1  ;;  %v5508_v11 = vadd.f32 %v1529_v8, %v1465_v15  ;;  %v7157_v54 = vrot.slane %v7156_v56, 4  ;;  %v7159_v28 = vrot.slane %v7158_v3, 4  ;;  %v1899_v31 = vpop.permute.xlu1 %1898  ;;  %v7160_v15 = vld [vmem:[#allocation50_spill] sm:$0xff]  ;;  %v5528_v40 = vpop.permute.xlu0 %1482 }
 0x25a   :  { %v1286_v25 = vsel %vm105_vm0, %v7154_v61, %v7152_v20  ;;  %v1643_v63 = vsel %vm105_vm0, %v1632_v32, %v1633_v0  ;;  %v1134_v61 = vsel %vm105_vm0, %v1119_v14, %v1120_v44  ;;  %v1888_v1 = vadd.f32 %v1881_v42, %v1817_v4  ;;  %v7164_v14 = vld [vmem:[#allocation52_spill] sm:$0xff] }
 0x25b   :  { %v1430_v10 = vsel %vm105_vm0, %v7159_v28, %v7157_v54  ;;  %v1145_v8 = vadd.f32 %v7160_v15, %v1065_v53  ;;  %v1644_v5 = vsel %vm1639_vm6, %v1643_v63, %v5492_v34  ;;  %v1135_v16 = vsel %vm1122_vm14, %v5251_v18, %v1134_v61  ;;  %v7162_v54 = vld [vmem:[#allocation47_spill] sm:$0xff]  ;;  %v7167_v53 = vld [vmem:[#allocation97_spill] sm:$0xff] }
 0x25c   :  { %v1914_v20 = vrot.slane %v1899_v31, 4  ;;  %v1207_v32 = vsel %vm1202_vm15, %v7162_v54, %v7161_v58  ;;  %v7163_v3 = vrot.slane %v4920_v22, 4  ;;  %v7165_v44 = vrot.slane %v7164_v14, 4  ;;  %v7169_v18 = vld [vmem:[#allocation3_spill] sm:$0xff]  ;;  %v7170_v61 = vld [vmem:[#allocation77_spill] sm:$0xff] }
 0x25d   :  { %v7166_v4 = vrot.slane %v7118_v37, 4  ;;  %v7168_v28 = vrot.slane %v7167_v53, 4  ;;  %v5545_v31 = vrot.slane %v7170_v61, %v7169_v18  ;;  %v1225_v15 = vadd.f32 %v1207_v32, %v1145_v8 }
 0x25e   :  { %v1501_v42 = vsel %vm105_vm0, %v7165_v44, %v7163_v3  ;;  %v1922_v58 = vsel %vm105_vm0, %v1914_v20, %v1915_v19  ;;  %v1287_v54 = vsel %vm1282_vm1, %v7153_v9, %v1286_v25  ;;  %v1431_v3 = vsel %vm1426_vm2, %v1430_v10, %v7156_v56  ;;  %v1032_v44 = vpop.permute.xlu1 %1031  ;;  %v5560_v20 = vpop.permute.xlu0 %1762 }
 0x25f   :  { %v1366_v63 = vsel %vm105_vm0, %v7168_v28, %v7166_v4  ;;  %v1924_v37 = vsel %vm1923_vm10, %v1922_v58, %v5342_v47  ;;  %v1493_v14 = vrot.slane %v5528_v40, 4  ;;  %v1502_v4 = vsel %vm1497_vm4, %v1501_v42, %v4920_v22  ;;  %v7171_v42 = vld [vmem:[#allocation59_spill] sm:$0xff] }
 0x260   :  { %v1305_v8 = vadd.f32 %v1287_v54, %v1225_v15  ;;  %v1952_v32 = vmul.f32 %v5545_v31, %v1924_v37  ;;  %v1040_v28 = vrot.slane %v1032_v44, 4  ;;  %v1367_v25 = vsel %vm1362_vm3, %v7167_v53, %v1366_v63 }
 0x261   :  { %v1775_v9 = vrot.slane %v5560_v20, 4  ;;  %v1457_v56 = vmul.f32 %v4688_v23, %v1431_v3  ;;  %v1528_v22 = vmul.f32 %v7150_v39, %v1502_v4  ;;  %v1599_v15 = vmul.f32 %v7171_v42, %v5423_v62 }
 0x262   :  { %v1385_v10 = vadd.f32 %v1367_v25, %v1305_v8  ;;  %v1054_v61 = vsel %vm105_vm0, %v1039_v17, %v1040_v28  ;;  %v5569_v58 = vadd.f32 %v1952_v32, %v1888_v1  ;;  %v1505_v53 = vsel %vm105_vm0, %v1492_v12, %v1493_v14  ;;  %v5581_v54 = vpop.permute.xlu1 %1347  ;;  %v1192_v37 = vpop.permute.xlu0 %1191 }
 0x263   :  { %v1055_v63 = vsel %vm1042_vm13, %v5310_v38, %v1054_v61  ;;  %v1785_v1 = vsel %vm105_vm0, %v1774_v2, %v1775_v9  ;;  %v1358_v62 = vrot.slane %v5581_v54, 4  ;;  %v1459_v36 = vmul.f32 %v4688_v23, %v5455_v49 }
 0x264   :  { %v1464_v3 = vadd.f32 %v1457_v56, %v1385_v10  ;;  %v1069_v17 = vadd.f32 %v1055_v63, %v989_v24  ;;  %v1200_v12 = vrot.slane %v1192_v37, 4  ;;  %v1670_v38 = vmul.f32 %v7117_v41, %v1644_v5 }
 0x265   :  { %v1370_v24 = vsel %vm105_vm0, %v1357_v13, %v1358_v62  ;;  %v1506_v27 = vsel %vm1497_vm4, %v1505_v53, %v5528_v40  ;;  %v1786_v2 = vsel %vm1781_vm8, %v1785_v1, %v5560_v20  ;;  %v1741_v56 = vmul.f32 %v4861_v26, %v5485_v55 }
 0x266   :  { %v1535_v44 = vadd.f32 %v1528_v22, %v1464_v3  ;;  %v1149_v4 = vadd.f32 %v1135_v16, %v1069_v17  ;;  %v1371_v49 = vsel %vm1362_vm3, %v5332_v60, %v1370_v24  ;;  %v1214_v5 = vsel %vm105_vm0, %v1199_v46, %v1200_v12  ;;  %v5606_v8 = vpop.permute.xlu1 %1551  ;;  %v5611_v25 = vpop.permute.xlu0 %1413 }
 0x267   :  { %v1387_v28 = vadd.f32 %v1371_v49, %v1307_v6  ;;  %v1215_v13 = vsel %vm1202_vm15, %v5379_v59, %v1214_v5  ;;  %v1563_v16 = vrot.slane %v5606_v8, 4  ;;  %v1812_v61 = vmul.f32 %v7134_v35, %v1786_v2 }
 0x268   :  { %v1606_v32 = vadd.f32 %v1599_v15, %v1535_v44  ;;  %v5615_v10 = vadd.f32 %v1215_v13, %v1149_v4  ;;  %v1530_v59 = vmul.f32 %v7150_v39, %v1506_v27  ;;  %v1985_v12 = vrot.slane %v5463_v57, 4  ;;  %v7172_v4 = vld [vmem:[#allocation103_spill] sm:$0xff] }
 0x269   :  { %v1574_v46 = vsel %vm105_vm0, %v1562_v7, %v1563_v16  ;;  %v1466_v6 = vadd.f32 %v1459_v36, %v1387_v28  ;;  %vm1994_vm11 = vcmask 277504   ;;  %v5651_v27 = vrot.slane %v7172_v4, %v7169_v18 }
 0x26a   :  { %v1677_v60 = vadd.f32 %v1670_v38, %v1606_v32  ;;  %v1575_v22 = vsel %vm1568_vm5, %v1574_v46, %v5606_v8  ;;  %v5626_v15 = vpop.permute.xlu1 %1831  ;;  %v5630_v3 = vpop.permute.xlu0 %1693  ;;  %v7175_v34 = vrot.slane %v5405_v45, 4  ;;  %vm2176_vm12 = vcmask 928768  }
 0x26b   :  { %v1600_v53 = vmul.f32 %v7171_v42, %v1575_v22  ;;  %v1845_v63 = vrot.slane %v5626_v15, 4  ;;  %v5632_v17 = vadd.f32 %v1530_v59, %v1466_v6  ;;  %v6687_v5 = vrot.slane %v5630_v3, 4 }
 0x26c   :  { %v1748_v55 = vadd.f32 %v1741_v56, %v1677_v60  ;;  %v7174_v59 = vrot.slane %v5435_v52, 4  ;;  %vm3104_vm13 = vcmask 932868  }
 0x26d   :  { %v1607_v7 = vadd.f32 %v1600_v53, %v5508_v11  ;;  %v1854_v1 = vsel %vm105_vm0, %v1844_v48, %v1845_v63  ;;  %vm3105_vm14 = vmor %vm3104_vm13, %vm105_vm0 }
 0x26e   :  { %v5634_v21 = vadd.f32 %v1812_v61, %v1748_v55  ;;  %v1855_v37 = vsel %vm1852_vm9, %v1854_v1, %v5626_v15  ;;  %v1972_v36 = vpop.permute.xlu1 %1971  ;;  %v5646_v24 = vpop.permute.xlu0 %1973  ;;  %v1716_v22 = vsel %vm105_vm0, %v7174_v59, %v6687_v5  ;;  %v6681_v1 = vrot.slane %v5611_v25, 4 }
 0x26f   :  { %v1882_v44 = vmul.f32 %v7141_v33, %v1855_v37  ;;  %v1986_v38 = vrot.slane %v1972_v36, 4  ;;  %v6686_v11 = vrot.slane %v5646_v24, 4 }
 0x271   :  { %v1889_v29 = vadd.f32 %v1882_v44, %v5468_v43  ;;  %v1993_v48 = vsel %vm105_vm0, %v1985_v12, %v1986_v38  ;;  %v1996_v57 = vsel %vm105_vm0, %v1986_v38, %v6686_v11 }
 0x272   :  { %v1995_v2 = vsel %vm1994_vm11, %v1993_v48, %v1972_v36  ;;  %v5659_v49 = vpop.permute.xlu1 %1269  ;;  %v1997_v28 = vsel %vm1994_vm11, %v1996_v57, %v5646_v24  ;;  %v5666_v43 = vpop.permute.xlu0 %1484 }
 0x273   :  { %v2023_v32 = vmul.f32 %v5651_v27, %v1995_v2  ;;  %v1279_v13 = vrot.slane %v5659_v49, 4  ;;  %v2024_v56 = vmul.f32 %v5651_v27, %v1997_v28 }
 0x275   :  { %v5670_v60 = vadd.f32 %v2023_v32, %v5569_v58  ;;  %v1292_v61 = vsel %vm105_vm0, %v1278_v51, %v1279_v13  ;;  %v1717_v51 = vsel %vm1710_vm7, %v1716_v22, %v5630_v3 }
 0x276   :  { %v1293_v46 = vsel %vm1282_vm1, %v5457_v30, %v1292_v61  ;;  %v5679_v6 = vpop.permute.xlu1 %1622  ;;  %v5688_v53 = vpop.permute.xlu0 %1764  ;;  %v1742_v44 = vmul.f32 %v4861_v26, %v1717_v51 }
 0x277   :  { %7173 = vst [vmem:[#allocation6_spill] sm:$0xff] %v5670_v60  ;;  %v1308_v58 = vadd.f32 %v1293_v46, %v5441_v50  ;;  %v1634_v55 = vrot.slane %v5679_v6, 4  ;;  %v6689_v22 = vrot.slane %v5688_v53, 4 }
 0x279   :  { %v1645_v30 = vsel %vm105_vm0, %v1633_v0, %v1634_v55  ;;  %v1436_v0 = vsel %vm105_vm0, %v7175_v34, %v6681_v1 }
 0x27a   :  { %v1646_v52 = vsel %vm1639_vm6, %v1645_v30, %v5679_v6  ;;  %v5700_v37 = vpop.permute.xlu1 %1902  ;;  %v5703_v36 = vpop.permute.xlu0 %1351  ;;  %v1437_v28 = vsel %vm1426_vm2, %v1436_v0, %v5611_v25 }
 0x27b   :  { %v1671_v50 = vmul.f32 %v7117_v41, %v1646_v52  ;;  %v1916_v12 = vrot.slane %v5700_v37, 4  ;;  %v1460_v59 = vmul.f32 %v4688_v23, %v1437_v28 }
 0x27d   :  { %v1678_v38 = vadd.f32 %v1671_v50, %v1607_v7  ;;  %v1925_v4 = vsel %vm105_vm0, %v1915_v19, %v1916_v12 }
 0x27e   :  { %v5717_v48 = vpop.permute.xlu1 %1349  ;;  %v1926_v57 = vsel %vm1923_vm10, %v1925_v4, %v5700_v37  ;;  %v5722_v45 = vpop.permute.xlu0 %1555 }
 0x27f   :  { %v1749_v2 = vadd.f32 %v1742_v44, %v1678_v38  ;;  %v6682_v32 = vrot.slane %v5717_v48, 4  ;;  %v1953_v7 = vmul.f32 %v5545_v31, %v1926_v57 }
 0x281   :  { %v1372_v47 = vsel %vm105_vm0, %v1358_v62, %v6682_v32  ;;  %v1960_v19 = vadd.f32 %v1953_v7, %v1889_v29 }
 0x282   :  { %v1373_v61 = vsel %vm1362_vm3, %v5581_v54, %v1372_v47  ;;  %v5734_v46 = vpop.permute.xlu1 %1553  ;;  %v5739_v52 = vpop.permute.xlu0 %1835 }
 0x283   :  { %v1388_v30 = vadd.f32 %v1373_v61, %v1308_v58  ;;  %v6683_v51 = vrot.slane %v5734_v46, 4  ;;  %v5741_v50 = vadd.f32 %v2024_v56, %v1960_v19  ;;  %v6688_v54 = vrot.slane %v5739_v52, 4  ;;  %v37_v61 = vld [vmem:[%s6563_s1] sm:$0xff] }
 0x284   :  { %v1787_v56 = vsel %vm105_vm0, %v1775_v9, %v6689_v22 }
 0x285   :  { %7176 = vst [vmem:[#allocation65_spill] sm:$0xff] %v5741_v50  ;;  %v1576_v62 = vsel %vm105_vm0, %v1563_v16, %v6683_v51  ;;  %v5749_v29 = vadd.f32 %v1460_v59, %v1388_v30  ;;  %v1788_v20 = vsel %vm1781_vm8, %v1787_v56, %v5688_v53 }
 0x286   :  { %v1577_v34 = vsel %vm1568_vm5, %v1576_v62, %v5734_v46  ;;  %v1834_v58 = vpop.permute.xlu1 %1833  ;;  %v5759_v8 = vpop.permute.xlu0 %1486  ;;  %v1813_v59 = vmul.f32 %v7134_v35, %v1788_v20 }
 0x287   :  { %v1601_v0 = vmul.f32 %v7171_v42, %v1577_v34  ;;  %v1846_v44 = vrot.slane %v1834_v58, 4 }
 0x288   :  { %v1820_v56 = vadd.f32 %v1813_v59, %v1749_v2 }
 0x289   :  { %v5762_v16 = vadd.f32 %v1601_v0, %v5632_v17  ;;  %v1856_v38 = vsel %vm105_vm0, %v1845_v63, %v1846_v44  ;;  %v1858_v4 = vsel %vm105_vm0, %v1846_v44, %v6688_v54  ;;  %v7177_v17 = vld [vmem:[#allocation2_spill] sm:$0xff] }
 0x28a   :  { %v1857_v9 = vsel %vm1852_vm9, %v1856_v38, %v1834_v58  ;;  %v1272_v57 = vpop.permute.xlu1 %1271  ;;  %v5774_v47 = vpop.permute.xlu0 %1766  ;;  %v5777_v19 = vsub.s32 0, %v7177_v17  ;;  %v5780_v15 = vsub.s32 1, %v7177_v17  ;;  %v1859_v63 = vsel %vm1852_vm9, %v1858_v4, %v5739_v52 }
 0x28b   :  { %v1883_v28 = vmul.f32 %v7141_v33, %v1857_v9  ;;  %v1280_v7 = vrot.slane %v1272_v57, 4  ;;  %v1884_v38 = vmul.f32 %v7141_v33, %v1859_v63  ;;  %v5831_v59 = vsub.s32 6, %v7177_v17 }
 0x28c   :  { %7178 = vst [vmem:[#allocation66_spill] sm:$0xff] %v5777_v19  ;;  %7179 = vst [vmem:[#allocation67_spill] sm:$0xff] %v5780_v15  ;;  %v5803_v4 = vrot.slane %v37_v61, %v5777_v19  ;;  %v7189_v40 = vrot.slane %v5774_v47, 4 }
 0x28d   :  { %v1890_v30 = vadd.f32 %v1883_v28, %v5634_v21  ;;  %v1294_v62 = vsel %vm105_vm0, %v1279_v13, %v1280_v7  ;;  %v5806_v21 = vrot.slane %v37_v61, %v5780_v15  ;;  %v5809_v20 = vadd.f32 %v1884_v38, %v1820_v56  ;;  %7185 = vst [vmem:[#allocation75_spill] sm:$0xff] %v5831_v59 }
 0x28e   :  { %v1295_v34 = vsel %vm1282_vm1, %v5659_v49, %v1294_v62  ;;  %v5794_v58 = vpop.permute.xlu1 %1624  ;;  %v5799_v44 = vpop.permute.xlu0 %1557  ;;  %7180 = vst [vmem:[#allocation68_spill] sm:$0xff] %v5803_v4  ;;  %v5812_v49 = vsub.s32 2, %v7177_v17  ;;  %v5823_v28 = vsub.s32 4, %v7177_v17  ;;  %v5826_v7 = vsub.s32 5, %v7177_v17 }
 0x28f   :  { %v5797_v0 = vadd.f32 %v1295_v34, %v5615_v10  ;;  %7181 = vst [vmem:[#allocation69_spill] sm:$0xff] %v5806_v21  ;;  %v6684_v13 = vrot.slane %v5794_v58, 4  ;;  %v5815_v10 = vsub.s32 3, %v7177_v17  ;;  %v2109_v63 = vcombine.low %v5803_v4, %v5806_v21 }
 0x290   :  { %7183 = vst [vmem:[#allocation73_spill] sm:$0xff] %v5823_v28  ;;  %7184 = vst [vmem:[#allocation74_spill] sm:$0xff] %v5826_v7  ;;  %v6690_v62 = vrot.slane %v5666_v43, 4  ;;  %v5845_v38 = vsub.s32 7, %v7177_v17  ;;  %v5848_v1 = vrot.slane %v37_v61, %v5812_v49  ;;  %v5865_v17 = vrot.slane %v37_v61, %v5826_v7 }
 0x291   :  { %7182 = vst [vmem:[#allocation71_spill] sm:$0xff] %v5815_v10  ;;  %v1647_v34 = vsel %vm105_vm0, %v1634_v55, %v6684_v13  ;;  %v5851_v32 = vrot.slane %v37_v61, %v5815_v10 }
 0x292   :  { %v5817_v2 = vpop.permute.xlu1 %1904  ;;  %v5820_v57 = vpop.permute.xlu0 %1837  ;;  %7186 = vst [vmem:[#allocation76_spill] sm:$0xff] %v5845_v38  ;;  %7187 = vst [vmem:[#allocation79_spill] sm:$0xff] %v5848_v1  ;;  %v1648_v11 = vsel %vm1639_vm6, %v1647_v34, %v5794_v58  ;;  %v5880_v22 = vrot.slane %v37_v61, %v5845_v38 }
 0x293   :  { %v6685_v9 = vrot.slane %v5817_v2, 4  ;;  %7188 = vst [vmem:[#allocation80_spill] sm:$0xff] %v5851_v32  ;;  %v2110_v34 = vcombine.low %v5848_v1, %v5851_v32 }
 0x295   :  { %v1927_v56 = vsel %vm105_vm0, %v1916_v12, %v6685_v9  ;;  %v5862_v12 = vrot.slane %v37_v61, %v5823_v28  ;;  %v2123_v9 = vmul.f32 %v2109_v63, %v5670_v60  ;;  %v5885_v63 = vld [vmem:[%s6563_s1 + $0x8] sm:$0x3f] }
 0x296   :  { %v1928_v6 = vsel %vm1923_vm10, %v1927_v56, %v5817_v2  ;;  %v5855_v51 = vpop.permute.xlu1 %1415  ;;  %v5859_v13 = vpop.permute.xlu0 %1628  ;;  %v5871_v56 = vrot.slane %v37_v61, %v5831_v59  ;;  %v5905_v1 = vrot.slane %v5885_v63, %v5777_v19  ;;  %v5923_v38 = vrot.slane %v5885_v63, %v5780_v15 }
 0x297   :  { %v1954_v37 = vmul.f32 %v5545_v31, %v1928_v6  ;;  %v1507_v6 = vsel %vm105_vm0, %v1493_v14, %v6690_v62  ;;  %v7190_v14 = vrot.slane %v5688_v53, 4  ;;  %v2137_v54 = vcombine.high %v2123_v9, %v2123_v9 }
 0x298   :  { %v2181_v21 = vmul.f32 %v2123_v9, %v5670_v60  ;;  %v1508_v32 = vsel %vm1497_vm4, %v1507_v6, %v5666_v43  ;;  %v7191_v53 = vrot.slane %v5820_v57, 4  ;;  %7194 = vst [vmem:[#allocation81_spill] sm:$0xff] %v5923_v38  ;;  %v2124_v59 = vmul.f32 %v2110_v34, %v5741_v50 }
 0x299   :  { %v1961_v5 = vadd.f32 %v1954_v37, %v1890_v30  ;;  %v1789_v30 = vsel %vm105_vm0, %v7190_v14, %v7189_v40  ;;  %v1672_v37 = vmul.f32 %v7117_v41, %v1648_v11  ;;  %v7192_v40 = vrot.slane %v5739_v52, 4 }
 0x29a   :  { %v5889_v55 = vpop.permute.xlu1 %1695  ;;  %v7193_v14 = vrot.slane %v5630_v3, 4  ;;  %v5917_v4 = vpop.permute.xlu0 %1908  ;;  %v2151_v34 = vsel %vm105_vm0, %v2123_v9, 0.0  ;;  %v2152_v52 = vsel %vm105_vm0, %v2137_v54, 0.0  ;;  %v2195_v19 = vcombine.high %v2181_v21, %v2181_v21 }
 0x29b   :  { %v6699_v61 = vrot.slane %v5889_v55, 4  ;;  %v1860_v11 = vsel %vm105_vm0, %v7192_v40, %v7191_v53  ;;  %v1790_v53 = vsel %vm1781_vm8, %v1789_v30, %v5774_v47  ;;  %v1679_v6 = vadd.f32 %v1672_v37, %v5762_v16 }
 0x29c   :  { %v1861_v30 = vsel %vm1852_vm9, %v1860_v11, %v5820_v57  ;;  %v1814_v60 = vmul.f32 %v7134_v35, %v1790_v53  ;;  %v2182_v37 = vmul.f32 %v2124_v59, %v5741_v50  ;;  %v7196_v9 = vrot.slane %v5722_v45, 4 }
 0x29d   :  { %v1718_v62 = vsel %vm105_vm0, %v7193_v14, %v6699_v61  ;;  %v1531_v14 = vmul.f32 %v7150_v39, %v1508_v32  ;;  %v7195_v32 = vrot.slane %v5646_v24, 4  ;;  %v7197_v54 = vrot.slane %v5734_v46, 4 }
 0x29e   :  { %v1719_v3 = vsel %vm1710_vm7, %v1718_v62, %v5889_v55  ;;  %v5931_v40 = vpop.permute.xlu1 %1975  ;;  %v1360_v62 = vrot.slane %v5703_v36, 4  ;;  %v1424_v11 = vrot.slane %v5855_v51, 4  ;;  %v1885_v24 = vmul.f32 %v7141_v33, %v1861_v30 }
 0x29f   :  { %v1743_v61 = vmul.f32 %v4861_v26, %v1719_v3  ;;  %v6706_v15 = vrot.slane %v5931_v40, 4  ;;  %v1578_v3 = vsel %vm105_vm0, %v7197_v54, %v7196_v9  ;;  %v2153_v50 = vadd.f32 %v2152_v52, %v2151_v34 }
 0x2a0   :  { %v2209_v46 = vsel %vm105_vm0, %v2181_v21, 0.0  ;;  %v2210_v9 = vsel %vm105_vm0, %v2195_v19, 0.0  ;;  %v7198_v54 = vrot.slane %v5717_v48, 4  ;;  %v1579_v28 = vsel %vm1568_vm5, %v1578_v3, %v5722_v45 }
 0x2a1   :  { %v1750_v18 = vadd.f32 %v1743_v61, %v1679_v6  ;;  %v1998_v16 = vsel %vm105_vm0, %v7195_v32, %v6706_v15  ;;  %v1495_v6 = vrot.slane %v5759_v8, 4  ;;  %v5960_v15 = vpop.permute.xlu0 %1839  ;;  %v2196_v30 = vcombine.high %v2182_v37, %v2182_v37 }
 0x2a2   :  { %v1999_v36 = vsel %vm1994_vm11, %v1998_v16, %v5931_v40  ;;  %v1627_v61 = vpop.permute.xlu1 %1626  ;;  %v1374_v7 = vsel %vm105_vm0, %v7198_v54, %v1360_v62  ;;  %v2138_v16 = vcombine.high %v2124_v59, %v2124_v59  ;;  %v7199_v52 = vrot.slane %v5611_v25, 4 }
 0x2a3   :  { %v1821_v53 = vadd.f32 %v1814_v60, %v1750_v18  ;;  %v2025_v32 = vmul.f32 %v5651_v27, %v1999_v36  ;;  %v2154_v60 = vsel %vm105_vm0, %v2124_v59, 0.0  ;;  %v1919_v19 = vrot.slane %v5917_v4, 4 }
 0x2a4   :  { %v1438_v21 = vsel %vm105_vm0, %v7199_v52, %v1424_v11  ;;  %v2212_v36 = vsel %vm105_vm0, %v2182_v37, 0.0  ;;  %v7200_v62 = vrot.slane %v5666_v43, 4  ;;  %v1636_v3 = vrot.slane %v1627_v61, 4 }
 0x2a5   :  { %v5969_v10 = vadd.f32 %v2025_v32, %v1961_v5  ;;  %v1892_v18 = vadd.f32 %v1885_v24, %v1821_v53  ;;  %v2211_v32 = vadd.f32 %v2210_v9, %v2209_v46  ;;  %v1375_v59 = vsel %vm1362_vm3, %v5717_v48, %v1374_v7  ;;  %v5988_v52 = vpop.permute.xlu0 %1770 }
 0x2a6   :  { %v1907_v34 = vpop.permute.xlu1 %1906  ;;  %v1509_v54 = vsel %vm105_vm0, %v7200_v62, %v1495_v6  ;;  %v1538_v24 = vadd.f32 %v1531_v14, %v5749_v29  ;;  %v1602_v25 = vmul.f32 %v7171_v42, %v1579_v28  ;;  %v2155_v11 = vadd.f32 %v2154_v60, %v2153_v50 }
 0x2a7   :  { %v1918_v5 = vrot.slane %v1907_v34, 4  ;;  %v1566_v53 = vrot.slane %v5799_v44, 4  ;;  %v1439_v37 = vsel %vm1426_vm2, %v1438_v21, %v5855_v51  ;;  %v1637_v43 = vrot.slane %v5859_v13, 4 }
 0x2a8   :  { %v2213_v6 = vadd.f32 %v2212_v36, %v2211_v32  ;;  %v1510_v46 = vsel %vm1497_vm4, %v1509_v54, %v5759_v8  ;;  %v7201_v48 = vrot.slane %v5817_v2, 4  ;;  %v2156_v51 = vsel %vm105_vm0, %v2138_v16, 0.0 }
 0x2a9   :  { %v1931_v50 = vsel %vm105_vm0, %v1918_v5, %v1919_v19  ;;  %v2214_v7 = vsel %vm105_vm0, %v2196_v30, 0.0  ;;  %v7202_v14 = vrot.slane %v5794_v58, 4  ;;  %v1389_v2 = vadd.f32 %v1375_v59, %v5797_v0 }
 0x2aa   :  { %v1929_v29 = vsel %vm105_vm0, %v7201_v48, %v1918_v5  ;;  %v5998_v28 = vpop.permute.xlu1 %1697  ;;  %v1461_v60 = vmul.f32 %v4688_v23, %v1439_v37  ;;  %v1932_v21 = vsel %vm1923_vm10, %v1931_v50, %v5917_v4  ;;  %v7203_v62 = vrot.slane %v5722_v45, 4  ;;  %v1842_v37 = vpop.permute.xlu0 %1841 }
 0x2ab   :  { %v1649_v9 = vsel %vm105_vm0, %v7202_v14, %v1636_v3  ;;  %v1930_v8 = vsel %vm1923_vm10, %v1929_v29, %v1907_v34  ;;  %v1849_v30 = vrot.slane %v5960_v15, 4  ;;  %v1651_v58 = vsel %vm105_vm0, %v1636_v3, %v1637_v43 }
 0x2ac   :  { %v1955_v36 = vmul.f32 %v5545_v31, %v1930_v8  ;;  %v1580_v16 = vsel %vm105_vm0, %v7203_v62, %v1566_v53  ;;  %v1707_v54 = vrot.slane %v5998_v28, 4  ;;  %v7204_v0 = vcombine.low %v5862_v12, %v5865_v17 }
 0x2ad   :  { %v1650_v34 = vsel %vm1639_vm6, %v1649_v9, %v1627_v61  ;;  %v1956_v45 = vmul.f32 %v5545_v31, %v1932_v21  ;;  %v1532_v59 = vmul.f32 %v7150_v39, %v1510_v46  ;;  %v2157_v53 = vadd.f32 %v2156_v51, %v2155_v11 }
 0x2ae   :  { %v2125_v23 = vmul.f32 %v7204_v0, %v5969_v10  ;;  %v1962_v5 = vadd.f32 %v1955_v36, %v5809_v20  ;;  %v6023_v32 = vpop.permute.xlu1 %1977  ;;  %v7205_v3 = vrot.slane %v5889_v55, 4  ;;  %v1581_v29 = vsel %vm1568_vm5, %v1580_v16, %v5799_v44 }
 0x2af   :  { %v1989_v48 = vrot.slane %v6023_v32, 4  ;;  %v1468_v61 = vadd.f32 %v1461_v60, %v1389_v2  ;;  %v6035_v50 = vadd.f32 %v1956_v45, %v1892_v18  ;;  %v7206_v14 = vrot.slane %v5820_v57, 4 }
 0x2b0   :  { %v1720_v43 = vsel %vm105_vm0, %v7205_v3, %v1707_v54  ;;  %v1652_v55 = vsel %vm1639_vm6, %v1651_v58, %v5859_v13  ;;  %v1673_v11 = vmul.f32 %v7117_v41, %v1650_v34  ;;  %v7207_v46 = vrot.slane %v5931_v40, 4 }
 0x2b1   :  { %v1721_v20 = vsel %vm1710_vm7, %v1720_v43, %v5998_v28  ;;  %v1862_v39 = vsel %vm105_vm0, %v7206_v14, %v1849_v30  ;;  %v2183_v51 = vmul.f32 %v2125_v23, %v5969_v10  ;;  %v1609_v28 = vadd.f32 %v1602_v25, %v1538_v24 }
 0x2b2   :  { %v2000_v44 = vsel %vm105_vm0, %v7207_v46, %v1989_v48  ;;  %v1850_v18 = vrot.slane %v1842_v37, 4  ;;  %v1769_v9 = vpop.permute.xlu1 %1768  ;;  %v1603_v8 = vmul.f32 %v7171_v42, %v1581_v29  ;;  %v1744_v13 = vmul.f32 %v4861_v26, %v1721_v20 }
 0x2b3   :  { %v2001_v57 = vsel %vm1994_vm11, %v2000_v44, %v6023_v32  ;;  %v1778_v60 = vrot.slane %v1769_v9, 4  ;;  %v1539_v21 = vadd.f32 %v1532_v59, %v1468_v61  ;;  %v1863_v40 = vsel %vm1852_vm9, %v1862_v39, %v5960_v15 }
 0x2b4   :  { %v2026_v2 = vmul.f32 %v5651_v27, %v2001_v57  ;;  %v1779_v36 = vrot.slane %v5988_v52, 4  ;;  %v1674_v24 = vmul.f32 %v7117_v41, %v1652_v55  ;;  %v2139_v25 = vcombine.high %v2125_v23, %v2125_v23 }
 0x2b5   :  { %v1680_v62 = vadd.f32 %v1673_v11, %v1609_v28  ;;  %v7208_v58 = vrot.slane %v5774_v47, 4  ;;  %v2158_v0 = vsel %vm105_vm0, %v2125_v23, 0.0  ;;  %v2197_v34 = vcombine.high %v2183_v51, %v2183_v51 }
 0x2b6   :  { %v6058_v16 = vadd.f32 %v2026_v2, %v1962_v5  ;;  %v1864_v45 = vsel %vm105_vm0, %v1849_v30, %v1850_v18  ;;  %v1700_v15 = vpop.permute.xlu1 %1699  ;;  %v2216_v3 = vsel %vm105_vm0, %v2183_v51, 0.0  ;;  %v2215_v5 = vadd.f32 %v2214_v7, %v2213_v6  ;;  %v1913_v51 = vpop.permute.xlu0 %1912 }
 0x2b7   :  { %v1791_v42 = vsel %vm105_vm0, %v7208_v58, %v1778_v60  ;;  %v1751_v43 = vadd.f32 %v1744_v13, %v1680_v62  ;;  %v1708_v29 = vrot.slane %v1700_v15, 4  ;;  %v7209_v47 = vcombine.low %v5871_v56, %v5880_v22 }
 0x2b8   :  { %v1792_v59 = vsel %vm1781_vm8, %v1791_v42, %v1769_v9  ;;  %v1793_v23 = vsel %vm105_vm0, %v1778_v60, %v1779_v36  ;;  %v6075_v30 = vrot.slane %v5885_v63, %v5812_v49  ;;  %v2159_v20 = vadd.f32 %v2158_v0, %v2157_v53 }
 0x2b9   :  { %v1815_v41 = vmul.f32 %v7134_v35, %v1792_v59  ;;  %v2126_v61 = vmul.f32 %v7209_v47, %v6058_v16  ;;  %v1886_v14 = vmul.f32 %v7141_v33, %v1863_v40  ;;  %v1610_v55 = vadd.f32 %v1603_v8, %v1539_v21  ;;  %v7211_v47 = vld [vmem:[#allocation71_spill] sm:$0xff] }
 0x2ba   :  { %7210 = vst [vmem:[#allocation83_spill] sm:$0xff] %v6075_v30  ;;  %v2160_v11 = vsel %vm105_vm0, %v2139_v25, 0.0  ;;  %v2217_v46 = vadd.f32 %v2216_v3, %v2215_v5  ;;  %v1865_v6 = vsel %vm1852_vm9, %v1864_v45, %v1842_v37  ;;  %v1722_v7 = vsel %vm105_vm0, %v1707_v54, %v1708_v29  ;;  %v1980_v44 = vpop.permute.xlu1 %1979 }
 0x2bb   :  { %v1822_v39 = vadd.f32 %v1815_v41, %v1751_v43  ;;  %v2218_v28 = vsel %vm105_vm0, %v2197_v34, 0.0  ;;  %v1794_v18 = vsel %vm1781_vm8, %v1793_v23, %v5988_v52  ;;  %v1681_v57 = vadd.f32 %v1674_v24, %v1610_v55 }
 0x2bc   :  { %v1723_v53 = vsel %vm1710_vm7, %v1722_v7, %v1700_v15  ;;  %v2184_v9 = vmul.f32 %v2126_v61, %v6058_v16  ;;  %v1990_v13 = vrot.slane %v1980_v44, 4  ;;  %v2140_v60 = vcombine.high %v2126_v61, %v2126_v61 }
 0x2bd   :  { %v1745_v8 = vmul.f32 %v4861_v26, %v1723_v53  ;;  %v1893_v2 = vadd.f32 %v1886_v14, %v1822_v39  ;;  %v2162_v37 = vsel %vm105_vm0, %v2126_v61, 0.0  ;;  %v2113_v54 = vcombine.low %v5905_v1, %v5923_v38  ;;  %v7213_v14 = vld [vmem:[#allocation73_spill] sm:$0xff]  ;;  %v7215_v53 = vld [vmem:[#allocation74_spill] sm:$0xff] }
 0x2be   :  { %v1921_v21 = vrot.slane %v1913_v51, 4  ;;  %v2161_v40 = vadd.f32 %v2160_v11, %v2159_v20  ;;  %v1816_v36 = vmul.f32 %v7134_v35, %v1794_v18  ;;  %v2002_v24 = vsel %vm105_vm0, %v1989_v48, %v1990_v13  ;;  %v1911_v25 = vpop.permute.xlu1 %1910 }
 0x2bf   :  { %v1752_v52 = vadd.f32 %v1745_v8, %v1681_v57  ;;  %v1887_v26 = vmul.f32 %v7141_v33, %v1865_v6  ;;  %v2219_v62 = vadd.f32 %v2218_v28, %v2217_v46  ;;  %v2003_v58 = vsel %vm1994_vm11, %v2002_v24, %v1980_v44 }
 0x2c0   :  { %v1920_v42 = vrot.slane %v1911_v25, 4  ;;  %v2163_v0 = vadd.f32 %v2162_v37, %v2161_v40  ;;  %v2198_v34 = vcombine.high %v2184_v9, %v2184_v9  ;;  %v2027_v59 = vmul.f32 %v5651_v27, %v2003_v58 }
 0x2c1   :  { %v1823_v45 = vadd.f32 %v1816_v36, %v1752_v52  ;;  %v2164_v15 = vsel %vm105_vm0, %v2140_v60, 0.0  ;;  %v2220_v35 = vsel %vm105_vm0, %v2184_v9, 0.0  ;;  %v6111_v61 = vrot.slane %v5885_v63, %v7211_v47 }
 0x2c2   :  { %v1933_v32 = vsel %vm105_vm0, %v1919_v19, %v1920_v42  ;;  %v1935_v48 = vsel %vm105_vm0, %v1920_v42, %v1921_v21  ;;  %v6104_v33 = vadd.f32 %v2027_v59, %v6035_v50  ;;  %v1982_v41 = vpop.permute.xlu1 %1981  ;;  %v2221_v23 = vadd.f32 %v2220_v35, %v2219_v62 }
 0x2c3   :  { %v1934_v3 = vsel %vm1923_vm10, %v1933_v32, %v1911_v25  ;;  %v1936_v43 = vsel %vm1923_vm10, %v1935_v48, %v1913_v51  ;;  %v1894_v29 = vadd.f32 %v1887_v26, %v1823_v45  ;;  %7212 = vst [vmem:[#allocation14_spill] sm:$0xff] %v6111_v61  ;;  %v1991_v4 = vrot.slane %v1982_v41, 4 }
 0x2c4   :  { %v1957_v5 = vmul.f32 %v5545_v31, %v1934_v3  ;;  %v1958_v19 = vmul.f32 %v5545_v31, %v1936_v43  ;;  %v2222_v20 = vsel %vm105_vm0, %v2198_v34, 0.0  ;;  %v2127_v50 = vmul.f32 %v2113_v54, %v6104_v33 }
 0x2c5   :  { %v6118_v39 = vrot.slane %v5885_v63, %v7213_v14  ;;  %v2004_v11 = vsel %vm105_vm0, %v1990_v13, %v1991_v4  ;;  %v2165_v6 = vadd.f32 %v2164_v15, %v2163_v0  ;;  %v2114_v18 = vcombine.low %v6075_v30, %v6111_v61 }
 0x2c6   :  { %v1964_v55 = vadd.f32 %v1957_v5, %v1893_v2  ;;  %v1965_v46 = vadd.f32 %v1958_v19, %v1894_v29  ;;  %v2141_v7 = vcombine.high %v2127_v50, %v2127_v50  ;;  %v2166_v44 = vsel %vm105_vm0, %v2127_v50, 0.0  ;;  %v1984_v28 = vpop.permute.xlu1 %1983 }
 0x2c7   :  { %7214 = vst [vmem:[#allocation94_spill] sm:$0xff] %v6118_v39  ;;  %v2185_v51 = vmul.f32 %v2127_v50, %v6104_v33  ;;  %v2005_v31 = vsel %vm1994_vm11, %v2004_v11, %v1982_v41  ;;  %v6129_v9 = vrot.slane %v5885_v63, %v7215_v53  ;;  %v1992_v8 = vrot.slane %v1984_v28, 4 }
 0x2c8   :  { %v2028_v57 = vmul.f32 %v5651_v27, %v2005_v31  ;;  %v2223_v13 = vadd.f32 %v2222_v20, %v2221_v23  ;;  %v2167_v37 = vadd.f32 %v2166_v44, %v2165_v6  ;;  %v2168_v40 = vsel %vm105_vm0, %v2141_v7, 0.0 }
 0x2c9   :  { %7216 = vst [vmem:[#allocation31_spill] sm:$0xff] %v6129_v9  ;;  %v2199_v2 = vcombine.high %v2185_v51, %v2185_v51  ;;  %v2224_v60 = vsel %vm105_vm0, %v2185_v51, 0.0  ;;  %v2006_v21 = vsel %vm105_vm0, %v1991_v4, %v1992_v8  ;;  %v2115_v63 = vcombine.low %v6118_v39, %v6129_v9  ;;  %v2242_v8 = vld [vmem:[%s6564_s4] sm:$0xf] }
 0x2ca   :  { %v6132_v54 = vadd.f32 %v2028_v57, %v1964_v55  ;;  %v2225_v36 = vadd.f32 %v2224_v60, %v2223_v13  ;;  %v2007_v52 = vsel %vm1994_vm11, %v2006_v21, %v1984_v28  ;;  %v2169_v62 = vadd.f32 %v2168_v40, %v2167_v37  ;;  %v2246_v60 = vld [vmem:[%s6565_s5] sm:$0xf] }
 0x2cb   :  { %v2029_v25 = vmul.f32 %v5651_v27, %v2007_v52  ;;  %v2226_v26 = vsel %vm105_vm0, %v2199_v2, 0.0  ;;  %v2294_v40 = vld [vmem:[%s6566_s3] sm:$0xf]  ;;  %v7218_v52 = vmov 2  }
 0x2cc   :  { %v2128_v24 = vmul.f32 %v2114_v18, %v6132_v54  ;;  %v2227_v59 = vadd.f32 %v2226_v26, %v2225_v36  ;;  %v7217_v36 = vmov 1   ;;  %v7221_v26 = vld [vmem:[#allocation3_spill] sm:$0xff] }
 0x2cd   :  { %v6143_v42 = vadd.f32 %v2029_v25, %v1965_v46 }
 0x2ce   :  { %v2186_v58 = vmul.f32 %v2128_v24, %v6132_v54  ;;  %v2142_v0 = vcombine.high %v2128_v24, %v2128_v24  ;;  %v2170_v34 = vsel %vm105_vm0, %v2128_v24, 0.0  ;;  %v7219_v24 = vmov 3  }
 0x2cf   :  { %v2171_v45 = vadd.f32 %v2170_v34, %v2169_v62  ;;  %v2129_v15 = vmul.f32 %v2115_v63, %v6143_v42  ;;  %v7220_v63 = vmov 0   ;;  %v7222_v34 = vld [vmem:[#allocation6_spill] sm:$0xff] }
 0x2d0   :  { %v2172_v35 = vsel %vm105_vm0, %v2142_v0, 0.0  ;;  %v2200_v32 = vcombine.high %v2186_v58, %v2186_v58  ;;  %v2228_v48 = vsel %vm105_vm0, %v2186_v58, 0.0 }
 0x2d1   :  { %v2173_v27 = vadd.f32 %v2172_v35, %v2171_v45  ;;  %v2229_v3 = vadd.f32 %v2228_v48, %v2227_v59  ;;  %v2143_v43 = vcombine.high %v2129_v15, %v2129_v15  ;;  %v2174_v41 = vsel %vm105_vm0, %v2129_v15, 0.0  ;;  %v7223_v59 = vld [vmem:[#allocation65_spill] sm:$0xff] }
 0x2d2   :  { %v2187_v29 = vmul.f32 %v2129_v15, %v6143_v42  ;;  %v2230_v5 = vsel %vm105_vm0, %v2200_v32, 0.0 }
 0x2d3   :  { %v2175_v4 = vadd.f32 %v2174_v41, %v2173_v27  ;;  %v2231_v19 = vadd.f32 %v2230_v5, %v2229_v3  ;;  %v2177_v23 = vsel %vm2176_vm12, %v2143_v43, 0.0 }
 0x2d4   :  { %v2201_v20 = vcombine.high %v2187_v29, %v2187_v29  ;;  %v2232_v50 = vsel %vm105_vm0, %v2187_v29, 0.0 }
 0x2d5   :  { %v2178_v55 = vadd.f32 %v2177_v23, %v2175_v4  ;;  %v2233_v11 = vadd.f32 %v2232_v50, %v2231_v19 }
 0x2d6   :  { %v2234_v46 = vsel %vm2176_vm12, %v2201_v20, 0.0 }
 0x2d7   :  { %2179 = vadd.xlane.f32.xlu0 %v2178_v55  ;;  %v2235_v6 = vadd.f32 %v2234_v46, %v2233_v11 }
 0x2d9   :  { %2236 = vadd.xlane.f32.xlu1 %v2235_v6 }
 0x364   :  { %v2180_v7 = vpop.xlane.xlu0 %2179 }
 0x365   :  { %v2238_v44 = vmul.f32 0.0009765625, %v2180_v7 }
 0x366   :  { %v2237_v51 = vpop.xlane.xlu1 %2236 }
 0x367   :  { %v2240_v31 = vmul.f32 %v2238_v44, %v2238_v44  ;;  %v2239_v28 = vmul.f32 0.0009765625, %v2237_v51 }
 0x369   :  { %v2241_v18 = vsub.f32 %v2239_v28, %v2240_v31 }
 0x36b   :  { %v2243_v57 = vadd.f32 1e-05, %v2241_v18 }
 0x36d   :  { %3197 = vrsqrt.f32 %v2243_v57 }
 0x377   :  { %v3198_v13 = vpop.eup %3197 }
 0x378   :  { %v2245_v2 = vmul.f32 %v3198_v13, %v2242_v8 }
 0x37a   :  { %2251 = vperm.xlu0 %3191, %v2245_v2   ;;  %v2247_v37 = vmul.f32 %v2245_v2, %v2238_v44 }
 0x37c   :  { %v2248_v21 = vsub.f32 %v2246_v60, %v2247_v37 }
 0x37e   :  { %2270 = vperm.xlu1 %3192, %v2248_v21  }
 0x382   :  { %2297 = vperm.xlu1 %3192, %v2294_v40  }
 0x386   :  { %3193 = vset.pattern.permute.xlu1 %v7217_v36 }
 0x387   :  { %2448 = vperm.xlu1 %3193, %v2294_v40  }
 0x38b   :  { %3194 = vset.pattern.permute.xlu1 %v7218_v52 }
 0x38c   :  { %2606 = vperm.xlu1 %3194, %v2294_v40  }
 0x390   :  { %3195 = vset.pattern.permute.xlu1 %v7219_v24 }
 0x391   :  { %2764 = vperm.xlu1 %3195, %v2294_v40  }
 0x395   :  { %3196 = vset.pattern.permute.xlu1 %v7220_v63 }
 0x3f9   :  { %v2252_v25 = vpop.permute.xlu0 %2251 }
 0x3fa   :  { %v2259_v62 = vrot.slane %v2252_v25, %v7221_v26 }
 0x3fc   :  { %v2261_v45 = vmul.f32 %v2259_v62, %v7222_v34  ;;  %v2262_v15 = vmul.f32 %v2259_v62, %v7223_v59  ;;  %v2263_v35 = vmul.f32 %v2259_v62, %v5969_v10  ;;  %v2264_v32 = vmul.f32 %v2259_v62, %v6058_v16 }
 0x3fd   :  { %v2271_v58 = vpop.permute.xlu1 %2270  ;;  %v2265_v48 = vmul.f32 %v2259_v62, %v6104_v33  ;;  %v2266_v43 = vmul.f32 %v2259_v62, %v6132_v54  ;;  %v2267_v41 = vmul.f32 %v2259_v62, %v6143_v42  ;;  %v7224_v42 = vld [vmem:[#allocation66_spill] sm:$0xff] }
 0x3fe   :  { %v2278_v0 = vrot.slane %v2271_v58, %v7221_v26 }
 0x400   :  { %v2280_v27 = vadd.f32 %v2278_v0, %v2261_v45  ;;  %v2281_v3 = vadd.f32 %v2278_v0, %v2262_v15  ;;  %v2282_v29 = vadd.f32 %v2278_v0, %v2263_v35  ;;  %v2283_v5 = vadd.f32 %v2278_v0, %v2264_v32 }
 0x401   :  { %v2284_v4 = vadd.f32 %v2278_v0, %v2265_v48  ;;  %v2285_v19 = vadd.f32 %v2278_v0, %v2266_v43  ;;  %v2286_v23 = vadd.f32 %v2278_v0, %v2267_v41  ;;  %v2298_v62 = vpop.permute.xlu1 %2297  ;;  %v7225_v41 = vld [vmem:[#allocation67_spill] sm:$0xff] }
 0x402   :  { %v6177_v20 = vmax.f32 %v2280_v27, 0.0  ;;  %v6179_v50 = vmax.f32 %v2281_v3, 0.0  ;;  %v6181_v10 = vmax.f32 %v2282_v29, 0.0  ;;  %v6183_v16 = vmax.f32 %v2283_v5, 0.0 }
 0x403   :  { %v6185_v33 = vmax.f32 %v2284_v4, 0.0  ;;  %v6187_v55 = vmax.f32 %v2285_v19, 0.0  ;;  %v6189_v54 = vmax.f32 %v2286_v23, 0.0 }
 0x404   :  { %v2310_v11 = vrot.slane %v6177_v20, %v7224_v42  ;;  %v2314_v46 = vrot.slane %v6177_v20, %v7213_v14  ;;  %v2318_v6 = vrot.slane %v6179_v50, %v7224_v42  ;;  %v2322_v7 = vrot.slane %v6179_v50, %v7213_v14 }
 0x405   :  { %v2326_v44 = vrot.slane %v6181_v10, %v7224_v42  ;;  %v2330_v51 = vrot.slane %v6181_v10, %v7213_v14  ;;  %v2334_v31 = vrot.slane %v6183_v16, %v7224_v42  ;;  %v2338_v28 = vrot.slane %v6183_v16, %v7213_v14 }
 0x406   :  { %v2342_v18 = vrot.slane %v6185_v33, %v7224_v42  ;;  %v2346_v57 = vrot.slane %v6185_v33, %v7213_v14  ;;  %v2350_v8 = vrot.slane %v6187_v55, %v7224_v42  ;;  %v2354_v13 = vrot.slane %v6187_v55, %v7213_v14 }
 0x407   :  { %v2358_v2 = vrot.slane %v6189_v54, %v7224_v42  ;;  %v2362_v60 = vrot.slane %v6189_v54, %v7213_v14  ;;  %v2380_v37 = vrot.slane %v2310_v11, %v7224_v42  ;;  %v2384_v21 = vrot.slane %v2314_v46, %v7224_v42 }
 0x408   :  { %v2388_v40 = vrot.slane %v2318_v6, %v7224_v42  ;;  %v2392_v36 = vrot.slane %v2322_v7, %v7224_v42  ;;  %v2396_v52 = vrot.slane %v2326_v44, %v7224_v42  ;;  %v2400_v24 = vrot.slane %v2330_v51, %v7224_v42 }
 0x409   :  { %v2404_v63 = vrot.slane %v2334_v31, %v7224_v42  ;;  %v2408_v25 = vrot.slane %v2338_v28, %v7224_v42  ;;  %v2412_v26 = vrot.slane %v2342_v18, %v7224_v42  ;;  %v2416_v14 = vrot.slane %v2346_v57, %v7224_v42 }
 0x40a   :  { %v2420_v58 = vrot.slane %v2350_v8, %v7224_v42  ;;  %v2424_v0 = vrot.slane %v2354_v13, %v7224_v42  ;;  %v2428_v34 = vrot.slane %v2358_v2, %v7224_v42  ;;  %v2432_v45 = vrot.slane %v2362_v60, %v7224_v42  ;;  %v2449_v60 = vpop.permute.xlu1 %2448 }
 0x40b   :  { %v2433_v59 = vmul.f32 %v2380_v37, %v2298_v62  ;;  %v2434_v15 = vmul.f32 %v2384_v21, %v2298_v62  ;;  %v2435_v35 = vmul.f32 %v2388_v40, %v2298_v62  ;;  %v2436_v32 = vmul.f32 %v2392_v36, %v2298_v62 }
 0x40c   :  { %v2437_v48 = vmul.f32 %v2396_v52, %v2298_v62  ;;  %v2438_v27 = vmul.f32 %v2400_v24, %v2298_v62  ;;  %v2439_v3 = vmul.f32 %v2404_v63, %v2298_v62  ;;  %v2440_v43 = vmul.f32 %v2408_v25, %v2298_v62 }
 0x40d   :  { %v2454_v29 = vrot.slane %v6177_v20, %v7225_v41  ;;  %v2458_v5 = vrot.slane %v6177_v20, %v7215_v53  ;;  %v2462_v4 = vrot.slane %v6179_v50, %v7225_v41  ;;  %v2466_v19 = vrot.slane %v6179_v50, %v7215_v53 }
 0x40e   :  { %v2470_v23 = vrot.slane %v6181_v10, %v7225_v41  ;;  %v2474_v42 = vrot.slane %v6181_v10, %v7215_v53  ;;  %v2478_v11 = vrot.slane %v6183_v16, %v7225_v41  ;;  %v2482_v46 = vrot.slane %v6183_v16, %v7215_v53 }
 0x40f   :  { %v2486_v6 = vrot.slane %v6185_v33, %v7225_v41  ;;  %v2490_v7 = vrot.slane %v6185_v33, %v7215_v53  ;;  %v2494_v44 = vrot.slane %v6187_v55, %v7225_v41  ;;  %v2441_v51 = vmul.f32 %v2412_v26, %v2298_v62 }
 0x410   :  { %v2442_v31 = vmul.f32 %v2416_v14, %v2298_v62  ;;  %v2498_v28 = vrot.slane %v6187_v55, %v7215_v53  ;;  %v2502_v18 = vrot.slane %v6189_v54, %v7225_v41  ;;  %v2506_v57 = vrot.slane %v6189_v54, %v7215_v53 }
 0x411   :  { %v2524_v8 = vrot.slane %v2454_v29, %v7225_v41  ;;  %v2528_v13 = vrot.slane %v2458_v5, %v7225_v41  ;;  %v2532_v2 = vrot.slane %v2462_v4, %v7225_v41  ;;  %v2536_v37 = vrot.slane %v2466_v19, %v7225_v41 }
 0x412   :  { %v2540_v21 = vrot.slane %v2470_v23, %v7225_v41  ;;  %v2544_v40 = vrot.slane %v2474_v42, %v7225_v41  ;;  %v2548_v36 = vrot.slane %v2478_v11, %v7225_v41  ;;  %v2552_v52 = vrot.slane %v2482_v46, %v7225_v41 }
 0x413   :  { %v2556_v24 = vrot.slane %v2486_v6, %v7225_v41  ;;  %v2560_v53 = vrot.slane %v2490_v7, %v7225_v41  ;;  %v2564_v63 = vrot.slane %v2494_v44, %v7225_v41  ;;  %v2443_v25 = vmul.f32 %v2420_v58, %v2298_v62 }
 0x414   :  { %v2444_v26 = vmul.f32 %v2424_v0, %v2298_v62  ;;  %v2568_v14 = vrot.slane %v2498_v28, %v7225_v41  ;;  %v2572_v29 = vrot.slane %v2502_v18, %v7225_v41  ;;  %v2576_v5 = vrot.slane %v2506_v57, %v7225_v41 }
 0x415   :  { %v2577_v4 = vmul.f32 %v2524_v8, %v2449_v60  ;;  %v2578_v19 = vmul.f32 %v2528_v13, %v2449_v60  ;;  %v2579_v23 = vmul.f32 %v2532_v2, %v2449_v60  ;;  %v2580_v42 = vmul.f32 %v2536_v37, %v2449_v60 }
 0x416   :  { %v2581_v11 = vmul.f32 %v2540_v21, %v2449_v60  ;;  %v2582_v46 = vmul.f32 %v2544_v40, %v2449_v60  ;;  %v2583_v9 = vmul.f32 %v2548_v36, %v2449_v60  ;;  %v2584_v6 = vmul.f32 %v2552_v52, %v2449_v60  ;;  %v2607_v52 = vpop.permute.xlu1 %2606 }
 0x417   :  { %v2585_v39 = vmul.f32 %v2556_v24, %v2449_v60  ;;  %v2586_v7 = vmul.f32 %v2560_v53, %v2449_v60  ;;  %v2587_v61 = vmul.f32 %v2564_v63, %v2449_v60  ;;  %v2445_v44 = vmul.f32 %v2428_v34, %v2298_v62 }
 0x418   :  { %v2446_v58 = vmul.f32 %v2432_v45, %v2298_v62  ;;  %v2588_v0 = vmul.f32 %v2568_v14, %v2449_v60  ;;  %v2589_v30 = vmul.f32 %v2572_v29, %v2449_v60  ;;  %v2590_v28 = vmul.f32 %v2576_v5, %v2449_v60 }
 0x419   :  { %v6275_v38 = vadd.f32 %v2577_v4, %v2433_v59  ;;  %v6277_v18 = vadd.f32 %v2578_v19, %v2434_v15  ;;  %v6279_v41 = vadd.f32 %v2579_v23, %v2435_v35  ;;  %v6281_v57 = vadd.f32 %v2580_v42, %v2436_v32  ;;  %v7226_v35 = vld [vmem:[#allocation75_spill] sm:$0xff] }
 0x41a   :  { %v6283_v8 = vadd.f32 %v2581_v11, %v2437_v48  ;;  %v6285_v13 = vadd.f32 %v2582_v46, %v2438_v27  ;;  %v6287_v2 = vadd.f32 %v2583_v9, %v2439_v3  ;;  %v6289_v37 = vadd.f32 %v2584_v6, %v2440_v43  ;;  %v7227_v6 = vld [vmem:[#allocation76_spill] sm:$0xff] }
 0x41b   :  { %v6291_v62 = vadd.f32 %v2585_v39, %v2441_v51  ;;  %v6293_v34 = vadd.f32 %v2586_v7, %v2442_v31  ;;  %v6295_v45 = vadd.f32 %v2587_v61, %v2443_v25  ;;  %v6297_v59 = vadd.f32 %v2588_v0, %v2444_v26 }
 0x41c   :  { %v2612_v15 = vrot.slane %v6177_v20, %v5812_v49  ;;  %v2616_v32 = vrot.slane %v6177_v20, %v7226_v35  ;;  %v2620_v9 = vrot.slane %v6179_v50, %v5812_v49  ;;  %v2624_v48 = vrot.slane %v6179_v50, %v7226_v35 }
 0x41d   :  { %v2628_v39 = vrot.slane %v6181_v10, %v5812_v49  ;;  %v2632_v61 = vrot.slane %v6181_v10, %v7226_v35  ;;  %v2636_v27 = vrot.slane %v6183_v16, %v5812_v49  ;;  %v2640_v3 = vrot.slane %v6183_v16, %v7226_v35 }
 0x41e   :  { %v2644_v43 = vrot.slane %v6185_v33, %v5812_v49  ;;  %v2648_v51 = vrot.slane %v6185_v33, %v7226_v35  ;;  %v2652_v31 = vrot.slane %v6187_v55, %v5812_v49  ;;  %v6321_v60 = vadd.f32 %v2589_v30, %v2445_v44 }
 0x41f   :  { %v6323_v21 = vadd.f32 %v2590_v28, %v2446_v58  ;;  %v2656_v40 = vrot.slane %v6187_v55, %v7226_v35  ;;  %v2660_v36 = vrot.slane %v6189_v54, %v5812_v49  ;;  %v2664_v24 = vrot.slane %v6189_v54, %v7226_v35 }
 0x420   :  { %v2682_v53 = vrot.slane %v2612_v15, %v5812_v49  ;;  %v2686_v63 = vrot.slane %v2616_v32, %v5812_v49  ;;  %v2690_v25 = vrot.slane %v2620_v9, %v5812_v49  ;;  %v2694_v30 = vrot.slane %v2624_v48, %v5812_v49  ;;  %v6351_v48 = vpop.permute.xlu1 %2764 }
 0x421   :  { %v2698_v26 = vrot.slane %v2628_v39, %v5812_v49  ;;  %v2702_v14 = vrot.slane %v2632_v61, %v5812_v49  ;;  %v2706_v29 = vrot.slane %v2636_v27, %v5812_v49  ;;  %v2710_v5 = vrot.slane %v2640_v3, %v5812_v49 }
 0x422   :  { %v2714_v4 = vrot.slane %v2644_v43, %v5812_v49  ;;  %v2718_v19 = vrot.slane %v2648_v51, %v5812_v49  ;;  %v2722_v23 = vrot.slane %v2652_v31, %v5812_v49  ;;  %v2726_v42 = vrot.slane %v2656_v40, %v5812_v49 }
 0x423   :  { %v2730_v11 = vrot.slane %v2660_v36, %v5812_v49  ;;  %v2770_v46 = vrot.slane %v6177_v20, %v7211_v47  ;;  %v2774_v7 = vrot.slane %v6177_v20, %v7227_v6  ;;  %v2734_v44 = vrot.slane %v2664_v24, %v5812_v49 }
 0x424   :  { %v2735_v58 = vmul.f32 %v2682_v53, %v2607_v52  ;;  %v2736_v0 = vmul.f32 %v2686_v63, %v2607_v52  ;;  %v2778_v28 = vrot.slane %v6179_v50, %v7211_v47  ;;  %v2737_v15 = vmul.f32 %v2690_v25, %v2607_v52 }
 0x425   :  { %v2738_v35 = vmul.f32 %v2694_v30, %v2607_v52  ;;  %v2739_v32 = vmul.f32 %v2698_v26, %v2607_v52  ;;  %v2740_v9 = vmul.f32 %v2702_v14, %v2607_v52  ;;  %v2741_v39 = vmul.f32 %v2706_v29, %v2607_v52 }
 0x426   :  { %v2742_v61 = vmul.f32 %v2710_v5, %v2607_v52  ;;  %v2743_v27 = vmul.f32 %v2714_v4, %v2607_v52  ;;  %v2782_v3 = vrot.slane %v6179_v50, %v7227_v6  ;;  %v2744_v20 = vmul.f32 %v2718_v19, %v2607_v52 }
 0x427   :  { %v2745_v43 = vmul.f32 %v2722_v23, %v2607_v52  ;;  %v2840_v49 = vrot.slane %v2770_v46, %v7211_v47  ;;  %v2844_v51 = vrot.slane %v2774_v7, %v7211_v47  ;;  %v2746_v31 = vmul.f32 %v2726_v42, %v2607_v52 }
 0x428   :  { %v2747_v40 = vmul.f32 %v2730_v11, %v2607_v52  ;;  %v2786_v36 = vrot.slane %v6181_v10, %v7211_v47  ;;  %v2848_v24 = vrot.slane %v2778_v28, %v7211_v47  ;;  %v6360_v53 = vmul.f32 %v2734_v44, %v2607_v52 }
 0x429   :  { %v2749_v63 = vadd.f32 %v2735_v58, %v6275_v38  ;;  %v2893_v25 = vmul.f32 %v2840_v49, %v6351_v48  ;;  %v2894_v50 = vmul.f32 %v2844_v51, %v6351_v48  ;;  %v2750_v30 = vadd.f32 %v2736_v0, %v6277_v18 }
 0x42a   :  { %v2790_v26 = vrot.slane %v6181_v10, %v7227_v6  ;;  %v2852_v14 = vrot.slane %v2782_v3, %v7211_v47  ;;  %v2895_v29 = vmul.f32 %v2848_v24, %v6351_v48  ;;  %v2751_v5 = vadd.f32 %v2737_v15, %v6279_v41  ;;  %v7229_v15 = vld [vmem:[#allocation69_spill] sm:$0xff]  ;;  %v7230_v3 = vld [vmem:[#allocation79_spill] sm:$0xff] }
 0x42b   :  { %v2752_v52 = vadd.f32 %v2738_v35, %v6281_v57  ;;  %v2753_v4 = vadd.f32 %v2739_v32, %v6283_v8  ;;  %v2794_v38 = vrot.slane %v6183_v16, %v7211_v47  ;;  %v2754_v19 = vadd.f32 %v2740_v9, %v6285_v13 }
 0x42c   :  { %v2755_v18 = vadd.f32 %v2741_v39, %v6287_v2  ;;  %v2856_v23 = vrot.slane %v2786_v36, %v7211_v47  ;;  %v2896_v10 = vmul.f32 %v2852_v14, %v6351_v48  ;;  %v2756_v42 = vadd.f32 %v2742_v61, %v6289_v37 }
 0x42d   :  { %v2798_v41 = vrot.slane %v6183_v16, %v7227_v6  ;;  %v6382_v11 = vadd.f32 %v2893_v25, %v2749_v63  ;;  %v6384_v57 = vadd.f32 %v2894_v50, %v2750_v30  ;;  %v2757_v8 = vadd.f32 %v2743_v27, %v6291_v62  ;;  %v7228_v62 = vld [vmem:[#allocation68_spill] sm:$0xff] }
 0x42e   :  { %v2860_v46 = vrot.slane %v2790_v26, %v7211_v47  ;;  %v2897_v13 = vmul.f32 %v2856_v23, %v6351_v48  ;;  %v6389_v2 = vadd.f32 %v2895_v29, %v2751_v5  ;;  %v2758_v7 = vadd.f32 %v2744_v20, %v6293_v34 }
 0x42f   :  { %v2759_v44 = vadd.f32 %v2745_v43, %v6295_v45  ;;  %v2802_v37 = vrot.slane %v6185_v33, %v7211_v47  ;;  %v2864_v16 = vrot.slane %v2794_v38, %v7211_v47  ;;  %v6397_v0 = vadd.f32 %v2896_v10, %v2752_v52 }
 0x430   :  { %v2898_v58 = vmul.f32 %v2860_v46, %v6351_v48  ;;  %v2921_v28 = vmul.f32 %v6382_v11, %v7228_v62  ;;  %v2922_v35 = vmul.f32 %v6384_v57, %v7229_v15  ;;  %v2760_v32 = vadd.f32 %v2746_v31, %v6297_v59 }
 0x431   :  { %v2806_v34 = vrot.slane %v6185_v33, %v7227_v6  ;;  %v2810_v45 = vrot.slane %v6187_v55, %v7211_v47  ;;  %v2868_v9 = vrot.slane %v2798_v41, %v7211_v47  ;;  %v2761_v39 = vadd.f32 %v2747_v40, %v6321_v60  ;;  %v7231_v60 = vld [vmem:[#allocation80_spill] sm:$0xff] }
 0x432   :  { %v2899_v61 = vmul.f32 %v2864_v16, %v6351_v48  ;;  %v6411_v27 = vadd.f32 %v2897_v13, %v2753_v4  ;;  %v2923_v20 = vmul.f32 %v6389_v2, %v7230_v3  ;;  %v2814_v59 = vrot.slane %v6187_v55, %v7227_v6 }
 0x433   :  { %v2818_v33 = vrot.slane %v6189_v54, %v7211_v47  ;;  %v2872_v43 = vrot.slane %v2802_v37, %v7211_v47  ;;  %v2900_v49 = vmul.f32 %v2868_v9, %v6351_v48  ;;  %v6421_v51 = vadd.f32 %v2898_v58, %v2754_v19 }
 0x434   :  { %v2924_v31 = vmul.f32 %v6397_v0, %v7231_v60  ;;  %v2935_v40 = vsel %vm105_vm0, %v2921_v28, 0.0  ;;  %v2936_v36 = vsel %vm105_vm0, %v2922_v35, 0.0  ;;  %v2822_v24 = vrot.slane %v6189_v54, %v7227_v6 }
 0x435   :  { %v2876_v55 = vrot.slane %v2806_v34, %v7211_v47  ;;  %v2880_v63 = vrot.slane %v2810_v45, %v7211_v47  ;;  %v2937_v25 = vadd.f32 %v2936_v36, %v2935_v40  ;;  %v2901_v50 = vmul.f32 %v2872_v43, %v6351_v48 }
 0x436   :  { %v6432_v30 = vadd.f32 %v2899_v61, %v2755_v18  ;;  %v2925_v26 = vmul.f32 %v6411_v27, %v5862_v12  ;;  %v2938_v14 = vsel %vm105_vm0, %v2923_v20, 0.0  ;;  %v2884_v29 = vrot.slane %v2814_v59, %v7211_v47 }
 0x437   :  { %v2902_v5 = vmul.f32 %v2876_v55, %v6351_v48  ;;  %v6439_v52 = vadd.f32 %v2900_v49, %v2756_v42  ;;  %v2939_v54 = vadd.f32 %v2938_v14, %v2937_v25  ;;  %v2926_v6 = vmul.f32 %v6421_v51, %v5865_v17  ;;  %v7234_v14 = vld [vmem:[#allocation14_spill] sm:$0xff] }
 0x438   :  { %v2940_v4 = vsel %vm105_vm0, %v2924_v31, 0.0  ;;  %v2964_v38 = vmul.f32 %v2921_v28, %v6382_v11  ;;  %v2965_v19 = vmul.f32 %v2922_v35, %v6384_v57  ;;  %v2888_v12 = vrot.slane %v2818_v33, %v7211_v47  ;;  %v7232_v33 = vld [vmem:[#allocation81_spill] sm:$0xff] }
 0x439   :  { %v2892_v18 = vrot.slane %v2822_v24, %v7211_v47  ;;  %v2903_v23 = vmul.f32 %v2880_v63, %v6351_v48  ;;  %v2941_v10 = vadd.f32 %v2940_v4, %v2939_v54  ;;  %v6449_v41 = vadd.f32 %v2901_v50, %v2757_v8 }
 0x43a   :  { %v2927_v42 = vmul.f32 %v6432_v30, %v5871_v56  ;;  %v2942_v17 = vsel %vm105_vm0, %v2925_v26, 0.0  ;;  %v2966_v46 = vmul.f32 %v2923_v20, %v6389_v2  ;;  %v2904_v13 = vmul.f32 %v2884_v29, %v6351_v48 }
 0x43b   :  { %v6456_v37 = vadd.f32 %v2902_v5, %v2758_v7  ;;  %v2928_v16 = vmul.f32 %v6439_v52, %v5880_v22  ;;  %v2943_v47 = vadd.f32 %v2942_v17, %v2941_v10  ;;  %v2944_v58 = vsel %vm105_vm0, %v2926_v6, 0.0  ;;  %v7236_v10 = vld [vmem:[#allocation31_spill] sm:$0xff] }
 0x43c   :  { %v2967_v8 = vmul.f32 %v2924_v31, %v6397_v0  ;;  %v2978_v62 = vsel %vm105_vm0, %v2964_v38, 0.0  ;;  %v2979_v56 = vsel %vm105_vm0, %v2965_v19, 0.0  ;;  %v2905_v28 = vmul.f32 %v2888_v12, %v6351_v48 }
 0x43d   :  { %v6465_v15 = vadd.f32 %v2903_v23, %v2759_v44  ;;  %v2945_v35 = vadd.f32 %v2944_v58, %v2943_v47  ;;  %v2980_v34 = vadd.f32 %v2979_v56, %v2978_v62  ;;  %v2929_v7 = vmul.f32 %v6449_v41, %v5905_v1 }
 0x43e   :  { %v2946_v22 = vsel %vm105_vm0, %v2927_v42, 0.0  ;;  %v2968_v45 = vmul.f32 %v2925_v26, %v6411_v27  ;;  %v2981_v9 = vsel %vm105_vm0, %v2966_v46, 0.0  ;;  %v2906_v61 = vmul.f32 %v2892_v18, %v6351_v48 }
 0x43f   :  { %v6473_v3 = vadd.f32 %v2904_v13, %v2760_v32  ;;  %v2947_v20 = vadd.f32 %v2946_v22, %v2945_v35  ;;  %v2982_v59 = vadd.f32 %v2981_v9, %v2980_v34  ;;  %v2930_v44 = vmul.f32 %v6456_v37, %v7232_v33  ;;  %v7233_v32 = vld [vmem:[#allocation83_spill] sm:$0xff] }
 0x440   :  { %v2948_v43 = vsel %vm105_vm0, %v2928_v16, 0.0  ;;  %v2969_v49 = vmul.f32 %v2926_v6, %v6421_v51  ;;  %v2983_v1 = vsel %vm105_vm0, %v2967_v8, 0.0  ;;  %v2762_v60 = vadd.f32 %v6360_v53, %v6323_v21  ;;  %v7235_v6 = vld [vmem:[#allocation94_spill] sm:$0xff] }
 0x441   :  { %v6482_v31 = vadd.f32 %v2905_v28, %v2761_v39  ;;  %v2949_v40 = vadd.f32 %v2948_v43, %v2947_v20  ;;  %v2984_v48 = vadd.f32 %v2983_v1, %v2982_v59  ;;  %v2931_v36 = vmul.f32 %v6465_v15, %v7233_v32 }
 0x442   :  { %v2950_v24 = vsel %vm105_vm0, %v2929_v7, 0.0  ;;  %v2970_v55 = vmul.f32 %v2927_v42, %v6432_v30  ;;  %v2985_v63 = vsel %vm105_vm0, %v2968_v45, 0.0  ;;  %v6489_v25 = vadd.f32 %v2906_v61, %v2762_v60 }
 0x443   :  { %v2951_v50 = vadd.f32 %v2950_v24, %v2949_v40  ;;  %v2986_v26 = vadd.f32 %v2985_v63, %v2984_v48  ;;  %v2932_v21 = vmul.f32 %v6473_v3, %v7234_v14  ;;  %v2952_v53 = vsel %vm105_vm0, %v2930_v44, 0.0 }
 0x444   :  { %v2971_v39 = vmul.f32 %v2928_v16, %v6439_v52  ;;  %v2987_v29 = vsel %vm105_vm0, %v2969_v49, 0.0  ;;  %v2933_v4 = vmul.f32 %v6482_v31, %v7235_v6  ;;  %v2954_v38 = vsel %vm105_vm0, %v2931_v36, 0.0 }
 0x445   :  { %v2953_v5 = vadd.f32 %v2952_v53, %v2951_v50  ;;  %v2988_v54 = vadd.f32 %v2987_v29, %v2986_v26  ;;  %v2972_v19 = vmul.f32 %v2929_v7, %v6449_v41  ;;  %v2989_v12 = vsel %vm105_vm0, %v2970_v55, 0.0  ;;  %v3011_v50 = vld [vmem:[%s6567_s6] sm:$0xf] }
 0x446   :  { %v2934_v42 = vmul.f32 %v6489_v25, %v7236_v10  ;;  %v2956_v17 = vsel %vm105_vm0, %v2932_v21, 0.0  ;;  %v2973_v46 = vmul.f32 %v2930_v44, %v6456_v37  ;;  %v2991_v13 = vsel %vm105_vm0, %v2971_v39, 0.0 }
 0x447   :  { %v2955_v18 = vadd.f32 %v2954_v38, %v2953_v5  ;;  %v2990_v23 = vadd.f32 %v2989_v12, %v2988_v54  ;;  %v2958_v58 = vsel %vm105_vm0, %v2933_v4, 0.0  ;;  %v2974_v8 = vmul.f32 %v2931_v36, %v6465_v15 }
 0x448   :  { %v2993_v62 = vsel %vm105_vm0, %v2972_v19, 0.0  ;;  %v2960_v35 = vsel %vm2176_vm12, %v2934_v42, 0.0  ;;  %v2975_v34 = vmul.f32 %v2932_v21, %v6473_v3  ;;  %v2995_v7 = vsel %vm105_vm0, %v2973_v46, 0.0  ;;  %v3015_v21 = vld [vmem:[%s6568_s7] sm:$0xf] }
 0x449   :  { %v2957_v16 = vadd.f32 %v2956_v17, %v2955_v18  ;;  %v2992_v47 = vadd.f32 %v2991_v13, %v2990_v23  ;;  %v2976_v9 = vmul.f32 %v2933_v4, %v6482_v31  ;;  %v2997_v61 = vsel %vm105_vm0, %v2974_v8, 0.0 }
 0x44a   :  { %v2977_v59 = vmul.f32 %v2934_v42, %v6489_v25  ;;  %v2999_v33 = vsel %vm105_vm0, %v2975_v34, 0.0 }
 0x44b   :  { %v2959_v56 = vadd.f32 %v2958_v58, %v2957_v16  ;;  %v2994_v28 = vadd.f32 %v2993_v62, %v2992_v47  ;;  %v3001_v43 = vsel %vm105_vm0, %v2976_v9, 0.0 }
 0x44c   :  { %v3003_v1 = vsel %vm2176_vm12, %v2977_v59, 0.0 }
 0x44d   :  { %v2961_v22 = vadd.f32 %v2960_v35, %v2959_v56  ;;  %v2996_v45 = vadd.f32 %v2995_v7, %v2994_v28 }
 0x44f   :  { %2962 = vadd.xlane.f32.xlu1 %v2961_v22  ;;  %v2998_v20 = vadd.f32 %v2997_v61, %v2996_v45 }
 0x451   :  { %v3000_v44 = vadd.f32 %v2999_v33, %v2998_v20 }
 0x453   :  { %v3002_v49 = vadd.f32 %v3001_v43, %v3000_v44 }
 0x455   :  { %v3004_v60 = vadd.f32 %v3003_v1, %v3002_v49 }
 0x457   :  { %3005 = vadd.xlane.f32.xlu0 %v3004_v60 }
 0x4dc   :  { %v2963_v40 = vpop.xlane.xlu1 %2962 }
 0x4dd   :  { %v3007_v48 = vmul.f32 0.0009765625, %v2963_v40 }
 0x4df   :  { %v3009_v32 = vmul.f32 %v3007_v48, %v3007_v48 }
 0x4e4   :  { %v3006_v36 = vpop.xlane.xlu0 %3005 }
 0x4e5   :  { %v3008_v24 = vmul.f32 0.0009765625, %v3006_v36 }
 0x4e7   :  { %v3010_v55 = vsub.f32 %v3008_v24, %v3009_v32 }
 0x4e9   :  { %v3012_v63 = vadd.f32 1e-05, %v3010_v55 }
 0x4eb   :  { %3199 = vrsqrt.f32 %v3012_v63 }
 0x4f5   :  { %v3200_v26 = vpop.eup %3199 }
 0x4f6   :  { %v3014_v14 = vmul.f32 %v3200_v26, %v3011_v50 }
 0x4f8   :  { %3020 = vperm.xlu1 %3196, %v3014_v14   ;;  %v3016_v53 = vmul.f32 %v3014_v14, %v3007_v48 }
 0x4fa   :  { %v3017_v39 = vsub.f32 %v3015_v21, %v3016_v53 }
 0x4fc   :  { %3039 = vperm.xlu0 %3191, %v3017_v39  }
 0x577   :  { %v3021_v29 = vpop.permute.xlu1 %3020 }
 0x578   :  { %v3023_v5 = vmul.f32 %v3021_v29, %v6382_v11  ;;  %v3024_v54 = vmul.f32 %v3021_v29, %v6384_v57  ;;  %v3025_v6 = vmul.f32 %v3021_v29, %v6389_v2  ;;  %v3026_v4 = vmul.f32 %v3021_v29, %v6397_v0 }
 0x579   :  { %v3027_v38 = vmul.f32 %v3021_v29, %v6411_v27  ;;  %v3028_v19 = vmul.f32 %v3021_v29, %v6421_v51  ;;  %v3029_v12 = vmul.f32 %v3021_v29, %v6432_v30  ;;  %v3030_v18 = vmul.f32 %v3021_v29, %v6439_v52 }
 0x57a   :  { %v3031_v23 = vmul.f32 %v3021_v29, %v6449_v41  ;;  %v3032_v10 = vmul.f32 %v3021_v29, %v6456_v37  ;;  %v3033_v11 = vmul.f32 %v3021_v29, %v6465_v15  ;;  %v3034_v57 = vmul.f32 %v3021_v29, %v6473_v3 }
 0x57b   :  { %v3035_v2 = vmul.f32 %v3021_v29, %v6482_v31  ;;  %v3036_v0 = vmul.f32 %v3021_v29, %v6489_v25  ;;  %v3040_v42 = vpop.permute.xlu0 %3039 }
 0x57c   :  { %v3042_v27 = vadd.f32 %v3040_v42, %v3023_v5  ;;  %v3043_v17 = vadd.f32 %v3040_v42, %v3024_v54  ;;  %v3044_v51 = vadd.f32 %v3040_v42, %v3025_v6  ;;  %v3045_v46 = vadd.f32 %v3040_v42, %v3026_v4 }
 0x57d   :  { %v3046_v30 = vadd.f32 %v3040_v42, %v3027_v38  ;;  %v3047_v13 = vadd.f32 %v3040_v42, %v3028_v19  ;;  %v3048_v52 = vadd.f32 %v3040_v42, %v3029_v12  ;;  %v3049_v16 = vadd.f32 %v3040_v42, %v3030_v18 }
 0x57e   :  { %v3050_v41 = vadd.f32 %v3040_v42, %v3031_v23  ;;  %v3051_v47 = vadd.f32 %v3040_v42, %v3032_v10  ;;  %v3052_v37 = vadd.f32 %v3040_v42, %v3033_v11  ;;  %v3053_v58 = vadd.f32 %v3040_v42, %v3034_v57 }
 0x57f   :  { %v3054_v15 = vadd.f32 %v3040_v42, %v3035_v2  ;;  %v3055_v8 = vadd.f32 %v3040_v42, %v3036_v0  ;;  %v3056_v3 = vmax.f32 %v3042_v27, 0.0  ;;  %v3057_v62 = vmax.f32 %v3043_v17, 0.0 }
 0x580   :  { %v3058_v31 = vmax.f32 %v3044_v51, 0.0  ;;  %v3059_v56 = vmax.f32 %v3045_v46, 0.0  ;;  %v3060_v25 = vmax.f32 %v3046_v30, 0.0  ;;  %v3061_v28 = vmax.f32 %v3047_v13, 0.0 }
 0x581   :  { %v3062_v35 = vmax.f32 %v3048_v52, 0.0  ;;  %v3063_v34 = vmax.f32 %v3049_v16, 0.0  ;;  %v3064_v7 = vmax.f32 %v3050_v41, 0.0  ;;  %v3065_v22 = vmax.f32 %v3051_v47, 0.0 }
 0x582   :  { %v3066_v45 = vmax.f32 %v3052_v37, 0.0  ;;  %v3067_v9 = vmax.f32 %v3053_v58, 0.0  ;;  %v3068_v61 = vmax.f32 %v3054_v15, 0.0  ;;  %v3069_v20 = vmax.f32 %v3055_v8, 0.0 }
 0x583   :  { %v3084_v59 = vcombine.low %v3056_v3, %v3057_v62  ;;  %v3085_v33 = vcombine.low %v3058_v31, %v3059_v56  ;;  %v3086_v44 = vcombine.low %v3060_v25, %v3061_v28  ;;  %v3087_v43 = vcombine.low %v3062_v35, %v3063_v34 }
 0x584   :  { %v3088_v49 = vcombine.low %v3064_v7, %v3065_v22  ;;  %v3089_v1 = vcombine.low %v3066_v45, %v3067_v9  ;;  %v3090_v60 = vcombine.low %v3068_v61, %v3069_v20 }
 0x585   :  { %3098 = vst [vmem:[%s6569_s8] sm:$0xff] %v3084_v59  ;;  %3099 = vst [vmem:[%s6569_s8 + $0x8] sm:$0xff] %v3085_v33 }
 0x586   :  { %3100 = vst [vmem:[%s6569_s8 + $0x10] sm:$0xff] %v3086_v44  ;;  %3101 = vst [vmem:[%s6569_s8 + $0x18] sm:$0xff] %v3087_v43 }
 0x587   :  { %3102 = vst [vmem:[%s6569_s8 + $0x20] sm:$0xff] %v3088_v49  ;;  %3103 = vst [vmem:[%s6569_s8 + $0x28] sm:$0xff] %v3089_v1 }
 0x588   :  { %3106 = vst.msk [vmem:[%s6569_s8 + $0x30] sm:$0xff] %vm3105_vm14, %v3090_v60 }

</bundles_post_ra>
